<compile_context>
chip_gen: v7x
topology: tpu7x:2x2x1
jax: 0.10.0
libtpu: 0.0.40
codegen_flags: <defaults>
</compile_context>

<pallas_src>
import math
from functools import partial

import numpy as np
import jax
import jax.numpy as jnp
from jax.experimental import pallas as pl
from jax.experimental.pallas import tpu as pltpu

# ----------------------------- synthetic config -----------------------------
IMAGE_SIZE = 32          # vision_config.image_size
PATCH_SIZE = 8           # vision_config.patch_size
NUM_CHANNELS = 3
VIS_HIDDEN = 32          # vision_config.hidden_size == image_dim_out
VIS_INTERMEDIATE = 64    # vision_config.intermediate_size
NUM_HEADS = 2
HEAD_DIM = VIS_HIDDEN // NUM_HEADS
NUM_LAYERS = 2           # num_hidden_layers=2, feature_layer=-1 -> keep 2 layers
LM_HIDDEN = 64           # config.hidden_size (language model)
CROP_SIZE = 32           # vision_config.crop_size
N_PATCHES = IMAGE_SIZE // PATCH_SIZE          # 4 -> even, no ReflectionPad2d
NUM_POSITIONS = N_PATCHES * N_PATCHES         # 16
LN_EPS = 1e-6
VMEM_LIMIT = 32 * 1024 * 1024   # explicit, safe on v5e/v6e/v7x


# ------------------------------ helpers (in-kernel) ---------------------------
def _ln(x, g, b, eps):
    x = x.astype(jnp.float32)
    mean = jnp.mean(x, axis=-1, keepdims=True)
    var = jnp.mean(jnp.square(x - mean), axis=-1, keepdims=True)
    return (x - mean) * jax.lax.rsqrt(var + eps) * g + b


# --------------------------- fused vision-tower kernel ------------------------
def _vit_tower_kernel(patches_ref, pw_ref, pb_ref, pos_ref, poolsel_ref,
                      ln1g_ref, ln1b_ref,
                      wq_ref, wk_ref, wv_ref, bq_ref, bk_ref, bv_ref,
                      wo_ref, bo_ref,
                      ln2g_ref, ln2b_ref, fc1w_ref, fc1b_ref, fc2w_ref, fc2b_ref,
                      o_ref, *, num_layers, num_heads, head_dim, n_crops, seq,
                      s_out, eps):
    D = num_heads * head_dim
    M = n_crops * seq                      # rows processed per grid step
    scale = head_dim ** -0.5
    bf16 = jnp.bfloat16

    # Patch embedding: Conv2d(kernel=stride=patch) == im2col (wrapper) + matmul.
    # Patches arrive in bf16 (halves the only per-step HBM->VMEM DMA).
    hidden = (jnp.dot(patches_ref[0], pw_ref[...],
                      preferred_element_type=jnp.float32)
              + pb_ref[...] + pos_ref[...])                     # (M, D) f32
    # TODO(synk): non-full patch_attention_mask (in-tower attention masking and
    #             fractional bucketized position ids) not implemented; all-ones
    #             assumed inside the tower.

    for l in range(num_layers):
        # ---- attention block: LN1 fused into per-head QKV projections ----
        h_bf = _ln(hidden, ln1g_ref[l], ln1b_ref[l], eps).astype(bf16)
        attn = bo_ref[l]                                        # (1, D) f32, broadcasts
        for hh in range(num_heads):
            q = (jnp.dot(h_bf, wq_ref[l, hh], preferred_element_type=jnp.float32)
                 + bq_ref[l, hh]).reshape(n_crops, seq, head_dim)
            k = (jnp.dot(h_bf, wk_ref[l, hh], preferred_element_type=jnp.float32)
                 + bk_ref[l, hh]).reshape(n_crops, seq, head_dim)
            v = (jnp.dot(h_bf, wv_ref[l, hh], preferred_element_type=jnp.float32)
                 + bv_ref[l, hh]).reshape(n_crops, seq, head_dim)
            # per-crop attention, batched over the G crops of this grid step
            s = jnp.einsum("gqd,gkd->gqk", q.astype(bf16), k.astype(bf16),
                           preferred_element_type=jnp.float32) * scale
            s = s - jnp.max(s, axis=-1, keepdims=True)
            p = jnp.exp(s)
            p = p * pl.reciprocal(jnp.sum(p, axis=-1, keepdims=True), approx=True)
            head = jnp.einsum("gqk,gkd->gqd", p.astype(bf16), v.astype(bf16),
                              preferred_element_type=jnp.float32)
            head2 = head.reshape(M, head_dim).astype(bf16)
            # concat(heads) @ Wo == sum_h head_h @ Wo[h*Dh:(h+1)*Dh, :]
            attn = attn + jnp.dot(head2, wo_ref[l, hh],
                                  preferred_element_type=jnp.float32)
        hidden = hidden + attn

        # ---- MLP block: LN2 + fc1 (gelu_pytorch_tanh) + fc2 ----
        h = _ln(hidden, ln2g_ref[l], ln2b_ref[l], eps)
        h = (jnp.dot(h.astype(bf16), fc1w_ref[l],
                     preferred_element_type=jnp.float32) + fc1b_ref[l])
        h = jax.nn.gelu(h, approximate=True)                    # f32 on VPU/EUP
        h = (jnp.dot(h.astype(bf16), fc2w_ref[l],
                     preferred_element_type=jnp.float32) + fc2b_ref[l])
        hidden = hidden + h

    # require_post_norm=False -> no final layernorm.
    # AvgPool2d(2,2) token compression as per-output-position selector matmuls;
    # the result is written lane-dense as (G, S_out*D) (a multiple of 128 lanes).
    out_cols = [jnp.dot(poolsel_ref[i], hidden, preferred_element_type=jnp.float32)
                for i in range(s_out)]                          # each (G, D)
    o_ref[0] = jnp.concatenate(out_cols, axis=-1).astype(o_ref.dtype)


def _make_pool_selector(nph, npw, n_crops):
    """Selector tensor P of shape (S_out, G, G*S) so that
       (P[i] @ hidden)[g, :] = AvgPool2d(2,2) of crop g at pooled position i."""
    oh, ow = nph // 2, npw // 2
    S = nph * npw
    s_out = oh * ow
    P = np.zeros((s_out, n_crops, n_crops * S), np.float32)
    for g in range(n_crops):
        for oi in range(oh):
            for oj in range(ow):
                o = oi * ow + oj
                for di in range(2):
                    for dj in range(2):
                        P[o, g, g * S + (2 * oi + di) * npw + (2 * oj + dj)] = 0.25
    return jnp.asarray(P)


def _pick_crop_batch(n_crops_total, seq):
    """Crops per grid step: ~128 rows per step, and keep >=2 grid steps when
    possible so v7x's two TensorCores both get work ("parallel" grid axis)."""
    g_target = max(1, 128 // seq)
    G = 1
    for g in range(1, min(g_target, n_crops_total) + 1):
        if n_crops_total % g == 0:
            G = g
    if G == n_crops_total and n_crops_total > 1:
        for g in range(n_crops_total // 2, 0, -1):
            if n_crops_total % g == 0:
                G = g
                break
    return G, n_crops_total // G


def fused_vit_forward(params, pixel_values):
    """pixel_values: (N, 3, H, W) NCHW (matches torch Conv2d input).
    Returns (N, (H/ps/2)*(W/ps/2), D): tower output already 2x2-avg-pooled."""
    N, C, Hpx, Wpx = pixel_values.shape
    ps = PATCH_SIZE
    nph, npw = Hpx // ps, Wpx // ps
    S, D, K, L = nph * npw, VIS_HIDDEN, C * ps * ps, NUM_LAYERS
    H, Dh, I = NUM_HEADS, HEAD_DIM, VIS_INTERMEDIATE
    S_out = (nph // 2) * (npw // 2)
    # TODO(synk): ReflectionPad2d((0,1,0,1)) branch for odd n_patches not implemented.

    G, steps = _pick_crop_batch(N, S)
    M = G * S                                            # rows per grid step

    # im2col in bf16: one (G*S, C*ps*ps) row-matrix per grid step.
    patches = (pixel_values.reshape(N, C, nph, ps, npw, ps)
               .transpose(0, 2, 4, 1, 3, 5)
               .reshape(steps, M, K)
               .astype(jnp.bfloat16))

    patch_w = params["patch_w"].reshape(D, K).T.astype(jnp.bfloat16)   # (K, D)
    patch_b = params["patch_b"].reshape(1, D)
    pos_emb = jnp.tile(params["pos_emb"][:S, :], (G, 1))                # (M, D) f32
    poolsel = _make_pool_selector(nph, npw, G)                          # (S_out, G, M)

    layers = params["layers"]

    def stackvec(name):                                  # (L, 1, ·) f32 (bias / LN)
        return jnp.stack([l[name].reshape(1, -1) for l in layers])

    def stackmat_bf16(name):                             # (L, ·, ·) bf16 (MXU weight)
        return jnp.stack([l[name] for l in layers]).astype(jnp.bfloat16)

    def split_heads_w(name):                             # (L, H, D, Dh) bf16
        return jnp.stack([jnp.stack([l[name][:, h * Dh:(h + 1) * Dh]
                                     for h in range(H)]) for l in layers]
                         ).astype(jnp.bfloat16)

    def split_heads_b(name):                             # (L, H, 1, Dh) f32
        return jnp.stack([jnp.stack([l[name][h * Dh:(h + 1) * Dh].reshape(1, Dh)
                                     for h in range(H)]) for l in layers])

    def split_heads_wo():                                # (L, H, Dh, D) bf16
        return jnp.stack([jnp.stack([l["wo"][h * Dh:(h + 1) * Dh, :]
                                     for h in range(H)]) for l in layers]
                         ).astype(jnp.bfloat16)

    ln1_g, ln1_b = stackvec("ln1_g"), stackvec("ln1_b")
    wq, wk, wv = split_heads_w("wq"), split_heads_w("wk"), split_heads_w("wv")
    bq, bk, bv = split_heads_b("bq"), split_heads_b("bk"), split_heads_b("bv")
    wo, bo = split_heads_wo(), stackvec("bo")
    ln2_g, ln2_b = stackvec("ln2_g"), stackvec("ln2_b")
    fc1_w, fc1_b = stackmat_bf16("fc1_w"), stackvec("fc1_b")
    fc2_w, fc2_b = stackmat_bf16("fc2_w"), stackvec("fc2_b")

    # Weight blocks are identical for every grid step and stay resident in VMEM.
    # NOTE: at real Phi-4MM sizes (D=1152, I=4304, L=27) the resident-weight
    # design must switch to per-layer streaming (layer grid axis / emit_pipeline)
    # and single-buffered constant weights, especially on v7x's 64 MiB VMEM.
    def rep(shape):
        nd = len(shape)
        return pl.BlockSpec(shape, lambda i, nd=nd: (0,) * nd)

    out = pl.pallas_call(
        partial(_vit_tower_kernel, num_layers=L, num_heads=H, head_dim=Dh,
                n_crops=G, seq=S, s_out=S_out, eps=LN_EPS),
        out_shape=jax.ShapeDtypeStruct((steps, G, S_out * D), jnp.float32),
        grid=(steps,),
        in_specs=[
            pl.BlockSpec((1, M, K), lambda i: (i, 0, 0)),
            rep((K, D)), rep((1, D)), rep((M, D)), rep((S_out, G, M)),
            rep((L, 1, D)), rep((L, 1, D)),
            rep((L, H, D, Dh)), rep((L, H, D, Dh)), rep((L, H, D, Dh)),
            rep((L, H, 1, Dh)), rep((L, H, 1, Dh)), rep((L, H, 1, Dh)),
            rep((L, H, Dh, D)), rep((L, 1, D)),
            rep((L, 1, D)), rep((L, 1, D)),
            rep((L, D, I)), rep((L, 1, I)),
            rep((L, I, D)), rep((L, 1, D)),
        ],
        out_specs=pl.BlockSpec((1, G, S_out * D), lambda i: (i, 0, 0)),
        compiler_params=pltpu.CompilerParams(
            dimension_semantics=("parallel",),
            vmem_limit_bytes=VMEM_LIMIT),
    )(patches, patch_w, patch_b, pos_emb, poolsel,
      ln1_g, ln1_b, wq, wk, wv, bq, bk, bv, wo, bo,
      ln2_g, ln2_b, fc1_w, fc1_b, fc2_w, fc2_b)

    return out.reshape(N, S_out, D)


# ------------------------------ batched projector -----------------------------
def _projector_kernel(x_ref, wu_ref, bu_ref, wd_ref, bd_ref, o_ref):
    # Phi4MMProjector: up -> exact (erf) gelu -> down, fused; bf16 MXU, f32 acc.
    h = (jnp.dot(x_ref[...], wu_ref[...], preferred_element_type=jnp.float32)
         + bu_ref[...])
    h = jax.nn.gelu(h, approximate=False)
    o = (jnp.dot(h.astype(jnp.bfloat16), wd_ref[...],
                 preferred_element_type=jnp.float32) + bd_ref[...])
    o_ref[...] = o.astype(o_ref.dtype)


def pallas_projector_batched(x, wu, bu, wd, bd, tm=128):
    """x: (sum_of_tokens, D) for ALL images at once; one pallas_call.
    128-row tiles + output padded to a 128-column (lane-dense) block."""
    Mrows, Kin = x.shape
    Hd = wu.shape[1]
    Od = wd.shape[1]
    Od_pad = ((Od + 127) // 128) * 128
    Mp = ((Mrows + tm - 1) // tm) * tm

    xp = jnp.pad(x, ((0, Mp - Mrows), (0, 0))).astype(jnp.bfloat16)
    wup = wu.astype(jnp.bfloat16)
    bup = bu.reshape(1, -1)
    wdp = jnp.pad(wd, ((0, 0), (0, Od_pad - Od))).astype(jnp.bfloat16)
    bdp = jnp.pad(bd.reshape(1, -1), ((0, 0), (0, Od_pad - Od)))

    out = pl.pallas_call(
        _projector_kernel,
        out_shape=jax.ShapeDtypeStruct((Mp, Od_pad), jnp.float32),
        grid=(Mp // tm,),
        in_specs=[pl.BlockSpec((tm, Kin), lambda i: (i, 0)),
                  pl.BlockSpec((Kin, Hd), lambda i: (0, 0)),
                  pl.BlockSpec((1, Hd), lambda i: (0, 0)),
                  pl.BlockSpec((Hd, Od_pad), lambda i: (0, 0)),
                  pl.BlockSpec((1, Od_pad), lambda i: (0, 0))],
        out_specs=pl.BlockSpec((tm, Od_pad), lambda i: (i, 0)),
        compiler_params=pltpu.CompilerParams(
            dimension_semantics=("parallel",),
            vmem_limit_bytes=VMEM_LIMIT),
    )(xp, wup, bup, wdp, bdp)
    return out[:Mrows, :Od]


# ------------------- host-side ragged stitching -> gather indices -------------
def _image_token_indices(img_idx, hr, wr, mask_np, base, ncrops, s_out, n_feat_rows):
    """Token gather indices for one image, mirroring the PyTorch per-image
    stitching.  Pure host numpy/python: no device ops, no syncs."""
    SUB = n_feat_rows          # sub_img_feature_extensor row in the gather source
    GLB = n_feat_rows + 1      # global_img_feature_extensor row
    area = hr * wr

    # pooled-grid attention mask of the sub crops, stitched to (hr*base, wr*base)
    m = np.asarray(mask_np)[img_idx, 1:area + 1, 0::2, 0::2]
    m = m.reshape(hr, wr, base, base).transpose(0, 2, 1, 3).reshape(hr * base, wr * base)
    useful_h = int(m[:, 0].sum())
    useful_w = int(m[0, :].sum())

    idxs = []
    # sub-image grid (cropped to useful_h x useful_w) + one sub extensor per row
    for R in range(useful_h):
        hrow, pr = divmod(R, base)
        for Ccol in range(useful_w):
            wcol, pc = divmod(Ccol, base)
            crop = 1 + hrow * wr + wcol
            idxs.append((img_idx * ncrops + crop) * s_out + pr * base + pc)
        idxs.append(SUB)
    # global extensor token
    idxs.append(GLB)
    # global crop + one sub extensor per row
    for pr in range(base):
        for pc in range(base):
            idxs.append((img_idx * ncrops + 0) * s_out + pr * base + pc)
        idxs.append(SUB)
    return idxs


# --------------------------- Phi4MMImageEmbedding ----------------------------
def phi4mm_image_embedding(params, image_pixel_values, image_sizes, image_attention_mask):
    """image_sizes / image_attention_mask should be host numpy arrays (avoids
    device->host syncs in the ragged bookkeeping)."""
    B, Ncrops = image_pixel_values.shape[:2]
    D = VIS_HIDDEN
    N = B * Ncrops

    # get_img_features: fused ViT tower + 2x2 token compression (1 pallas_call).
    flat_pixels = image_pixel_values.reshape((N,) + image_pixel_values.shape[2:])
    patch_feature = fused_vit_forward(params, flat_pixels)        # (N, base^2, D)
    s_out = patch_feature.shape[1]
    base = int(math.sqrt(s_out))

    feat_rows = patch_feature.reshape(N * s_out, D)
    source = jnp.concatenate(
        [feat_rows,
         params["sub_img_feature_extensor"].reshape(1, D),
         params["global_img_feature_extensor"].reshape(1, D)], axis=0)

    image_sizes_np = np.asarray(image_sizes).reshape(-1, 2)
    mask_np = np.asarray(image_attention_mask)

    all_idx = []
    lengths = []
    for idx in range(B):
        hr = int(image_sizes_np[idx, 0]) // CROP_SIZE
        wr = int(image_sizes_np[idx, 1]) // CROP_SIZE
        idxs = _image_token_indices(idx, hr, wr, mask_np, base, Ncrops, s_out,
                                    N * s_out)
        all_idx.extend(idxs)
        lengths.append(len(idxs))

    gather_idx = jnp.asarray(np.asarray(all_idx, dtype=np.int32))
    all_rows = jnp.take(source, gather_idx, axis=0)               # (sum_tokens, D)

    # Phi4MMProjector on ALL images' tokens in one call, then split per image.
    proj_all = pallas_projector_batched(
        all_rows,
        params["proj_up_w"], params["proj_up_b"],
        params["proj_down_w"], params["proj_down_b"])

    outputs = []
    off = 0
    for Lr in lengths:
        outputs.append(proj_all[off:off + Lr])                    # (L, LM_HIDDEN)
        off += Lr
    return outputs


# ------------------------------ parameter init -------------------------------
def init_params(key):
    D, C, PS, I, LMH = VIS_HIDDEN, NUM_CHANNELS, PATCH_SIZE, VIS_INTERMEDIATE, LM_HIDDEN
    keys = iter(jax.random.split(key, 128))

    def w(shape, scale=0.02):
        return jax.random.normal(next(keys), shape, jnp.float32) * scale

    params = {
        "patch_w": w((D, C, PS, PS)),                       # Conv2d weight (D, C, k, k)
        "patch_b": w((D,)),
        "pos_emb": w((NUM_POSITIONS, D)),
        "layers": [],
        # nn.Parameter(torch.zeros(...)) in __init__:
        "global_img_feature_extensor": jnp.zeros((1, 1, D), jnp.float32),
        "sub_img_feature_extensor": jnp.zeros((1, 1, 1, D), jnp.float32),
        # Phi4MMProjector (weights stored (in, out)):
        "proj_up_w": w((D, LMH)), "proj_up_b": w((LMH,)),
        "proj_down_w": w((LMH, LMH)), "proj_down_b": w((LMH,)),
    }
    for _ in range(NUM_LAYERS):
        params["layers"].append({
            "ln1_g": jnp.ones((D,), jnp.float32), "ln1_b": jnp.zeros((D,), jnp.float32),
            "wq": w((D, D)), "bq": w((D,)),
            "wk": w((D, D)), "bk": w((D,)),
            "wv": w((D, D)), "bv": w((D,)),
            "wo": w((D, D)), "bo": w((D,)),
            "ln2_g": jnp.ones((D,), jnp.float32), "ln2_b": jnp.zeros((D,), jnp.float32),
            "fc1_w": w((D, I)), "fc1_b": w((I,)),
            "fc2_w": w((I, D)), "fc2_b": w((D,)),
        })
    return params


# ----------------------------------- main ------------------------------------
if __name__ == "__main__":
    key = jax.random.PRNGKey(0)
    pkey, xkey = jax.random.split(key)
    params = init_params(pkey)

    B, NCROPS = 2, 5
    image_pixel_values = jax.random.normal(
        xkey, (B, NCROPS, NUM_CHANNELS, IMAGE_SIZE, IMAGE_SIZE), jnp.float32)
    # Host-side (numpy) metadata -> no device->host syncs during stitching.
    # image 0 is a 2x2 crop grid, image 1 is a 1x2 crop grid.
    image_sizes = np.array([[2 * CROP_SIZE, 2 * CROP_SIZE],
                            [1 * CROP_SIZE, 2 * CROP_SIZE]], dtype=np.int32)
    image_attention_mask = np.ones((B, NCROPS, N_PATCHES, N_PATCHES), np.float32)

    outs = phi4mm_image_embedding(params, image_pixel_values, image_sizes,
                                  image_attention_mask)
    for o in outs:
        jax.block_until_ready(o)

    # base_feat_size = 2 -> image0: 2x2 crops -> 4*5 + 1 + 6 = 27 tokens,
    #                       image1: 1x2 crops -> 2*5 + 1 + 6 = 17 tokens.
    assert outs[0].shape == (27, LM_HIDDEN), outs[0].shape
    assert outs[1].shape == (17, LM_HIDDEN), outs[1].shape
    assert all(bool(jnp.all(jnp.isfinite(o))) for o in outs)
    print("KERNEL_OK")
</pallas_src>

<mosaic_0001>
module attributes {stable_mosaic.version = 11 : i64} {
  func.func @_vit_tower_kernel(%arg0: i32, %arg1: memref<1x80x192xbf16, #tpu.memory_space<vmem>>, %arg2: memref<192x32xbf16, #tpu.memory_space<vmem>>, %arg3: memref<1x32xf32, #tpu.memory_space<vmem>>, %arg4: memref<80x32xf32, #tpu.memory_space<vmem>>, %arg5: memref<4x5x80xf32, #tpu.memory_space<vmem>>, %arg6: memref<2x1x32xf32, #tpu.memory_space<vmem>>, %arg7: memref<2x1x32xf32, #tpu.memory_space<vmem>>, %arg8: memref<2x2x32x16xbf16, #tpu.memory_space<vmem>>, %arg9: memref<2x2x32x16xbf16, #tpu.memory_space<vmem>>, %arg10: memref<2x2x32x16xbf16, #tpu.memory_space<vmem>>, %arg11: memref<2x2x1x16xf32, #tpu.memory_space<vmem>>, %arg12: memref<2x2x1x16xf32, #tpu.memory_space<vmem>>, %arg13: memref<2x2x1x16xf32, #tpu.memory_space<vmem>>, %arg14: memref<2x2x16x32xbf16, #tpu.memory_space<vmem>>, %arg15: memref<2x1x32xf32, #tpu.memory_space<vmem>>, %arg16: memref<2x1x32xf32, #tpu.memory_space<vmem>>, %arg17: memref<2x1x32xf32, #tpu.memory_space<vmem>>, %arg18: memref<2x32x64xbf16, #tpu.memory_space<vmem>>, %arg19: memref<2x1x64xf32, #tpu.memory_space<vmem>>, %arg20: memref<2x64x32xbf16, #tpu.memory_space<vmem>>, %arg21: memref<2x1x32xf32, #tpu.memory_space<vmem>>, %arg22: memref<1x5x128xf32, #tpu.memory_space<vmem>>) attributes {dimension_semantics = [#tpu.dimension_semantics<parallel>], iteration_bounds = array<i64: 2>, scalar_prefetch = 0 : i64, scratch_operands = 0 : i64, tpu.core_type = #tpu.core_type<tc>, window_params = [{transform_indices = @transform_0, window_bounds = array<i64: 1, 80, 192>}, {pipeline_mode = #tpu.pipeline_mode<synchronous>, transform_indices = @transform_1, window_bounds = array<i64: 192, 32>}, {pipeline_mode = #tpu.pipeline_mode<synchronous>, transform_indices = @transform_2, window_bounds = array<i64: 1, 32>}, {pipeline_mode = #tpu.pipeline_mode<synchronous>, transform_indices = @transform_3, window_bounds = array<i64: 80, 32>}, {pipeline_mode = #tpu.pipeline_mode<synchronous>, transform_indices = @transform_4, window_bounds = array<i64: 4, 5, 80>}, {pipeline_mode = #tpu.pipeline_mode<synchronous>, transform_indices = @transform_5, window_bounds = array<i64: 2, 1, 32>}, {pipeline_mode = #tpu.pipeline_mode<synchronous>, transform_indices = @transform_6, window_bounds = array<i64: 2, 1, 32>}, {pipeline_mode = #tpu.pipeline_mode<synchronous>, transform_indices = @transform_7, window_bounds = array<i64: 2, 2, 32, 16>}, {pipeline_mode = #tpu.pipeline_mode<synchronous>, transform_indices = @transform_8, window_bounds = array<i64: 2, 2, 32, 16>}, {pipeline_mode = #tpu.pipeline_mode<synchronous>, transform_indices = @transform_9, window_bounds = array<i64: 2, 2, 32, 16>}, {pipeline_mode = #tpu.pipeline_mode<synchronous>, transform_indices = @transform_10, window_bounds = array<i64: 2, 2, 1, 16>}, {pipeline_mode = #tpu.pipeline_mode<synchronous>, transform_indices = @transform_11, window_bounds = array<i64: 2, 2, 1, 16>}, {pipeline_mode = #tpu.pipeline_mode<synchronous>, transform_indices = @transform_12, window_bounds = array<i64: 2, 2, 1, 16>}, {pipeline_mode = #tpu.pipeline_mode<synchronous>, transform_indices = @transform_13, window_bounds = array<i64: 2, 2, 16, 32>}, {pipeline_mode = #tpu.pipeline_mode<synchronous>, transform_indices = @transform_14, window_bounds = array<i64: 2, 1, 32>}, {pipeline_mode = #tpu.pipeline_mode<synchronous>, transform_indices = @transform_15, window_bounds = array<i64: 2, 1, 32>}, {pipeline_mode = #tpu.pipeline_mode<synchronous>, transform_indices = @transform_16, window_bounds = array<i64: 2, 1, 32>}, {pipeline_mode = #tpu.pipeline_mode<synchronous>, transform_indices = @transform_17, window_bounds = array<i64: 2, 32, 64>}, {pipeline_mode = #tpu.pipeline_mode<synchronous>, transform_indices = @transform_18, window_bounds = array<i64: 2, 1, 64>}, {pipeline_mode = #tpu.pipeline_mode<synchronous>, transform_indices = @transform_19, window_bounds = array<i64: 2, 64, 32>}, {pipeline_mode = #tpu.pipeline_mode<synchronous>, transform_indices = @transform_20, window_bounds = array<i64: 2, 1, 32>}, {transform_indices = @transform_21, window_bounds = array<i64: 1, 5, 128>}]} {
    %c0 = arith.constant 0 : index
    %c0_0 = arith.constant 0 : index
    %c0_1 = arith.constant 0 : index
    %0 = vector.load %arg1[%c0, %c0_0, %c0_1] : memref<1x80x192xbf16, #tpu.memory_space<vmem>>, vector<1x80x192xbf16>
    %1 = vector.shape_cast %0 : vector<1x80x192xbf16> to vector<80x192xbf16>
    %c0_2 = arith.constant 0 : index
    %c0_3 = arith.constant 0 : index
    %2 = vector.load %arg2[%c0_2, %c0_3] : memref<192x32xbf16, #tpu.memory_space<vmem>>, vector<192x32xbf16>
    %cst = arith.constant dense<0.000000e+00> : vector<80x32xf32>
    %3 = tpu.matmul %1, %2, %cst {dimension_numbers = #tpu.dot_dimension_numbers<[1], [0], [0], [1], [0, 0, 1, 1], [], []>} : vector<80x192xbf16>, vector<192x32xbf16>, vector<80x32xf32> -> vector<80x32xf32>
    %c0_4 = arith.constant 0 : index
    %c0_5 = arith.constant 0 : index
    %4 = vector.load %arg3[%c0_4, %c0_5] : memref<1x32xf32, #tpu.memory_space<vmem>>, vector<1x32xf32>
    %5 = vector.broadcast %4 : vector<1x32xf32> to vector<80x32xf32>
    %6 = arith.addf %3, %5 : vector<80x32xf32>
    %c0_6 = arith.constant 0 : index
    %c0_7 = arith.constant 0 : index
    %7 = vector.load %arg4[%c0_6, %c0_7] : memref<80x32xf32, #tpu.memory_space<vmem>>, vector<80x32xf32>
    %8 = arith.addf %6, %7 : vector<80x32xf32>
    %c0_8 = arith.constant 0 : index
    %c0_9 = arith.constant 0 : index
    %c0_10 = arith.constant 0 : index
    %9 = vector.load %arg6[%c0_8, %c0_9, %c0_10] : memref<2x1x32xf32, #tpu.memory_space<vmem>>, vector<1x1x32xf32>
    %10 = vector.shape_cast %9 : vector<1x1x32xf32> to vector<1x32xf32>
    %c0_11 = arith.constant 0 : index
    %c0_12 = arith.constant 0 : index
    %c0_13 = arith.constant 0 : index
    %11 = vector.load %arg7[%c0_11, %c0_12, %c0_13] : memref<2x1x32xf32, #tpu.memory_space<vmem>>, vector<1x1x32xf32>
    %12 = vector.shape_cast %11 : vector<1x1x32xf32> to vector<1x32xf32>
    %cst_14 = arith.constant dense<0.000000e+00> : vector<80xf32>
    %13 = vector.multi_reduction <add>, %8, %cst_14 [1] : vector<80x32xf32> to vector<80xf32>
    %14 = vector.shape_cast %13 : vector<80xf32> to vector<80x1xf32>
    %cst_15 = arith.constant 3.200000e+01 : f32
    %15 = vector.broadcast %cst_15 : f32 to vector<80x1xf32>
    %16 = arith.divf %14, %15 : vector<80x1xf32>
    %17 = vector.broadcast %16 : vector<80x1xf32> to vector<80x32xf32>
    %18 = arith.subf %8, %17 : vector<80x32xf32>
    %19 = arith.mulf %18, %18 : vector<80x32xf32>
    %cst_16 = arith.constant dense<0.000000e+00> : vector<80xf32>
    %20 = vector.multi_reduction <add>, %19, %cst_16 [1] : vector<80x32xf32> to vector<80xf32>
    %21 = vector.shape_cast %20 : vector<80xf32> to vector<80x1xf32>
    %cst_17 = arith.constant 3.200000e+01 : f32
    %22 = vector.broadcast %cst_17 : f32 to vector<80x1xf32>
    %23 = arith.divf %21, %22 : vector<80x1xf32>
    %24 = vector.broadcast %16 : vector<80x1xf32> to vector<80x32xf32>
    %25 = arith.subf %8, %24 : vector<80x32xf32>
    %cst_18 = arith.constant 9.99999997E-7 : f32
    %26 = vector.broadcast %cst_18 : f32 to vector<80x1xf32>
    %27 = arith.addf %23, %26 : vector<80x1xf32>
    %28 = math.rsqrt %27 : vector<80x1xf32>
    %29 = vector.broadcast %28 : vector<80x1xf32> to vector<80x32xf32>
    %30 = arith.mulf %25, %29 : vector<80x32xf32>
    %31 = vector.broadcast %10 : vector<1x32xf32> to vector<80x32xf32>
    %32 = arith.mulf %30, %31 : vector<80x32xf32>
    %33 = vector.broadcast %12 : vector<1x32xf32> to vector<80x32xf32>
    %34 = arith.addf %32, %33 : vector<80x32xf32>
    %35 = arith.truncf %34 : vector<80x32xf32> to vector<80x32xbf16>
    %c0_19 = arith.constant 0 : index
    %c0_20 = arith.constant 0 : index
    %c0_21 = arith.constant 0 : index
    %36 = vector.load %arg15[%c0_19, %c0_20, %c0_21] : memref<2x1x32xf32, #tpu.memory_space<vmem>>, vector<1x1x32xf32>
    %37 = vector.shape_cast %36 : vector<1x1x32xf32> to vector<1x32xf32>
    %c0_22 = arith.constant 0 : index
    %c0_23 = arith.constant 0 : index
    %c0_24 = arith.constant 0 : index
    %c0_25 = arith.constant 0 : index
    %38 = vector.load %arg8[%c0_22, %c0_23, %c0_24, %c0_25] : memref<2x2x32x16xbf16, #tpu.memory_space<vmem>>, vector<1x1x32x16xbf16>
    %39 = vector.shape_cast %38 : vector<1x1x32x16xbf16> to vector<32x16xbf16>
    %cst_26 = arith.constant dense<0.000000e+00> : vector<80x16xf32>
    %40 = tpu.matmul %35, %39, %cst_26 {dimension_numbers = #tpu.dot_dimension_numbers<[1], [0], [0], [1], [0, 0, 1, 1], [], []>} : vector<80x32xbf16>, vector<32x16xbf16>, vector<80x16xf32> -> vector<80x16xf32>
    %c0_27 = arith.constant 0 : index
    %c0_28 = arith.constant 0 : index
    %c0_29 = arith.constant 0 : index
    %c0_30 = arith.constant 0 : index
    %41 = vector.load %arg11[%c0_27, %c0_28, %c0_29, %c0_30] : memref<2x2x1x16xf32, #tpu.memory_space<vmem>>, vector<1x1x1x16xf32>
    %42 = vector.shape_cast %41 : vector<1x1x1x16xf32> to vector<1x16xf32>
    %43 = vector.broadcast %42 : vector<1x16xf32> to vector<80x16xf32>
    %44 = arith.addf %40, %43 : vector<80x16xf32>
    %45 = vector.shape_cast %44 : vector<80x16xf32> to vector<5x16x16xf32>
    %c0_31 = arith.constant 0 : index
    %c0_32 = arith.constant 0 : index
    %c0_33 = arith.constant 0 : index
    %c0_34 = arith.constant 0 : index
    %46 = vector.load %arg9[%c0_31, %c0_32, %c0_33, %c0_34] : memref<2x2x32x16xbf16, #tpu.memory_space<vmem>>, vector<1x1x32x16xbf16>
    %47 = vector.shape_cast %46 : vector<1x1x32x16xbf16> to vector<32x16xbf16>
    %cst_35 = arith.constant dense<0.000000e+00> : vector<80x16xf32>
    %48 = tpu.matmul %35, %47, %cst_35 {dimension_numbers = #tpu.dot_dimension_numbers<[1], [0], [0], [1], [0, 0, 1, 1], [], []>} : vector<80x32xbf16>, vector<32x16xbf16>, vector<80x16xf32> -> vector<80x16xf32>
    %c0_36 = arith.constant 0 : index
    %c0_37 = arith.constant 0 : index
    %c0_38 = arith.constant 0 : index
    %c0_39 = arith.constant 0 : index
    %49 = vector.load %arg12[%c0_36, %c0_37, %c0_38, %c0_39] : memref<2x2x1x16xf32, #tpu.memory_space<vmem>>, vector<1x1x1x16xf32>
    %50 = vector.shape_cast %49 : vector<1x1x1x16xf32> to vector<1x16xf32>
    %51 = vector.broadcast %50 : vector<1x16xf32> to vector<80x16xf32>
    %52 = arith.addf %48, %51 : vector<80x16xf32>
    %53 = vector.shape_cast %52 : vector<80x16xf32> to vector<5x16x16xf32>
    %c0_40 = arith.constant 0 : index
    %c0_41 = arith.constant 0 : index
    %c0_42 = arith.constant 0 : index
    %c0_43 = arith.constant 0 : index
    %54 = vector.load %arg10[%c0_40, %c0_41, %c0_42, %c0_43] : memref<2x2x32x16xbf16, #tpu.memory_space<vmem>>, vector<1x1x32x16xbf16>
    %55 = vector.shape_cast %54 : vector<1x1x32x16xbf16> to vector<32x16xbf16>
    %cst_44 = arith.constant dense<0.000000e+00> : vector<80x16xf32>
    %56 = tpu.matmul %35, %55, %cst_44 {dimension_numbers = #tpu.dot_dimension_numbers<[1], [0], [0], [1], [0, 0, 1, 1], [], []>} : vector<80x32xbf16>, vector<32x16xbf16>, vector<80x16xf32> -> vector<80x16xf32>
    %c0_45 = arith.constant 0 : index
    %c0_46 = arith.constant 0 : index
    %c0_47 = arith.constant 0 : index
    %c0_48 = arith.constant 0 : index
    %57 = vector.load %arg13[%c0_45, %c0_46, %c0_47, %c0_48] : memref<2x2x1x16xf32, #tpu.memory_space<vmem>>, vector<1x1x1x16xf32>
    %58 = vector.shape_cast %57 : vector<1x1x1x16xf32> to vector<1x16xf32>
    %59 = vector.broadcast %58 : vector<1x16xf32> to vector<80x16xf32>
    %60 = arith.addf %56, %59 : vector<80x16xf32>
    %61 = vector.shape_cast %60 : vector<80x16xf32> to vector<5x16x16xf32>
    %62 = arith.truncf %45 : vector<5x16x16xf32> to vector<5x16x16xbf16>
    %63 = arith.truncf %53 : vector<5x16x16xf32> to vector<5x16x16xbf16>
    "tpu.trace_start"() <{level = 10 : i32, message = "gqd,gkd->gqk"}> : () -> ()
    %cst_49 = arith.constant dense<0.000000e+00> : vector<5x16x16xf32>
    %64 = tpu.matmul %62, %63, %cst_49 {dimension_numbers = #tpu.dot_dimension_numbers<[2], [2], [1], [1], [0, 0, 0, 1, 1, 1], [0], [0]>} : vector<5x16x16xbf16>, vector<5x16x16xbf16>, vector<5x16x16xf32> -> vector<5x16x16xf32>
    "tpu.trace_stop"() : () -> ()
    %cst_50 = arith.constant 2.500000e-01 : f32
    %65 = vector.broadcast %cst_50 : f32 to vector<5x16x16xf32>
    %66 = arith.mulf %64, %65 : vector<5x16x16xf32>
    %cst_51 = arith.constant dense<0xFF800000> : vector<5x16xf32>
    %67 = vector.multi_reduction <maximumf>, %66, %cst_51 [2] : vector<5x16x16xf32> to vector<5x16xf32>
    %68 = vector.shape_cast %67 : vector<5x16xf32> to vector<5x16x1xf32>
    %69 = vector.broadcast %68 : vector<5x16x1xf32> to vector<5x16x16xf32>
    %70 = arith.subf %66, %69 : vector<5x16x16xf32>
    %71 = math.exp %70 : vector<5x16x16xf32>
    %cst_52 = arith.constant dense<0.000000e+00> : vector<5x16xf32>
    %72 = vector.multi_reduction <add>, %71, %cst_52 [2] : vector<5x16x16xf32> to vector<5x16xf32>
    %73 = vector.shape_cast %72 : vector<5x16xf32> to vector<5x16x1xf32>
    %74 = tpu.reciprocal %73 {approx = true} : vector<5x16x1xf32> -> vector<5x16x1xf32>
    %75 = vector.broadcast %74 : vector<5x16x1xf32> to vector<5x16x16xf32>
    %76 = arith.mulf %71, %75 : vector<5x16x16xf32>
    %77 = arith.truncf %76 : vector<5x16x16xf32> to vector<5x16x16xbf16>
    %78 = arith.truncf %61 : vector<5x16x16xf32> to vector<5x16x16xbf16>
    "tpu.trace_start"() <{level = 10 : i32, message = "gqk,gkd->gqd"}> : () -> ()
    %cst_53 = arith.constant dense<0.000000e+00> : vector<5x16x16xf32>
    %79 = tpu.matmul %77, %78, %cst_53 {dimension_numbers = #tpu.dot_dimension_numbers<[2], [1], [1], [2], [0, 0, 0, 1, 1, 2], [0], [0]>} : vector<5x16x16xbf16>, vector<5x16x16xbf16>, vector<5x16x16xf32> -> vector<5x16x16xf32>
    "tpu.trace_stop"() : () -> ()
    %80 = vector.shape_cast %79 : vector<5x16x16xf32> to vector<80x16xf32>
    %81 = arith.truncf %80 : vector<80x16xf32> to vector<80x16xbf16>
    %c0_54 = arith.constant 0 : index
    %c0_55 = arith.constant 0 : index
    %c0_56 = arith.constant 0 : index
    %c0_57 = arith.constant 0 : index
    %82 = vector.load %arg14[%c0_54, %c0_55, %c0_56, %c0_57] : memref<2x2x16x32xbf16, #tpu.memory_space<vmem>>, vector<1x1x16x32xbf16>
    %83 = vector.shape_cast %82 : vector<1x1x16x32xbf16> to vector<16x32xbf16>
    %cst_58 = arith.constant dense<0.000000e+00> : vector<80x32xf32>
    %84 = tpu.matmul %81, %83, %cst_58 {dimension_numbers = #tpu.dot_dimension_numbers<[1], [0], [0], [1], [0, 0, 1, 1], [], []>} : vector<80x16xbf16>, vector<16x32xbf16>, vector<80x32xf32> -> vector<80x32xf32>
    %85 = vector.broadcast %37 : vector<1x32xf32> to vector<80x32xf32>
    %86 = arith.addf %85, %84 : vector<80x32xf32>
    %c0_59 = arith.constant 0 : index
    %c1 = arith.constant 1 : index
    %c0_60 = arith.constant 0 : index
    %c0_61 = arith.constant 0 : index
    %87 = vector.load %arg8[%c0_59, %c1, %c0_60, %c0_61] : memref<2x2x32x16xbf16, #tpu.memory_space<vmem>>, vector<1x1x32x16xbf16>
    %88 = vector.shape_cast %87 : vector<1x1x32x16xbf16> to vector<32x16xbf16>
    %cst_62 = arith.constant dense<0.000000e+00> : vector<80x16xf32>
    %89 = tpu.matmul %35, %88, %cst_62 {dimension_numbers = #tpu.dot_dimension_numbers<[1], [0], [0], [1], [0, 0, 1, 1], [], []>} : vector<80x32xbf16>, vector<32x16xbf16>, vector<80x16xf32> -> vector<80x16xf32>
    %c0_63 = arith.constant 0 : index
    %c1_64 = arith.constant 1 : index
    %c0_65 = arith.constant 0 : index
    %c0_66 = arith.constant 0 : index
    %90 = vector.load %arg11[%c0_63, %c1_64, %c0_65, %c0_66] : memref<2x2x1x16xf32, #tpu.memory_space<vmem>>, vector<1x1x1x16xf32>
    %91 = vector.shape_cast %90 : vector<1x1x1x16xf32> to vector<1x16xf32>
    %92 = vector.broadcast %91 : vector<1x16xf32> to vector<80x16xf32>
    %93 = arith.addf %89, %92 : vector<80x16xf32>
    %94 = vector.shape_cast %93 : vector<80x16xf32> to vector<5x16x16xf32>
    %c0_67 = arith.constant 0 : index
    %c1_68 = arith.constant 1 : index
    %c0_69 = arith.constant 0 : index
    %c0_70 = arith.constant 0 : index
    %95 = vector.load %arg9[%c0_67, %c1_68, %c0_69, %c0_70] : memref<2x2x32x16xbf16, #tpu.memory_space<vmem>>, vector<1x1x32x16xbf16>
    %96 = vector.shape_cast %95 : vector<1x1x32x16xbf16> to vector<32x16xbf16>
    %cst_71 = arith.constant dense<0.000000e+00> : vector<80x16xf32>
    %97 = tpu.matmul %35, %96, %cst_71 {dimension_numbers = #tpu.dot_dimension_numbers<[1], [0], [0], [1], [0, 0, 1, 1], [], []>} : vector<80x32xbf16>, vector<32x16xbf16>, vector<80x16xf32> -> vector<80x16xf32>
    %c0_72 = arith.constant 0 : index
    %c1_73 = arith.constant 1 : index
    %c0_74 = arith.constant 0 : index
    %c0_75 = arith.constant 0 : index
    %98 = vector.load %arg12[%c0_72, %c1_73, %c0_74, %c0_75] : memref<2x2x1x16xf32, #tpu.memory_space<vmem>>, vector<1x1x1x16xf32>
    %99 = vector.shape_cast %98 : vector<1x1x1x16xf32> to vector<1x16xf32>
    %100 = vector.broadcast %99 : vector<1x16xf32> to vector<80x16xf32>
    %101 = arith.addf %97, %100 : vector<80x16xf32>
    %102 = vector.shape_cast %101 : vector<80x16xf32> to vector<5x16x16xf32>
    %c0_76 = arith.constant 0 : index
    %c1_77 = arith.constant 1 : index
    %c0_78 = arith.constant 0 : index
    %c0_79 = arith.constant 0 : index
    %103 = vector.load %arg10[%c0_76, %c1_77, %c0_78, %c0_79] : memref<2x2x32x16xbf16, #tpu.memory_space<vmem>>, vector<1x1x32x16xbf16>
    %104 = vector.shape_cast %103 : vector<1x1x32x16xbf16> to vector<32x16xbf16>
    %cst_80 = arith.constant dense<0.000000e+00> : vector<80x16xf32>
    %105 = tpu.matmul %35, %104, %cst_80 {dimension_numbers = #tpu.dot_dimension_numbers<[1], [0], [0], [1], [0, 0, 1, 1], [], []>} : vector<80x32xbf16>, vector<32x16xbf16>, vector<80x16xf32> -> vector<80x16xf32>
    %c0_81 = arith.constant 0 : index
    %c1_82 = arith.constant 1 : index
    %c0_83 = arith.constant 0 : index
    %c0_84 = arith.constant 0 : index
    %106 = vector.load %arg13[%c0_81, %c1_82, %c0_83, %c0_84] : memref<2x2x1x16xf32, #tpu.memory_space<vmem>>, vector<1x1x1x16xf32>
    %107 = vector.shape_cast %106 : vector<1x1x1x16xf32> to vector<1x16xf32>
    %108 = vector.broadcast %107 : vector<1x16xf32> to vector<80x16xf32>
    %109 = arith.addf %105, %108 : vector<80x16xf32>
    %110 = vector.shape_cast %109 : vector<80x16xf32> to vector<5x16x16xf32>
    %111 = arith.truncf %94 : vector<5x16x16xf32> to vector<5x16x16xbf16>
    %112 = arith.truncf %102 : vector<5x16x16xf32> to vector<5x16x16xbf16>
    "tpu.trace_start"() <{level = 10 : i32, message = "gqd,gkd->gqk"}> : () -> ()
    %cst_85 = arith.constant dense<0.000000e+00> : vector<5x16x16xf32>
    %113 = tpu.matmul %111, %112, %cst_85 {dimension_numbers = #tpu.dot_dimension_numbers<[2], [2], [1], [1], [0, 0, 0, 1, 1, 1], [0], [0]>} : vector<5x16x16xbf16>, vector<5x16x16xbf16>, vector<5x16x16xf32> -> vector<5x16x16xf32>
    "tpu.trace_stop"() : () -> ()
    %cst_86 = arith.constant 2.500000e-01 : f32
    %114 = vector.broadcast %cst_86 : f32 to vector<5x16x16xf32>
    %115 = arith.mulf %113, %114 : vector<5x16x16xf32>
    %cst_87 = arith.constant dense<0xFF800000> : vector<5x16xf32>
    %116 = vector.multi_reduction <maximumf>, %115, %cst_87 [2] : vector<5x16x16xf32> to vector<5x16xf32>
    %117 = vector.shape_cast %116 : vector<5x16xf32> to vector<5x16x1xf32>
    %118 = vector.broadcast %117 : vector<5x16x1xf32> to vector<5x16x16xf32>
    %119 = arith.subf %115, %118 : vector<5x16x16xf32>
    %120 = math.exp %119 : vector<5x16x16xf32>
    %cst_88 = arith.constant dense<0.000000e+00> : vector<5x16xf32>
    %121 = vector.multi_reduction <add>, %120, %cst_88 [2] : vector<5x16x16xf32> to vector<5x16xf32>
    %122 = vector.shape_cast %121 : vector<5x16xf32> to vector<5x16x1xf32>
    %123 = tpu.reciprocal %122 {approx = true} : vector<5x16x1xf32> -> vector<5x16x1xf32>
    %124 = vector.broadcast %123 : vector<5x16x1xf32> to vector<5x16x16xf32>
    %125 = arith.mulf %120, %124 : vector<5x16x16xf32>
    %126 = arith.truncf %125 : vector<5x16x16xf32> to vector<5x16x16xbf16>
    %127 = arith.truncf %110 : vector<5x16x16xf32> to vector<5x16x16xbf16>
    "tpu.trace_start"() <{level = 10 : i32, message = "gqk,gkd->gqd"}> : () -> ()
    %cst_89 = arith.constant dense<0.000000e+00> : vector<5x16x16xf32>
    %128 = tpu.matmul %126, %127, %cst_89 {dimension_numbers = #tpu.dot_dimension_numbers<[2], [1], [1], [2], [0, 0, 0, 1, 1, 2], [0], [0]>} : vector<5x16x16xbf16>, vector<5x16x16xbf16>, vector<5x16x16xf32> -> vector<5x16x16xf32>
    "tpu.trace_stop"() : () -> ()
    %129 = vector.shape_cast %128 : vector<5x16x16xf32> to vector<80x16xf32>
    %130 = arith.truncf %129 : vector<80x16xf32> to vector<80x16xbf16>
    %c0_90 = arith.constant 0 : index
    %c1_91 = arith.constant 1 : index
    %c0_92 = arith.constant 0 : index
    %c0_93 = arith.constant 0 : index
    %131 = vector.load %arg14[%c0_90, %c1_91, %c0_92, %c0_93] : memref<2x2x16x32xbf16, #tpu.memory_space<vmem>>, vector<1x1x16x32xbf16>
    %132 = vector.shape_cast %131 : vector<1x1x16x32xbf16> to vector<16x32xbf16>
    %cst_94 = arith.constant dense<0.000000e+00> : vector<80x32xf32>
    %133 = tpu.matmul %130, %132, %cst_94 {dimension_numbers = #tpu.dot_dimension_numbers<[1], [0], [0], [1], [0, 0, 1, 1], [], []>} : vector<80x16xbf16>, vector<16x32xbf16>, vector<80x32xf32> -> vector<80x32xf32>
    %134 = arith.addf %86, %133 : vector<80x32xf32>
    %135 = arith.addf %8, %134 : vector<80x32xf32>
    %c0_95 = arith.constant 0 : index
    %c0_96 = arith.constant 0 : index
    %c0_97 = arith.constant 0 : index
    %136 = vector.load %arg16[%c0_95, %c0_96, %c0_97] : memref<2x1x32xf32, #tpu.memory_space<vmem>>, vector<1x1x32xf32>
    %137 = vector.shape_cast %136 : vector<1x1x32xf32> to vector<1x32xf32>
    %c0_98 = arith.constant 0 : index
    %c0_99 = arith.constant 0 : index
    %c0_100 = arith.constant 0 : index
    %138 = vector.load %arg17[%c0_98, %c0_99, %c0_100] : memref<2x1x32xf32, #tpu.memory_space<vmem>>, vector<1x1x32xf32>
    %139 = vector.shape_cast %138 : vector<1x1x32xf32> to vector<1x32xf32>
    %cst_101 = arith.constant dense<0.000000e+00> : vector<80xf32>
    %140 = vector.multi_reduction <add>, %135, %cst_101 [1] : vector<80x32xf32> to vector<80xf32>
    %141 = vector.shape_cast %140 : vector<80xf32> to vector<80x1xf32>
    %cst_102 = arith.constant 3.200000e+01 : f32
    %142 = vector.broadcast %cst_102 : f32 to vector<80x1xf32>
    %143 = arith.divf %141, %142 : vector<80x1xf32>
    %144 = vector.broadcast %143 : vector<80x1xf32> to vector<80x32xf32>
    %145 = arith.subf %135, %144 : vector<80x32xf32>
    %146 = arith.mulf %145, %145 : vector<80x32xf32>
    %cst_103 = arith.constant dense<0.000000e+00> : vector<80xf32>
    %147 = vector.multi_reduction <add>, %146, %cst_103 [1] : vector<80x32xf32> to vector<80xf32>
    %148 = vector.shape_cast %147 : vector<80xf32> to vector<80x1xf32>
    %cst_104 = arith.constant 3.200000e+01 : f32
    %149 = vector.broadcast %cst_104 : f32 to vector<80x1xf32>
    %150 = arith.divf %148, %149 : vector<80x1xf32>
    %151 = vector.broadcast %143 : vector<80x1xf32> to vector<80x32xf32>
    %152 = arith.subf %135, %151 : vector<80x32xf32>
    %cst_105 = arith.constant 9.99999997E-7 : f32
    %153 = vector.broadcast %cst_105 : f32 to vector<80x1xf32>
    %154 = arith.addf %150, %153 : vector<80x1xf32>
    %155 = math.rsqrt %154 : vector<80x1xf32>
    %156 = vector.broadcast %155 : vector<80x1xf32> to vector<80x32xf32>
    %157 = arith.mulf %152, %156 : vector<80x32xf32>
    %158 = vector.broadcast %137 : vector<1x32xf32> to vector<80x32xf32>
    %159 = arith.mulf %157, %158 : vector<80x32xf32>
    %160 = vector.broadcast %139 : vector<1x32xf32> to vector<80x32xf32>
    %161 = arith.addf %159, %160 : vector<80x32xf32>
    %162 = arith.truncf %161 : vector<80x32xf32> to vector<80x32xbf16>
    %c0_106 = arith.constant 0 : index
    %c0_107 = arith.constant 0 : index
    %c0_108 = arith.constant 0 : index
    %163 = vector.load %arg18[%c0_106, %c0_107, %c0_108] : memref<2x32x64xbf16, #tpu.memory_space<vmem>>, vector<1x32x64xbf16>
    %164 = vector.shape_cast %163 : vector<1x32x64xbf16> to vector<32x64xbf16>
    %cst_109 = arith.constant dense<0.000000e+00> : vector<80x64xf32>
    %165 = tpu.matmul %162, %164, %cst_109 {dimension_numbers = #tpu.dot_dimension_numbers<[1], [0], [0], [1], [0, 0, 1, 1], [], []>} : vector<80x32xbf16>, vector<32x64xbf16>, vector<80x64xf32> -> vector<80x64xf32>
    %c0_110 = arith.constant 0 : index
    %c0_111 = arith.constant 0 : index
    %c0_112 = arith.constant 0 : index
    %166 = vector.load %arg19[%c0_110, %c0_111, %c0_112] : memref<2x1x64xf32, #tpu.memory_space<vmem>>, vector<1x1x64xf32>
    %167 = vector.shape_cast %166 : vector<1x1x64xf32> to vector<1x64xf32>
    %168 = vector.broadcast %167 : vector<1x64xf32> to vector<80x64xf32>
    %169 = arith.addf %165, %168 : vector<80x64xf32>
    %170 = arith.mulf %169, %169 : vector<80x64xf32>
    %171 = arith.mulf %169, %170 : vector<80x64xf32>
    %cst_113 = arith.constant 4.471500e-02 : f32
    %172 = vector.broadcast %cst_113 : f32 to vector<80x64xf32>
    %173 = arith.mulf %172, %171 : vector<80x64xf32>
    %174 = arith.addf %169, %173 : vector<80x64xf32>
    %cst_114 = arith.constant 0.797884583 : f32
    %175 = vector.broadcast %cst_114 : f32 to vector<80x64xf32>
    %176 = arith.mulf %175, %174 : vector<80x64xf32>
    %177 = math.tanh %176 : vector<80x64xf32>
    %cst_115 = arith.constant 1.000000e+00 : f32
    %178 = vector.broadcast %cst_115 : f32 to vector<80x64xf32>
    %179 = arith.addf %178, %177 : vector<80x64xf32>
    %cst_116 = arith.constant 5.000000e-01 : f32
    %180 = vector.broadcast %cst_116 : f32 to vector<80x64xf32>
    %181 = arith.mulf %180, %179 : vector<80x64xf32>
    %182 = arith.mulf %169, %181 : vector<80x64xf32>
    %183 = arith.truncf %182 : vector<80x64xf32> to vector<80x64xbf16>
    %c0_117 = arith.constant 0 : index
    %c0_118 = arith.constant 0 : index
    %c0_119 = arith.constant 0 : index
    %184 = vector.load %arg20[%c0_117, %c0_118, %c0_119] : memref<2x64x32xbf16, #tpu.memory_space<vmem>>, vector<1x64x32xbf16>
    %185 = vector.shape_cast %184 : vector<1x64x32xbf16> to vector<64x32xbf16>
    %cst_120 = arith.constant dense<0.000000e+00> : vector<80x32xf32>
    %186 = tpu.matmul %183, %185, %cst_120 {dimension_numbers = #tpu.dot_dimension_numbers<[1], [0], [0], [1], [0, 0, 1, 1], [], []>} : vector<80x64xbf16>, vector<64x32xbf16>, vector<80x32xf32> -> vector<80x32xf32>
    %c0_121 = arith.constant 0 : index
    %c0_122 = arith.constant 0 : index
    %c0_123 = arith.constant 0 : index
    %187 = vector.load %arg21[%c0_121, %c0_122, %c0_123] : memref<2x1x32xf32, #tpu.memory_space<vmem>>, vector<1x1x32xf32>
    %188 = vector.shape_cast %187 : vector<1x1x32xf32> to vector<1x32xf32>
    %189 = vector.broadcast %188 : vector<1x32xf32> to vector<80x32xf32>
    %190 = arith.addf %186, %189 : vector<80x32xf32>
    %191 = arith.addf %135, %190 : vector<80x32xf32>
    %c1_124 = arith.constant 1 : index
    %c0_125 = arith.constant 0 : index
    %c0_126 = arith.constant 0 : index
    %192 = vector.load %arg6[%c1_124, %c0_125, %c0_126] : memref<2x1x32xf32, #tpu.memory_space<vmem>>, vector<1x1x32xf32>
    %193 = vector.shape_cast %192 : vector<1x1x32xf32> to vector<1x32xf32>
    %c1_127 = arith.constant 1 : index
    %c0_128 = arith.constant 0 : index
    %c0_129 = arith.constant 0 : index
    %194 = vector.load %arg7[%c1_127, %c0_128, %c0_129] : memref<2x1x32xf32, #tpu.memory_space<vmem>>, vector<1x1x32xf32>
    %195 = vector.shape_cast %194 : vector<1x1x32xf32> to vector<1x32xf32>
    %cst_130 = arith.constant dense<0.000000e+00> : vector<80xf32>
    %196 = vector.multi_reduction <add>, %191, %cst_130 [1] : vector<80x32xf32> to vector<80xf32>
    %197 = vector.shape_cast %196 : vector<80xf32> to vector<80x1xf32>
    %cst_131 = arith.constant 3.200000e+01 : f32
    %198 = vector.broadcast %cst_131 : f32 to vector<80x1xf32>
    %199 = arith.divf %197, %198 : vector<80x1xf32>
    %200 = vector.broadcast %199 : vector<80x1xf32> to vector<80x32xf32>
    %201 = arith.subf %191, %200 : vector<80x32xf32>
    %202 = arith.mulf %201, %201 : vector<80x32xf32>
    %cst_132 = arith.constant dense<0.000000e+00> : vector<80xf32>
    %203 = vector.multi_reduction <add>, %202, %cst_132 [1] : vector<80x32xf32> to vector<80xf32>
    %204 = vector.shape_cast %203 : vector<80xf32> to vector<80x1xf32>
    %cst_133 = arith.constant 3.200000e+01 : f32
    %205 = vector.broadcast %cst_133 : f32 to vector<80x1xf32>
    %206 = arith.divf %204, %205 : vector<80x1xf32>
    %207 = vector.broadcast %199 : vector<80x1xf32> to vector<80x32xf32>
    %208 = arith.subf %191, %207 : vector<80x32xf32>
    %cst_134 = arith.constant 9.99999997E-7 : f32
    %209 = vector.broadcast %cst_134 : f32 to vector<80x1xf32>
    %210 = arith.addf %206, %209 : vector<80x1xf32>
    %211 = math.rsqrt %210 : vector<80x1xf32>
    %212 = vector.broadcast %211 : vector<80x1xf32> to vector<80x32xf32>
    %213 = arith.mulf %208, %212 : vector<80x32xf32>
    %214 = vector.broadcast %193 : vector<1x32xf32> to vector<80x32xf32>
    %215 = arith.mulf %213, %214 : vector<80x32xf32>
    %216 = vector.broadcast %195 : vector<1x32xf32> to vector<80x32xf32>
    %217 = arith.addf %215, %216 : vector<80x32xf32>
    %218 = arith.truncf %217 : vector<80x32xf32> to vector<80x32xbf16>
    %c1_135 = arith.constant 1 : index
    %c0_136 = arith.constant 0 : index
    %c0_137 = arith.constant 0 : index
    %219 = vector.load %arg15[%c1_135, %c0_136, %c0_137] : memref<2x1x32xf32, #tpu.memory_space<vmem>>, vector<1x1x32xf32>
    %220 = vector.shape_cast %219 : vector<1x1x32xf32> to vector<1x32xf32>
    %c1_138 = arith.constant 1 : index
    %c0_139 = arith.constant 0 : index
    %c0_140 = arith.constant 0 : index
    %c0_141 = arith.constant 0 : index
    %221 = vector.load %arg8[%c1_138, %c0_139, %c0_140, %c0_141] : memref<2x2x32x16xbf16, #tpu.memory_space<vmem>>, vector<1x1x32x16xbf16>
    %222 = vector.shape_cast %221 : vector<1x1x32x16xbf16> to vector<32x16xbf16>
    %cst_142 = arith.constant dense<0.000000e+00> : vector<80x16xf32>
    %223 = tpu.matmul %218, %222, %cst_142 {dimension_numbers = #tpu.dot_dimension_numbers<[1], [0], [0], [1], [0, 0, 1, 1], [], []>} : vector<80x32xbf16>, vector<32x16xbf16>, vector<80x16xf32> -> vector<80x16xf32>
    %c1_143 = arith.constant 1 : index
    %c0_144 = arith.constant 0 : index
    %c0_145 = arith.constant 0 : index
    %c0_146 = arith.constant 0 : index
    %224 = vector.load %arg11[%c1_143, %c0_144, %c0_145, %c0_146] : memref<2x2x1x16xf32, #tpu.memory_space<vmem>>, vector<1x1x1x16xf32>
    %225 = vector.shape_cast %224 : vector<1x1x1x16xf32> to vector<1x16xf32>
    %226 = vector.broadcast %225 : vector<1x16xf32> to vector<80x16xf32>
    %227 = arith.addf %223, %226 : vector<80x16xf32>
    %228 = vector.shape_cast %227 : vector<80x16xf32> to vector<5x16x16xf32>
    %c1_147 = arith.constant 1 : index
    %c0_148 = arith.constant 0 : index
    %c0_149 = arith.constant 0 : index
    %c0_150 = arith.constant 0 : index
    %229 = vector.load %arg9[%c1_147, %c0_148, %c0_149, %c0_150] : memref<2x2x32x16xbf16, #tpu.memory_space<vmem>>, vector<1x1x32x16xbf16>
    %230 = vector.shape_cast %229 : vector<1x1x32x16xbf16> to vector<32x16xbf16>
    %cst_151 = arith.constant dense<0.000000e+00> : vector<80x16xf32>
    %231 = tpu.matmul %218, %230, %cst_151 {dimension_numbers = #tpu.dot_dimension_numbers<[1], [0], [0], [1], [0, 0, 1, 1], [], []>} : vector<80x32xbf16>, vector<32x16xbf16>, vector<80x16xf32> -> vector<80x16xf32>
    %c1_152 = arith.constant 1 : index
    %c0_153 = arith.constant 0 : index
    %c0_154 = arith.constant 0 : index
    %c0_155 = arith.constant 0 : index
    %232 = vector.load %arg12[%c1_152, %c0_153, %c0_154, %c0_155] : memref<2x2x1x16xf32, #tpu.memory_space<vmem>>, vector<1x1x1x16xf32>
    %233 = vector.shape_cast %232 : vector<1x1x1x16xf32> to vector<1x16xf32>
    %234 = vector.broadcast %233 : vector<1x16xf32> to vector<80x16xf32>
    %235 = arith.addf %231, %234 : vector<80x16xf32>
    %236 = vector.shape_cast %235 : vector<80x16xf32> to vector<5x16x16xf32>
    %c1_156 = arith.constant 1 : index
    %c0_157 = arith.constant 0 : index
    %c0_158 = arith.constant 0 : index
    %c0_159 = arith.constant 0 : index
    %237 = vector.load %arg10[%c1_156, %c0_157, %c0_158, %c0_159] : memref<2x2x32x16xbf16, #tpu.memory_space<vmem>>, vector<1x1x32x16xbf16>
    %238 = vector.shape_cast %237 : vector<1x1x32x16xbf16> to vector<32x16xbf16>
    %cst_160 = arith.constant dense<0.000000e+00> : vector<80x16xf32>
    %239 = tpu.matmul %218, %238, %cst_160 {dimension_numbers = #tpu.dot_dimension_numbers<[1], [0], [0], [1], [0, 0, 1, 1], [], []>} : vector<80x32xbf16>, vector<32x16xbf16>, vector<80x16xf32> -> vector<80x16xf32>
    %c1_161 = arith.constant 1 : index
    %c0_162 = arith.constant 0 : index
    %c0_163 = arith.constant 0 : index
    %c0_164 = arith.constant 0 : index
    %240 = vector.load %arg13[%c1_161, %c0_162, %c0_163, %c0_164] : memref<2x2x1x16xf32, #tpu.memory_space<vmem>>, vector<1x1x1x16xf32>
    %241 = vector.shape_cast %240 : vector<1x1x1x16xf32> to vector<1x16xf32>
    %242 = vector.broadcast %241 : vector<1x16xf32> to vector<80x16xf32>
    %243 = arith.addf %239, %242 : vector<80x16xf32>
    %244 = vector.shape_cast %243 : vector<80x16xf32> to vector<5x16x16xf32>
    %245 = arith.truncf %228 : vector<5x16x16xf32> to vector<5x16x16xbf16>
    %246 = arith.truncf %236 : vector<5x16x16xf32> to vector<5x16x16xbf16>
    "tpu.trace_start"() <{level = 10 : i32, message = "gqd,gkd->gqk"}> : () -> ()
    %cst_165 = arith.constant dense<0.000000e+00> : vector<5x16x16xf32>
    %247 = tpu.matmul %245, %246, %cst_165 {dimension_numbers = #tpu.dot_dimension_numbers<[2], [2], [1], [1], [0, 0, 0, 1, 1, 1], [0], [0]>} : vector<5x16x16xbf16>, vector<5x16x16xbf16>, vector<5x16x16xf32> -> vector<5x16x16xf32>
    "tpu.trace_stop"() : () -> ()
    %cst_166 = arith.constant 2.500000e-01 : f32
    %248 = vector.broadcast %cst_166 : f32 to vector<5x16x16xf32>
    %249 = arith.mulf %247, %248 : vector<5x16x16xf32>
    %cst_167 = arith.constant dense<0xFF800000> : vector<5x16xf32>
    %250 = vector.multi_reduction <maximumf>, %249, %cst_167 [2] : vector<5x16x16xf32> to vector<5x16xf32>
    %251 = vector.shape_cast %250 : vector<5x16xf32> to vector<5x16x1xf32>
    %252 = vector.broadcast %251 : vector<5x16x1xf32> to vector<5x16x16xf32>
    %253 = arith.subf %249, %252 : vector<5x16x16xf32>
    %254 = math.exp %253 : vector<5x16x16xf32>
    %cst_168 = arith.constant dense<0.000000e+00> : vector<5x16xf32>
    %255 = vector.multi_reduction <add>, %254, %cst_168 [2] : vector<5x16x16xf32> to vector<5x16xf32>
    %256 = vector.shape_cast %255 : vector<5x16xf32> to vector<5x16x1xf32>
    %257 = tpu.reciprocal %256 {approx = true} : vector<5x16x1xf32> -> vector<5x16x1xf32>
    %258 = vector.broadcast %257 : vector<5x16x1xf32> to vector<5x16x16xf32>
    %259 = arith.mulf %254, %258 : vector<5x16x16xf32>
    %260 = arith.truncf %259 : vector<5x16x16xf32> to vector<5x16x16xbf16>
    %261 = arith.truncf %244 : vector<5x16x16xf32> to vector<5x16x16xbf16>
    "tpu.trace_start"() <{level = 10 : i32, message = "gqk,gkd->gqd"}> : () -> ()
    %cst_169 = arith.constant dense<0.000000e+00> : vector<5x16x16xf32>
    %262 = tpu.matmul %260, %261, %cst_169 {dimension_numbers = #tpu.dot_dimension_numbers<[2], [1], [1], [2], [0, 0, 0, 1, 1, 2], [0], [0]>} : vector<5x16x16xbf16>, vector<5x16x16xbf16>, vector<5x16x16xf32> -> vector<5x16x16xf32>
    "tpu.trace_stop"() : () -> ()
    %263 = vector.shape_cast %262 : vector<5x16x16xf32> to vector<80x16xf32>
    %264 = arith.truncf %263 : vector<80x16xf32> to vector<80x16xbf16>
    %c1_170 = arith.constant 1 : index
    %c0_171 = arith.constant 0 : index
    %c0_172 = arith.constant 0 : index
    %c0_173 = arith.constant 0 : index
    %265 = vector.load %arg14[%c1_170, %c0_171, %c0_172, %c0_173] : memref<2x2x16x32xbf16, #tpu.memory_space<vmem>>, vector<1x1x16x32xbf16>
    %266 = vector.shape_cast %265 : vector<1x1x16x32xbf16> to vector<16x32xbf16>
    %cst_174 = arith.constant dense<0.000000e+00> : vector<80x32xf32>
    %267 = tpu.matmul %264, %266, %cst_174 {dimension_numbers = #tpu.dot_dimension_numbers<[1], [0], [0], [1], [0, 0, 1, 1], [], []>} : vector<80x16xbf16>, vector<16x32xbf16>, vector<80x32xf32> -> vector<80x32xf32>
    %268 = vector.broadcast %220 : vector<1x32xf32> to vector<80x32xf32>
    %269 = arith.addf %268, %267 : vector<80x32xf32>
    %c1_175 = arith.constant 1 : index
    %c1_176 = arith.constant 1 : index
    %c0_177 = arith.constant 0 : index
    %c0_178 = arith.constant 0 : index
    %270 = vector.load %arg8[%c1_175, %c1_176, %c0_177, %c0_178] : memref<2x2x32x16xbf16, #tpu.memory_space<vmem>>, vector<1x1x32x16xbf16>
    %271 = vector.shape_cast %270 : vector<1x1x32x16xbf16> to vector<32x16xbf16>
    %cst_179 = arith.constant dense<0.000000e+00> : vector<80x16xf32>
    %272 = tpu.matmul %218, %271, %cst_179 {dimension_numbers = #tpu.dot_dimension_numbers<[1], [0], [0], [1], [0, 0, 1, 1], [], []>} : vector<80x32xbf16>, vector<32x16xbf16>, vector<80x16xf32> -> vector<80x16xf32>
    %c1_180 = arith.constant 1 : index
    %c1_181 = arith.constant 1 : index
    %c0_182 = arith.constant 0 : index
    %c0_183 = arith.constant 0 : index
    %273 = vector.load %arg11[%c1_180, %c1_181, %c0_182, %c0_183] : memref<2x2x1x16xf32, #tpu.memory_space<vmem>>, vector<1x1x1x16xf32>
    %274 = vector.shape_cast %273 : vector<1x1x1x16xf32> to vector<1x16xf32>
    %275 = vector.broadcast %274 : vector<1x16xf32> to vector<80x16xf32>
    %276 = arith.addf %272, %275 : vector<80x16xf32>
    %277 = vector.shape_cast %276 : vector<80x16xf32> to vector<5x16x16xf32>
    %c1_184 = arith.constant 1 : index
    %c1_185 = arith.constant 1 : index
    %c0_186 = arith.constant 0 : index
    %c0_187 = arith.constant 0 : index
    %278 = vector.load %arg9[%c1_184, %c1_185, %c0_186, %c0_187] : memref<2x2x32x16xbf16, #tpu.memory_space<vmem>>, vector<1x1x32x16xbf16>
    %279 = vector.shape_cast %278 : vector<1x1x32x16xbf16> to vector<32x16xbf16>
    %cst_188 = arith.constant dense<0.000000e+00> : vector<80x16xf32>
    %280 = tpu.matmul %218, %279, %cst_188 {dimension_numbers = #tpu.dot_dimension_numbers<[1], [0], [0], [1], [0, 0, 1, 1], [], []>} : vector<80x32xbf16>, vector<32x16xbf16>, vector<80x16xf32> -> vector<80x16xf32>
    %c1_189 = arith.constant 1 : index
    %c1_190 = arith.constant 1 : index
    %c0_191 = arith.constant 0 : index
    %c0_192 = arith.constant 0 : index
    %281 = vector.load %arg12[%c1_189, %c1_190, %c0_191, %c0_192] : memref<2x2x1x16xf32, #tpu.memory_space<vmem>>, vector<1x1x1x16xf32>
    %282 = vector.shape_cast %281 : vector<1x1x1x16xf32> to vector<1x16xf32>
    %283 = vector.broadcast %282 : vector<1x16xf32> to vector<80x16xf32>
    %284 = arith.addf %280, %283 : vector<80x16xf32>
    %285 = vector.shape_cast %284 : vector<80x16xf32> to vector<5x16x16xf32>
    %c1_193 = arith.constant 1 : index
    %c1_194 = arith.constant 1 : index
    %c0_195 = arith.constant 0 : index
    %c0_196 = arith.constant 0 : index
    %286 = vector.load %arg10[%c1_193, %c1_194, %c0_195, %c0_196] : memref<2x2x32x16xbf16, #tpu.memory_space<vmem>>, vector<1x1x32x16xbf16>
    %287 = vector.shape_cast %286 : vector<1x1x32x16xbf16> to vector<32x16xbf16>
    %cst_197 = arith.constant dense<0.000000e+00> : vector<80x16xf32>
    %288 = tpu.matmul %218, %287, %cst_197 {dimension_numbers = #tpu.dot_dimension_numbers<[1], [0], [0], [1], [0, 0, 1, 1], [], []>} : vector<80x32xbf16>, vector<32x16xbf16>, vector<80x16xf32> -> vector<80x16xf32>
    %c1_198 = arith.constant 1 : index
    %c1_199 = arith.constant 1 : index
    %c0_200 = arith.constant 0 : index
    %c0_201 = arith.constant 0 : index
    %289 = vector.load %arg13[%c1_198, %c1_199, %c0_200, %c0_201] : memref<2x2x1x16xf32, #tpu.memory_space<vmem>>, vector<1x1x1x16xf32>
    %290 = vector.shape_cast %289 : vector<1x1x1x16xf32> to vector<1x16xf32>
    %291 = vector.broadcast %290 : vector<1x16xf32> to vector<80x16xf32>
    %292 = arith.addf %288, %291 : vector<80x16xf32>
    %293 = vector.shape_cast %292 : vector<80x16xf32> to vector<5x16x16xf32>
    %294 = arith.truncf %277 : vector<5x16x16xf32> to vector<5x16x16xbf16>
    %295 = arith.truncf %285 : vector<5x16x16xf32> to vector<5x16x16xbf16>
    "tpu.trace_start"() <{level = 10 : i32, message = "gqd,gkd->gqk"}> : () -> ()
    %cst_202 = arith.constant dense<0.000000e+00> : vector<5x16x16xf32>
    %296 = tpu.matmul %294, %295, %cst_202 {dimension_numbers = #tpu.dot_dimension_numbers<[2], [2], [1], [1], [0, 0, 0, 1, 1, 1], [0], [0]>} : vector<5x16x16xbf16>, vector<5x16x16xbf16>, vector<5x16x16xf32> -> vector<5x16x16xf32>
    "tpu.trace_stop"() : () -> ()
    %cst_203 = arith.constant 2.500000e-01 : f32
    %297 = vector.broadcast %cst_203 : f32 to vector<5x16x16xf32>
    %298 = arith.mulf %296, %297 : vector<5x16x16xf32>
    %cst_204 = arith.constant dense<0xFF800000> : vector<5x16xf32>
    %299 = vector.multi_reduction <maximumf>, %298, %cst_204 [2] : vector<5x16x16xf32> to vector<5x16xf32>
    %300 = vector.shape_cast %299 : vector<5x16xf32> to vector<5x16x1xf32>
    %301 = vector.broadcast %300 : vector<5x16x1xf32> to vector<5x16x16xf32>
    %302 = arith.subf %298, %301 : vector<5x16x16xf32>
    %303 = math.exp %302 : vector<5x16x16xf32>
    %cst_205 = arith.constant dense<0.000000e+00> : vector<5x16xf32>
    %304 = vector.multi_reduction <add>, %303, %cst_205 [2] : vector<5x16x16xf32> to vector<5x16xf32>
    %305 = vector.shape_cast %304 : vector<5x16xf32> to vector<5x16x1xf32>
    %306 = tpu.reciprocal %305 {approx = true} : vector<5x16x1xf32> -> vector<5x16x1xf32>
    %307 = vector.broadcast %306 : vector<5x16x1xf32> to vector<5x16x16xf32>
    %308 = arith.mulf %303, %307 : vector<5x16x16xf32>
    %309 = arith.truncf %308 : vector<5x16x16xf32> to vector<5x16x16xbf16>
    %310 = arith.truncf %293 : vector<5x16x16xf32> to vector<5x16x16xbf16>
    "tpu.trace_start"() <{level = 10 : i32, message = "gqk,gkd->gqd"}> : () -> ()
    %cst_206 = arith.constant dense<0.000000e+00> : vector<5x16x16xf32>
    %311 = tpu.matmul %309, %310, %cst_206 {dimension_numbers = #tpu.dot_dimension_numbers<[2], [1], [1], [2], [0, 0, 0, 1, 1, 2], [0], [0]>} : vector<5x16x16xbf16>, vector<5x16x16xbf16>, vector<5x16x16xf32> -> vector<5x16x16xf32>
    "tpu.trace_stop"() : () -> ()
    %312 = vector.shape_cast %311 : vector<5x16x16xf32> to vector<80x16xf32>
    %313 = arith.truncf %312 : vector<80x16xf32> to vector<80x16xbf16>
    %c1_207 = arith.constant 1 : index
    %c1_208 = arith.constant 1 : index
    %c0_209 = arith.constant 0 : index
    %c0_210 = arith.constant 0 : index
    %314 = vector.load %arg14[%c1_207, %c1_208, %c0_209, %c0_210] : memref<2x2x16x32xbf16, #tpu.memory_space<vmem>>, vector<1x1x16x32xbf16>
    %315 = vector.shape_cast %314 : vector<1x1x16x32xbf16> to vector<16x32xbf16>
    %cst_211 = arith.constant dense<0.000000e+00> : vector<80x32xf32>
    %316 = tpu.matmul %313, %315, %cst_211 {dimension_numbers = #tpu.dot_dimension_numbers<[1], [0], [0], [1], [0, 0, 1, 1], [], []>} : vector<80x16xbf16>, vector<16x32xbf16>, vector<80x32xf32> -> vector<80x32xf32>
    %317 = arith.addf %269, %316 : vector<80x32xf32>
    %318 = arith.addf %191, %317 : vector<80x32xf32>
    %c1_212 = arith.constant 1 : index
    %c0_213 = arith.constant 0 : index
    %c0_214 = arith.constant 0 : index
    %319 = vector.load %arg16[%c1_212, %c0_213, %c0_214] : memref<2x1x32xf32, #tpu.memory_space<vmem>>, vector<1x1x32xf32>
    %320 = vector.shape_cast %319 : vector<1x1x32xf32> to vector<1x32xf32>
    %c1_215 = arith.constant 1 : index
    %c0_216 = arith.constant 0 : index
    %c0_217 = arith.constant 0 : index
    %321 = vector.load %arg17[%c1_215, %c0_216, %c0_217] : memref<2x1x32xf32, #tpu.memory_space<vmem>>, vector<1x1x32xf32>
    %322 = vector.shape_cast %321 : vector<1x1x32xf32> to vector<1x32xf32>
    %cst_218 = arith.constant dense<0.000000e+00> : vector<80xf32>
    %323 = vector.multi_reduction <add>, %318, %cst_218 [1] : vector<80x32xf32> to vector<80xf32>
    %324 = vector.shape_cast %323 : vector<80xf32> to vector<80x1xf32>
    %cst_219 = arith.constant 3.200000e+01 : f32
    %325 = vector.broadcast %cst_219 : f32 to vector<80x1xf32>
    %326 = arith.divf %324, %325 : vector<80x1xf32>
    %327 = vector.broadcast %326 : vector<80x1xf32> to vector<80x32xf32>
    %328 = arith.subf %318, %327 : vector<80x32xf32>
    %329 = arith.mulf %328, %328 : vector<80x32xf32>
    %cst_220 = arith.constant dense<0.000000e+00> : vector<80xf32>
    %330 = vector.multi_reduction <add>, %329, %cst_220 [1] : vector<80x32xf32> to vector<80xf32>
    %331 = vector.shape_cast %330 : vector<80xf32> to vector<80x1xf32>
    %cst_221 = arith.constant 3.200000e+01 : f32
    %332 = vector.broadcast %cst_221 : f32 to vector<80x1xf32>
    %333 = arith.divf %331, %332 : vector<80x1xf32>
    %334 = vector.broadcast %326 : vector<80x1xf32> to vector<80x32xf32>
    %335 = arith.subf %318, %334 : vector<80x32xf32>
    %cst_222 = arith.constant 9.99999997E-7 : f32
    %336 = vector.broadcast %cst_222 : f32 to vector<80x1xf32>
    %337 = arith.addf %333, %336 : vector<80x1xf32>
    %338 = math.rsqrt %337 : vector<80x1xf32>
    %339 = vector.broadcast %338 : vector<80x1xf32> to vector<80x32xf32>
    %340 = arith.mulf %335, %339 : vector<80x32xf32>
    %341 = vector.broadcast %320 : vector<1x32xf32> to vector<80x32xf32>
    %342 = arith.mulf %340, %341 : vector<80x32xf32>
    %343 = vector.broadcast %322 : vector<1x32xf32> to vector<80x32xf32>
    %344 = arith.addf %342, %343 : vector<80x32xf32>
    %345 = arith.truncf %344 : vector<80x32xf32> to vector<80x32xbf16>
    %c1_223 = arith.constant 1 : index
    %c0_224 = arith.constant 0 : index
    %c0_225 = arith.constant 0 : index
    %346 = vector.load %arg18[%c1_223, %c0_224, %c0_225] : memref<2x32x64xbf16, #tpu.memory_space<vmem>>, vector<1x32x64xbf16>
    %347 = vector.shape_cast %346 : vector<1x32x64xbf16> to vector<32x64xbf16>
    %cst_226 = arith.constant dense<0.000000e+00> : vector<80x64xf32>
    %348 = tpu.matmul %345, %347, %cst_226 {dimension_numbers = #tpu.dot_dimension_numbers<[1], [0], [0], [1], [0, 0, 1, 1], [], []>} : vector<80x32xbf16>, vector<32x64xbf16>, vector<80x64xf32> -> vector<80x64xf32>
    %c1_227 = arith.constant 1 : index
    %c0_228 = arith.constant 0 : index
    %c0_229 = arith.constant 0 : index
    %349 = vector.load %arg19[%c1_227, %c0_228, %c0_229] : memref<2x1x64xf32, #tpu.memory_space<vmem>>, vector<1x1x64xf32>
    %350 = vector.shape_cast %349 : vector<1x1x64xf32> to vector<1x64xf32>
    %351 = vector.broadcast %350 : vector<1x64xf32> to vector<80x64xf32>
    %352 = arith.addf %348, %351 : vector<80x64xf32>
    %353 = arith.mulf %352, %352 : vector<80x64xf32>
    %354 = arith.mulf %352, %353 : vector<80x64xf32>
    %cst_230 = arith.constant 4.471500e-02 : f32
    %355 = vector.broadcast %cst_230 : f32 to vector<80x64xf32>
    %356 = arith.mulf %355, %354 : vector<80x64xf32>
    %357 = arith.addf %352, %356 : vector<80x64xf32>
    %cst_231 = arith.constant 0.797884583 : f32
    %358 = vector.broadcast %cst_231 : f32 to vector<80x64xf32>
    %359 = arith.mulf %358, %357 : vector<80x64xf32>
    %360 = math.tanh %359 : vector<80x64xf32>
    %cst_232 = arith.constant 1.000000e+00 : f32
    %361 = vector.broadcast %cst_232 : f32 to vector<80x64xf32>
    %362 = arith.addf %361, %360 : vector<80x64xf32>
    %cst_233 = arith.constant 5.000000e-01 : f32
    %363 = vector.broadcast %cst_233 : f32 to vector<80x64xf32>
    %364 = arith.mulf %363, %362 : vector<80x64xf32>
    %365 = arith.mulf %352, %364 : vector<80x64xf32>
    %366 = arith.truncf %365 : vector<80x64xf32> to vector<80x64xbf16>
    %c1_234 = arith.constant 1 : index
    %c0_235 = arith.constant 0 : index
    %c0_236 = arith.constant 0 : index
    %367 = vector.load %arg20[%c1_234, %c0_235, %c0_236] : memref<2x64x32xbf16, #tpu.memory_space<vmem>>, vector<1x64x32xbf16>
    %368 = vector.shape_cast %367 : vector<1x64x32xbf16> to vector<64x32xbf16>
    %cst_237 = arith.constant dense<0.000000e+00> : vector<80x32xf32>
    %369 = tpu.matmul %366, %368, %cst_237 {dimension_numbers = #tpu.dot_dimension_numbers<[1], [0], [0], [1], [0, 0, 1, 1], [], []>} : vector<80x64xbf16>, vector<64x32xbf16>, vector<80x32xf32> -> vector<80x32xf32>
    %c1_238 = arith.constant 1 : index
    %c0_239 = arith.constant 0 : index
    %c0_240 = arith.constant 0 : index
    %370 = vector.load %arg21[%c1_238, %c0_239, %c0_240] : memref<2x1x32xf32, #tpu.memory_space<vmem>>, vector<1x1x32xf32>
    %371 = vector.shape_cast %370 : vector<1x1x32xf32> to vector<1x32xf32>
    %372 = vector.broadcast %371 : vector<1x32xf32> to vector<80x32xf32>
    %373 = arith.addf %369, %372 : vector<80x32xf32>
    %374 = arith.addf %318, %373 : vector<80x32xf32>
    %c0_241 = arith.constant 0 : index
    %c0_242 = arith.constant 0 : index
    %c0_243 = arith.constant 0 : index
    %375 = vector.load %arg5[%c0_241, %c0_242, %c0_243] : memref<4x5x80xf32, #tpu.memory_space<vmem>>, vector<1x5x80xf32>
    %376 = vector.shape_cast %375 : vector<1x5x80xf32> to vector<5x80xf32>
    %cst_244 = arith.constant dense<0.000000e+00> : vector<5x32xf32>
    %377 = tpu.matmul %376, %374, %cst_244 {dimension_numbers = #tpu.dot_dimension_numbers<[1], [0], [0], [1], [0, 0, 1, 1], [], []>} : vector<5x80xf32>, vector<80x32xf32>, vector<5x32xf32> -> vector<5x32xf32>
    %c1_245 = arith.constant 1 : index
    %c0_246 = arith.constant 0 : index
    %c0_247 = arith.constant 0 : index
    %378 = vector.load %arg5[%c1_245, %c0_246, %c0_247] : memref<4x5x80xf32, #tpu.memory_space<vmem>>, vector<1x5x80xf32>
    %379 = vector.shape_cast %378 : vector<1x5x80xf32> to vector<5x80xf32>
    %cst_248 = arith.constant dense<0.000000e+00> : vector<5x32xf32>
    %380 = tpu.matmul %379, %374, %cst_248 {dimension_numbers = #tpu.dot_dimension_numbers<[1], [0], [0], [1], [0, 0, 1, 1], [], []>} : vector<5x80xf32>, vector<80x32xf32>, vector<5x32xf32> -> vector<5x32xf32>
    %c2 = arith.constant 2 : index
    %c0_249 = arith.constant 0 : index
    %c0_250 = arith.constant 0 : index
    %381 = vector.load %arg5[%c2, %c0_249, %c0_250] : memref<4x5x80xf32, #tpu.memory_space<vmem>>, vector<1x5x80xf32>
    %382 = vector.shape_cast %381 : vector<1x5x80xf32> to vector<5x80xf32>
    %cst_251 = arith.constant dense<0.000000e+00> : vector<5x32xf32>
    %383 = tpu.matmul %382, %374, %cst_251 {dimension_numbers = #tpu.dot_dimension_numbers<[1], [0], [0], [1], [0, 0, 1, 1], [], []>} : vector<5x80xf32>, vector<80x32xf32>, vector<5x32xf32> -> vector<5x32xf32>
    %c3 = arith.constant 3 : index
    %c0_252 = arith.constant 0 : index
    %c0_253 = arith.constant 0 : index
    %384 = vector.load %arg5[%c3, %c0_252, %c0_253] : memref<4x5x80xf32, #tpu.memory_space<vmem>>, vector<1x5x80xf32>
    %385 = vector.shape_cast %384 : vector<1x5x80xf32> to vector<5x80xf32>
    %cst_254 = arith.constant dense<0.000000e+00> : vector<5x32xf32>
    %386 = tpu.matmul %385, %374, %cst_254 {dimension_numbers = #tpu.dot_dimension_numbers<[1], [0], [0], [1], [0, 0, 1, 1], [], []>} : vector<5x80xf32>, vector<80x32xf32>, vector<5x32xf32> -> vector<5x32xf32>
    %387 = tpu.concatenate %377, %380, %383, %386 in 1 : vector<5x32xf32>, vector<5x32xf32>, vector<5x32xf32>, vector<5x32xf32> -> vector<5x128xf32>
    %c0_255 = arith.constant 0 : index
    %c0_256 = arith.constant 0 : index
    %c0_257 = arith.constant 0 : index
    %388 = vector.load %arg22[%c0_255, %c0_256, %c0_257] : memref<1x5x128xf32, #tpu.memory_space<vmem>>, vector<1x5x128xf32>
    %389 = vector.shape_cast %388 : vector<1x5x128xf32> to vector<5x128xf32>
    %390 = vector.shape_cast %387 : vector<5x128xf32> to vector<1x5x128xf32>
    tpu.vector_store %arg22[%c0_255, %c0_256, %c0_257], %390 {strides = array<i32>} : memref<1x5x128xf32, #tpu.memory_space<vmem>>, vector<1x5x128xf32>,
    return
  }
  func.func @transform_0(%arg0: i32) -> (i32, i32, i32) {
    %c0_i32 = arith.constant 0 : i32
    %c0_i32_0 = arith.constant 0 : i32
    %c0_i32_1 = arith.constant 0 : i32
    return %arg0, %c0_i32, %c0_i32_0 : i32, i32, i32
  }
  func.func @transform_1(%arg0: i32) -> (i32, i32) {
    %c0_i32 = arith.constant 0 : i32
    %c0_i32_0 = arith.constant 0 : i32
    %c0_i32_1 = arith.constant 0 : i32
    return %c0_i32, %c0_i32_0 : i32, i32
  }
  func.func @transform_2(%arg0: i32) -> (i32, i32) {
    %c0_i32 = arith.constant 0 : i32
    %c0_i32_0 = arith.constant 0 : i32
    %c0_i32_1 = arith.constant 0 : i32
    return %c0_i32, %c0_i32_0 : i32, i32
  }
  func.func @transform_3(%arg0: i32) -> (i32, i32) {
    %c0_i32 = arith.constant 0 : i32
    %c0_i32_0 = arith.constant 0 : i32
    %c0_i32_1 = arith.constant 0 : i32
    return %c0_i32, %c0_i32_0 : i32, i32
  }
  func.func @transform_4(%arg0: i32) -> (i32, i32, i32) {
    %c0_i32 = arith.constant 0 : i32
    %c0_i32_0 = arith.constant 0 : i32
    %c0_i32_1 = arith.constant 0 : i32
    %c0_i32_2 = arith.constant 0 : i32
    return %c0_i32, %c0_i32_0, %c0_i32_1 : i32, i32, i32
  }
  func.func @transform_5(%arg0: i32) -> (i32, i32, i32) {
    %c0_i32 = arith.constant 0 : i32
    %c0_i32_0 = arith.constant 0 : i32
    %c0_i32_1 = arith.constant 0 : i32
    %c0_i32_2 = arith.constant 0 : i32
    return %c0_i32, %c0_i32_0, %c0_i32_1 : i32, i32, i32
  }
  func.func @transform_6(%arg0: i32) -> (i32, i32, i32) {
    %c0_i32 = arith.constant 0 : i32
    %c0_i32_0 = arith.constant 0 : i32
    %c0_i32_1 = arith.constant 0 : i32
    %c0_i32_2 = arith.constant 0 : i32
    return %c0_i32, %c0_i32_0, %c0_i32_1 : i32, i32, i32
  }
  func.func @transform_7(%arg0: i32) -> (i32, i32, i32, i32) {
    %c0_i32 = arith.constant 0 : i32
    %c0_i32_0 = arith.constant 0 : i32
    %c0_i32_1 = arith.constant 0 : i32
    %c0_i32_2 = arith.constant 0 : i32
    %c0_i32_3 = arith.constant 0 : i32
    return %c0_i32, %c0_i32_0, %c0_i32_1, %c0_i32_2 : i32, i32, i32, i32
  }
  func.func @transform_8(%arg0: i32) -> (i32, i32, i32, i32) {
    %c0_i32 = arith.constant 0 : i32
    %c0_i32_0 = arith.constant 0 : i32
    %c0_i32_1 = arith.constant 0 : i32
    %c0_i32_2 = arith.constant 0 : i32
    %c0_i32_3 = arith.constant 0 : i32
    return %c0_i32, %c0_i32_0, %c0_i32_1, %c0_i32_2 : i32, i32, i32, i32
  }
  func.func @transform_9(%arg0: i32) -> (i32, i32, i32, i32) {
    %c0_i32 = arith.constant 0 : i32
    %c0_i32_0 = arith.constant 0 : i32
    %c0_i32_1 = arith.constant 0 : i32
    %c0_i32_2 = arith.constant 0 : i32
    %c0_i32_3 = arith.constant 0 : i32
    return %c0_i32, %c0_i32_0, %c0_i32_1, %c0_i32_2 : i32, i32, i32, i32
  }
  func.func @transform_10(%arg0: i32) -> (i32, i32, i32, i32) {
    %c0_i32 = arith.constant 0 : i32
    %c0_i32_0 = arith.constant 0 : i32
    %c0_i32_1 = arith.constant 0 : i32
    %c0_i32_2 = arith.constant 0 : i32
    %c0_i32_3 = arith.constant 0 : i32
    return %c0_i32, %c0_i32_0, %c0_i32_1, %c0_i32_2 : i32, i32, i32, i32
  }
  func.func @transform_11(%arg0: i32) -> (i32, i32, i32, i32) {
    %c0_i32 = arith.constant 0 : i32
    %c0_i32_0 = arith.constant 0 : i32
    %c0_i32_1 = arith.constant 0 : i32
    %c0_i32_2 = arith.constant 0 : i32
    %c0_i32_3 = arith.constant 0 : i32
    return %c0_i32, %c0_i32_0, %c0_i32_1, %c0_i32_2 : i32, i32, i32, i32
  }
  func.func @transform_12(%arg0: i32) -> (i32, i32, i32, i32) {
    %c0_i32 = arith.constant 0 : i32
    %c0_i32_0 = arith.constant 0 : i32
    %c0_i32_1 = arith.constant 0 : i32
    %c0_i32_2 = arith.constant 0 : i32
    %c0_i32_3 = arith.constant 0 : i32
    return %c0_i32, %c0_i32_0, %c0_i32_1, %c0_i32_2 : i32, i32, i32, i32
  }
  func.func @transform_13(%arg0: i32) -> (i32, i32, i32, i32) {
    %c0_i32 = arith.constant 0 : i32
    %c0_i32_0 = arith.constant 0 : i32
    %c0_i32_1 = arith.constant 0 : i32
    %c0_i32_2 = arith.constant 0 : i32
    %c0_i32_3 = arith.constant 0 : i32
    return %c0_i32, %c0_i32_0, %c0_i32_1, %c0_i32_2 : i32, i32, i32, i32
  }
  func.func @transform_14(%arg0: i32) -> (i32, i32, i32) {
    %c0_i32 = arith.constant 0 : i32
    %c0_i32_0 = arith.constant 0 : i32
    %c0_i32_1 = arith.constant 0 : i32
    %c0_i32_2 = arith.constant 0 : i32
    return %c0_i32, %c0_i32_0, %c0_i32_1 : i32, i32, i32
  }
  func.func @transform_15(%arg0: i32) -> (i32, i32, i32) {
    %c0_i32 = arith.constant 0 : i32
    %c0_i32_0 = arith.constant 0 : i32
    %c0_i32_1 = arith.constant 0 : i32
    %c0_i32_2 = arith.constant 0 : i32
    return %c0_i32, %c0_i32_0, %c0_i32_1 : i32, i32, i32
  }
  func.func @transform_16(%arg0: i32) -> (i32, i32, i32) {
    %c0_i32 = arith.constant 0 : i32
    %c0_i32_0 = arith.constant 0 : i32
    %c0_i32_1 = arith.constant 0 : i32
    %c0_i32_2 = arith.constant 0 : i32
    return %c0_i32, %c0_i32_0, %c0_i32_1 : i32, i32, i32
  }
  func.func @transform_17(%arg0: i32) -> (i32, i32, i32) {
    %c0_i32 = arith.constant 0 : i32
    %c0_i32_0 = arith.constant 0 : i32
    %c0_i32_1 = arith.constant 0 : i32
    %c0_i32_2 = arith.constant 0 : i32
    return %c0_i32, %c0_i32_0, %c0_i32_1 : i32, i32, i32
  }
  func.func @transform_18(%arg0: i32) -> (i32, i32, i32) {
    %c0_i32 = arith.constant 0 : i32
    %c0_i32_0 = arith.constant 0 : i32
    %c0_i32_1 = arith.constant 0 : i32
    %c0_i32_2 = arith.constant 0 : i32
    return %c0_i32, %c0_i32_0, %c0_i32_1 : i32, i32, i32
  }
  func.func @transform_19(%arg0: i32) -> (i32, i32, i32) {
    %c0_i32 = arith.constant 0 : i32
    %c0_i32_0 = arith.constant 0 : i32
    %c0_i32_1 = arith.constant 0 : i32
    %c0_i32_2 = arith.constant 0 : i32
    return %c0_i32, %c0_i32_0, %c0_i32_1 : i32, i32, i32
  }
  func.func @transform_20(%arg0: i32) -> (i32, i32, i32) {
    %c0_i32 = arith.constant 0 : i32
    %c0_i32_0 = arith.constant 0 : i32
    %c0_i32_1 = arith.constant 0 : i32
    %c0_i32_2 = arith.constant 0 : i32
    return %c0_i32, %c0_i32_0, %c0_i32_1 : i32, i32, i32
  }
  func.func @transform_21(%arg0: i32) -> (i32, i32, i32) {
    %c0_i32 = arith.constant 0 : i32
    %c0_i32_0 = arith.constant 0 : i32
    %c0_i32_1 = arith.constant 0 : i32
    return %arg0, %c0_i32, %c0_i32_0 : i32, i32, i32
  }
}

</mosaic_0001>

<bundles_post_ra>
// kernel: tpu_custom_call.1
= control target key start
LH: loop header
LB: loop body
LE: loop exit
PB: predicated region body
PF: predicated region fallthrough
CT: control target
= control target key end

     0   :  { %s10880_s0 = inlined_call_operand.vmem [shape: bf16[2,80,192], index: 0, kind: input, shape index: {}]   ;;  %s10881_s1 = inlined_call_operand.vmem [shape: bf16[192,32], index: 1, kind: input, shape index: {}]   ;;  %s10882_s2 = inlined_call_operand.vmem [shape: f32[1,32], index: 2, kind: input, shape index: {}]   ;;  %s10883_s3 = inlined_call_operand.vmem [shape: f32[80,32], index: 3, kind: input, shape index: {}]   ;;  %s10884_s4 = inlined_call_operand.vmem [shape: f32[4,5,80], index: 4, kind: input, shape index: {}]   ;;  %s10885_s5 = inlined_call_operand.vmem [shape: f32[2,1,32], index: 5, kind: input, shape index: {}]   ;;  %s10886_s6 = inlined_call_operand.vmem [shape: f32[2,1,32], index: 6, kind: input, shape index: {}]   ;;  %s10887_s7 = inlined_call_operand.vmem [shape: bf16[2,2,32,16], index: 7, kind: input, shape index: {}]   ;;  %s10888_s8 = inlined_call_operand.vmem [shape: bf16[2,2,32,16], index: 8, kind: input, shape index: {}]   ;;  %s10889_s9 = inlined_call_operand.vmem [shape: bf16[2,2,32,16], index: 9, kind: input, shape index: {}]   ;;  %s10890_s10 = inlined_call_operand.vmem [shape: f32[2,2,1,16], index: 10, kind: input, shape index: {}]   ;;  %s10891_s11 = inlined_call_operand.vmem [shape: f32[2,2,1,16], index: 11, kind: input, shape index: {}]   ;;  %s10892_s12 = inlined_call_operand.vmem [shape: f32[2,2,1,16], index: 12, kind: input, shape index: {}]   ;;  %s10893_s13 = inlined_call_operand.vmem [shape: bf16[2,2,16,32], index: 13, kind: input, shape index: {}]   ;;  %s10894_s14 = inlined_call_operand.vmem [shape: f32[2,1,32], index: 14, kind: input, shape index: {}]   ;;  %s10895_s15 = inlined_call_operand.vmem [shape: f32[2,1,32], index: 15, kind: input, shape index: {}]   ;;  %s10896_s16 = inlined_call_operand.vmem [shape: f32[2,1,32], index: 16, kind: input, shape index: {}]   ;;  %s10897_s17 = inlined_call_operand.vmem [shape: bf16[2,32,64], index: 17, kind: input, shape index: {}]   ;;  %s10898_s18 = inlined_call_operand.vmem [shape: f32[2,1,64], index: 18, kind: input, shape index: {}]   ;;  %s10899_s19 = inlined_call_operand.vmem [shape: bf16[2,64,32], index: 19, kind: input, shape index: {}]   ;;  %s10900_s20 = inlined_call_operand.vmem [shape: f32[2,1,32], index: 20, kind: input, shape index: {}]   ;;  %s10901_s21 = inlined_call_operand.vmem [shape: f32[2,5,128], index: 21, kind: output, shape index: {}]  }
   0x1   :  { %10906 = sst [smem:[#allocation2_spill]] %s10880_s0 }
   0x2   :  { %10907 = sst [smem:[#allocation3_spill]] %s10881_s1 }
   0x3   :  { %10908 = sst [smem:[#allocation4_spill]] %s10882_s2  ;;  %s8672_s2 = smov 0  }
   0x4   :  { %10909 = sst [smem:[#allocation5_spill]] %s10883_s3 }
   0x5   :  { %10910 = sst [smem:[#allocation6_spill]] %s10884_s4 }
   0x6   :  { %10911 = sst [smem:[#allocation7_spill]] %s10885_s5 }
   0x7 LB: > { %s6728_s25 = sadd.s32 4294967295, %s8553_s2   ;;  %p6732_p0 = scmp.ge.s32.totalorder %s8553_s2, 1  ;;  %s8553_s2 = sphi %s8672_s2, %s31_s2  }
   0x8   : > { %p587_p1 = scmp.lt.s32.totalorder %s8553_s2, 3 }
   0xa   : > { %p588_p2 = pnand %p6732_p0, %p587_p1 }
   0xb   : > { %s10912_s3 = sld [smem:[#allocation3_spill]] (!%p588_p2)  ;;  %v8555_v1 = vmov (!%p588_p2), 0   ;;  %p646_p3 = scmp.lt.s32.totalorder (!%p588_p2), %s6728_s25, 1  ;;  %vm814_vm0 = vcmask (!%p588_p2), 523264   ;;  %vm925_vm1 = vcmask (!%p588_p2), 261120   ;;  %vm8557_vm2 = vmmov (!%p588_p2), 0  }
   0xc   : > { %591 = sbr.rel (%p588_p2) target bundleno = 7329 (0x1ca1), region = 104  ;;  %830 = vmatprep.subr.bf16.mxu0 (!%p588_p2), %v8555_v1  ;;  %s10913_s24 = sld [smem:[#allocation2_spill]] (!%p588_p2)  ;;  %vm1408_vm3 = vcmask (!%p588_p2), 130048   ;;  %vm6359_vm4 = vcmask (!%p588_p2), 654336   ;;  %vm6672_vm5 = vcmask (!%p588_p2), 785408  }
   0xd   : > { %s10914_s22 = sld [smem:[#allocation4_spill]] (!%p588_p2)  ;;  %s10923_s27 = sld [smem:[#allocation6_spill]] (!%p588_p2) }
   0xe   : > { %s8560_s23 = smov (!%p588_p2), 32   ;;  %s8561_s1 = smov (!%p588_p2), 96  }
  0x11   : > { %v8200_v0 = vld [vmem:[%s10912_s3] sm:$0xff] (!%p588_p2)   ;;  %v8201_v2 = vld [vmem:[%s10912_s3 + $0x8] sm:$0xff] (!%p588_p2)   ;;  %v8202_v3 = vld [vmem:[%s10912_s3 + $0x10] sm:$0xff] (!%p588_p2)  }
  0x12   : > { %831 = vmatpush1.bf16.msra.mxu0 (!%p588_p2), %v8200_v0  ;;  %v8203_v4 = vld [vmem:[%s10912_s3 + $0x18] sm:$0xff] (!%p588_p2)   ;;  %v8204_v6 = vld [vmem:[%s10912_s3 + $0x20] sm:$0xff] (!%p588_p2)   ;;  %v8205_v7 = vld [vmem:[%s10912_s3 + $0x28] sm:$0xff] (!%p588_p2)  }
  0x13   : > { %832 = vmatprep.subr.bf16.mxu0 %v8555_v1  ;;  %s10925_s25 = smov (!%p646_p3, %s6728_s25), 1  ;;  %v8206_v8 = vld [vmem:[%s10912_s3 + $0x30] sm:$0xff]   ;;  %v8207_v9 = vld [vmem:[%s10912_s3 + $0x38] sm:$0xff]   ;;  %v8208_v10 = vld [vmem:[%s10912_s3 + $0x40] sm:$0xff]  }
  0x14   : > { %s8184_s30 = smul.u32 80, %s10925_s25  ;;  %v8209_v11 = vld [vmem:[%s10912_s3 + $0x48] sm:$0xff]   ;;  %v8210_v12 = vld [vmem:[%s10912_s3 + $0x50] sm:$0xff]   ;;  %v8211_v13 = vld [vmem:[%s10912_s3 + $0x58] sm:$0xff]   ;;  %s6734_s28 = sshll.u32 %s10925_s25, 3 }
  0x15   : > { %v8742_v23 = vld [vmem:[%s10914_s22] ss:$0 sm:$0xff]  ;;  %s8559_s22 = smov 64   ;;  %s654_s0 = scalar_lea.vmem %s10901_s21, %s6734_s28 }
  0x16   : > { %833 = vmatpush1.bf16.msra.mxu0 %v8201_v2  ;;  %s8698_s26 = scalar_lea.vmem %s10913_s24, %s8184_s30  ;;  %s10915_s24 = sld [smem:[#allocation5_spill]] }
  0x17   : > { %834 = vmatprep.subr.bf16.mxu0 %v8555_v1  ;;  %v8214_v5 = vld [vmem:[%s8698_s26 + $0x4] ss:$8 sps:$4 sm:$0xff]   ;;  %v8212_v14 = vld [vmem:[%s8698_s26] ss:$8 sps:$4 sm:$0xff]   ;;  %v8215_v15 = vld [vmem:[%s8698_s26 + $0x14] ss:$8 sps:$4 sm:$0xff]  }
  0x18   : > { %6758 = vmatprep.mubr.msk.bf16.mxu0 %vm814_vm0, %v8214_v5  ;;  %v8217_v16 = vld [vmem:[%s8698_s26 + $0x10] ss:$8 sps:$4 sm:$0xff]   ;;  %v8218_v17 = vld [vmem:[%s8698_s26 + $0x24] ss:$8 sps:$4 sm:$0xff]   ;;  %v8220_v18 = vld [vmem:[%s8698_s26 + $0x20] ss:$8 sps:$4 sm:$0xff]  }
  0x19   : > { %v8221_v19 = vld [vmem:[%s8698_s26 + $0x34] ss:$8 sps:$4 sm:$0xff]   ;;  %v8223_v20 = vld [vmem:[%s8698_s26 + $0x30] ss:$8 sps:$4 sm:$0xff]   ;;  %v8224_v21 = vld [vmem:[%s8698_s26 + $0x44] ss:$8 sps:$4 sm:$0xff]  }
  0x1a   : > { %835 = vmatpush1.bf16.msra.mxu0 %v8202_v3  ;;  %v8226_v22 = vld [vmem:[%s8698_s26 + $0x40] ss:$8 sps:$4 sm:$0xff]   ;;  %s10916_s30 = sld [smem:[#allocation7_spill]] }
  0x1b   : > { %836 = vmatprep.subr.bf16.mxu0 %v8555_v1 }
  0x1c   : > { %v903_v25 = vld [vmem:[%s10915_s24] sm:$0xff]  ;;  %v904_v29 = vld [vmem:[%s10915_s24 + $0x8] sm:$0xff]  ;;  %v905_v36 = vld [vmem:[%s10915_s24 + $0x10] sm:$0xff] }
  0x1d   : > { %v906_v41 = vld [vmem:[%s10915_s24 + $0x18] sm:$0xff]  ;;  %v907_v48 = vld [vmem:[%s10915_s24 + $0x20] sm:$0xff]  ;;  %v908_v53 = vld [vmem:[%s10915_s24 + $0x28] sm:$0xff] }
  0x1e   : > { %837 = vmatpush1.bf16.msra.mxu0 %v8203_v4  ;;  %v909_v61 = vld [vmem:[%s10915_s24 + $0x30] sm:$0xff] }
  0x1f   : > { %838 = vmatprep.subr.bf16.mxu0 %v8555_v1 }
  0x22   : > { %839 = vmatpush1.bf16.msra.mxu0 %v8204_v6 }
  0x23   : > { %840 = vmatprep.subr.bf16.mxu0 %v8555_v1 }
  0x26   : > { %841 = vmatpush1.bf16.msra.mxu0 %v8205_v7 }
  0x27   : > { %842 = vmatprep.subr.bf16.mxu0 %v8555_v1 }
  0x2a   : > { %843 = vmatpush1.bf16.msra.mxu0 %v8206_v8 }
  0x2b   : > { %844 = vmatprep.subr.bf16.mxu0 %v8555_v1 }
  0x2e   : > { %845 = vmatpush1.bf16.msra.mxu0 %v8207_v9  ;;  %v911_v9 = vld [vmem:[%s10915_s24 + $0x40] sm:$0xff] }
  0x2f   : > { %846 = vmatprep.subr.bf16.mxu0 %v8555_v1 }
  0x32   : > { %847 = vmatpush1.bf16.msra.mxu0 %v8208_v10 }
  0x33   : > { %848 = vmatprep.subr.bf16.mxu0 %v8555_v1 }
  0x36   : > { %849 = vmatpush1.bf16.msra.mxu0 %v8209_v11 }
  0x37   : > { %850 = vmatprep.subr.bf16.mxu0 %v8555_v1 }
  0x3a   : > { %851 = vmatpush1.bf16.msra.mxu0 %v8210_v12 }
  0x3b   : > { %852 = vmatprep.subr.bf16.mxu0 %v8555_v1  ;;  %v910_v1 = vld [vmem:[%s10915_s24 + $0x38] sm:$0xff] }
  0x3e   : > { %853 = vmatpush1.bf16.msra.mxu0 %v8211_v13  ;;  %v912_v13 = vld [vmem:[%s10915_s24 + $0x48] sm:$0xff] }
  0x41   : > { %863 = vmatmul.mubr.bf16.vlgmr.msra.gmra.mrb[0].mxu0 %v8212_v14 }
  0x42   : > { %6759 = vmatprep.mubr.msk.bf16.mxu0 %vm814_vm0, %v8215_v15 }
  0x49   : > { %871 = vmatmul.mubr.bf16.gmra.mrb[4].mxu0 %v8217_v16 }
  0x4a   : > { %6760 = vmatprep.mubr.msk.bf16.mxu0 %vm814_vm0, %v8218_v17 }
  0x51   : > { %879 = vmatmul.mubr.bf16.gmra.mrb[8].mxu0 %v8220_v18 }
  0x52   : > { %6761 = vmatprep.mubr.msk.bf16.mxu0 %vm814_vm0, %v8221_v19 }
  0x59   : > { %887 = vmatmul.mubr.bf16.gmra.mrb[12].mxu0 %v8223_v20 }
  0x5a   : > { %6762 = vmatprep.mubr.msk.bf16.mxu0 %vm814_vm0, %v8224_v21 }
  0x61   : > { %895 = vmatmul.mubr.bf16.gmra.mrb[16].mxu0 %v8226_v22 }
 0x114   : > { %v864_v24 = vpop.f32.mrb[0].mxu0 }
 0x115   : > { %v865_v26 = vadd.f32 %v8742_v23, %v864_v24  ;;  %v866_v27 = vpop.f32.mrb[1].mxu0 }
 0x116   : > { %v867_v28 = vpop.f32.mrb[2].mxu0 }
 0x117   : > { %v868_v30 = vadd.f32 %v8742_v23, %v867_v28  ;;  %v869_v31 = vpop.f32.mrb[3].mxu0  ;;  %v8752_v32 = vadd.f32 %v903_v25, %v865_v26 }
 0x119   : > { %v926_v33 = vsel %vm925_vm1, %v8752_v32, 0.0  ;;  %v8756_v34 = vadd.f32 %v904_v29, %v868_v30 }
 0x11a   : > { %927 = vadd.xlane.f32.xlu0 %v926_v33 }
 0x11b   : > { %v929_v39 = vsel %vm925_vm1, %v8756_v34, 0.0 }
 0x11c   : > { %v872_v35 = vpop.f32.mrb[4].mxu0 }
 0x11d   : > { %v873_v37 = vadd.f32 %v8742_v23, %v872_v35  ;;  %v874_v38 = vpop.f32.mrb[5].mxu0 }
 0x11e   : > { %v875_v40 = vpop.f32.mrb[6].mxu0  ;;  %930 = vadd.xlane.f32.xlu0 %v929_v39 }
 0x11f   : > { %v876_v42 = vadd.f32 %v8742_v23, %v875_v40  ;;  %v877_v43 = vpop.f32.mrb[7].mxu0  ;;  %v8768_v44 = vadd.f32 %v905_v36, %v873_v37 }
 0x121   : > { %v932_v45 = vsel %vm925_vm1, %v8768_v44, 0.0  ;;  %v8772_v46 = vadd.f32 %v906_v41, %v876_v42 }
 0x122   : > { %933 = vadd.xlane.f32.xlu1 %v932_v45 }
 0x123   : > { %v935_v51 = vsel %vm925_vm1, %v8772_v46, 0.0 }
 0x124   : > { %v880_v47 = vpop.f32.mrb[8].mxu0 }
 0x125   : > { %v881_v49 = vadd.f32 %v8742_v23, %v880_v47  ;;  %v882_v50 = vpop.f32.mrb[9].mxu0 }
 0x126   : > { %v883_v52 = vpop.f32.mrb[10].mxu0  ;;  %936 = vadd.xlane.f32.xlu1 %v935_v51 }
 0x127   : > { %v884_v54 = vadd.f32 %v8742_v23, %v883_v52  ;;  %v885_v55 = vpop.f32.mrb[11].mxu0  ;;  %v8784_v56 = vadd.f32 %v907_v48, %v881_v49 }
 0x129   : > { %v938_v57 = vsel %vm925_vm1, %v8784_v56, 0.0  ;;  %v8788_v58 = vadd.f32 %v908_v53, %v884_v54 }
 0x12a   : > { %939 = vadd.xlane.f32.xlu0 %v938_v57 }
 0x12b   : > { %v941_v59 = vsel %vm925_vm1, %v8788_v58, 0.0 }
 0x12c   : > { %v888_v60 = vpop.f32.mrb[12].mxu0  ;;  %942 = vadd.xlane.f32.xlu1 %v941_v59 }
 0x12d   : > { %v889_v62 = vadd.f32 %v8742_v23, %v888_v60  ;;  %v890_v63 = vpop.f32.mrb[13].mxu0 }
 0x12e   : > { %v891_v0 = vpop.f32.mrb[14].mxu0 }
 0x12f   : > { %v892_v2 = vadd.f32 %v8742_v23, %v891_v0  ;;  %v893_v3 = vpop.f32.mrb[15].mxu0  ;;  %v8800_v4 = vadd.f32 %v909_v61, %v889_v62 }
 0x131   : > { %v944_v5 = vsel %vm925_vm1, %v8800_v4, 0.0  ;;  %v8804_v6 = vadd.f32 %v910_v1, %v892_v2 }
 0x132   : > { %945 = vadd.xlane.f32.xlu0 %v944_v5 }
 0x133   : > { %v947_v7 = vsel %vm925_vm1, %v8804_v6, 0.0 }
 0x134   : > { %v896_v8 = vpop.f32.mrb[16].mxu0  ;;  %948 = vadd.xlane.f32.xlu1 %v947_v7 }
 0x135   : > { %v897_v10 = vadd.f32 %v8742_v23, %v896_v8  ;;  %v898_v11 = vpop.f32.mrb[17].mxu0 }
 0x136   : > { %v899_v12 = vpop.f32.mrb[18].mxu0 }
 0x137   : > { %v900_v14 = vadd.f32 %v8742_v23, %v899_v12  ;;  %v901_v15 = vpop.f32.mrb[19].mxu0  ;;  %v8816_v16 = vadd.f32 %v911_v9, %v897_v10 }
 0x139   : > { %v950_v17 = vsel %vm925_vm1, %v8816_v16, 0.0  ;;  %v8820_v18 = vadd.f32 %v912_v13, %v900_v14  ;;  %v8227_v13 = vld [vmem:[%s10887_s7] sm:$0xff]  }
 0x13a   : > { %951 = vadd.xlane.f32.xlu0 %v950_v17  ;;  %v8228_v14 = vld [vmem:[%s10889_s9] sm:$0xff]   ;;  %v8556_v17 = vmov 0.0  }
 0x13b   : > { %v953_v19 = vsel %vm925_vm1, %v8820_v18, 0.0  ;;  %7312 = vmatprep.subr.bf16.mxu1 %v8556_v17  ;;  %7360 = vmatprep.subr.bf16.mxu0 %v8556_v17 }
 0x13c   : > { %954 = vadd.xlane.f32.xlu1 %v953_v19  ;;  %7313 = vmatpush3.bf16.msra.mxu1 %v8227_v13  ;;  %v8229_v19 = vld [vmem:[%s10887_s7 + $0x8] sm:$0xff]  }
 0x13d   : > { %7361 = vmatpush3.bf16.msra.mxu0 %v8228_v14  ;;  %7314 = vmatprep.subr.bf16.mxu1 %v8556_v17 }
 0x13e   : > { %7362 = vmatprep.subr.bf16.mxu0 %v8556_v17  ;;  %7316 = vmatprep.mubr.msk.bf16.mxu1 %vm8557_vm2, %v8556_v17 }
 0x13f   : > { %7364 = vmatprep.mubr.msk.bf16.mxu0 %vm8557_vm2, %v8556_v17 }
 0x140   : > { %7315 = vmatpush3.bf16.msra.mxu1 %v8229_v19 }
 0x141   : > { %7336 = vmatprep.subr.bf16.mxu1 %v8556_v17 }
 0x1a7   : > { %v928_v20 = vpop.xlane.xlu0 %927 }
 0x1a8   : > { %v957_v21 = vmul.f32 0.03125, %v928_v20  ;;  %v8230_v20 = vld [vmem:[%s10889_s9 + $0x8] sm:$0xff]  }
 0x1a9   : > { %7363 = vmatpush3.bf16.msra.mxu0 %v8230_v20 }
 0x1aa   : > { %v8825_v22 = vsub.f32 %v8752_v32, %v957_v21  ;;  %7414 = vmatprep.subr.bf16.mxu0 %v8556_v17 }
 0x1ab   : > { %v931_v24 = vpop.xlane.xlu0 %930 }
 0x1ac   : > { %v958_v23 = vmul.f32 0.03125, %v931_v24  ;;  %v977_v25 = vmul.f32 %v8825_v22, %v8825_v22 }
 0x1ae   : > { %v8830_v26 = vsub.f32 %v8756_v34, %v958_v23  ;;  %v987_v27 = vsel %vm925_vm1, %v977_v25, 0.0 }
 0x1af   : > { %v934_v28 = vpop.xlane.xlu1 %933  ;;  %988 = vadd.xlane.f32.xlu0 %v987_v27 }
 0x1b0   : > { %v959_v29 = vmul.f32 0.03125, %v934_v28  ;;  %v978_v30 = vmul.f32 %v8830_v26, %v8830_v26 }
 0x1b2   : > { %v8836_v31 = vsub.f32 %v8768_v44, %v959_v29  ;;  %v990_v33 = vsel %vm925_vm1, %v978_v30, 0.0 }
 0x1b3   : > { %v937_v35 = vpop.xlane.xlu1 %936  ;;  %991 = vadd.xlane.f32.xlu1 %v990_v33 }
 0x1b4   : > { %v960_v36 = vmul.f32 0.03125, %v937_v35  ;;  %v979_v37 = vmul.f32 %v8836_v31, %v8836_v31 }
 0x1b6   : > { %v8842_v38 = vsub.f32 %v8772_v46, %v960_v36  ;;  %v993_v39 = vsel %vm925_vm1, %v979_v37, 0.0 }
 0x1b7   : > { %994 = vadd.xlane.f32.xlu0 %v993_v39  ;;  %v940_v40 = vpop.xlane.xlu0 %939 }
 0x1b8   : > { %v961_v41 = vmul.f32 0.03125, %v940_v40  ;;  %v980_v42 = vmul.f32 %v8842_v38, %v8842_v38 }
 0x1b9   : > { %v943_v43 = vpop.xlane.xlu1 %942 }
 0x1ba   : > { %v8848_v45 = vsub.f32 %v8784_v56, %v961_v41  ;;  %v962_v47 = vmul.f32 0.03125, %v943_v43  ;;  %v996_v48 = vsel %vm925_vm1, %v980_v42, 0.0  ;;  %v8910_v42 = vld [vmem:[%s10916_s30] ss:$0 sm:$0xff] }
 0x1bb   : > { %997 = vadd.xlane.f32.xlu1 %v996_v48 }
 0x1bc   : > { %v8852_v49 = vsub.f32 %v8788_v58, %v962_v47  ;;  %v981_v50 = vmul.f32 %v8848_v45, %v8848_v45 }
 0x1be   : > { %v999_v51 = vsel %vm925_vm1, %v981_v50, 0.0  ;;  %v982_v52 = vmul.f32 %v8852_v49, %v8852_v49 }
 0x1bf   : > { %1000 = vadd.xlane.f32.xlu0 %v999_v51  ;;  %v946_v53 = vpop.xlane.xlu0 %945 }
 0x1c0   : > { %v963_v54 = vmul.f32 0.03125, %v946_v53  ;;  %v1002_v55 = vsel %vm925_vm1, %v982_v52, 0.0 }
 0x1c1   : > { %v949_v57 = vpop.xlane.xlu1 %948  ;;  %1003 = vadd.xlane.f32.xlu1 %v1002_v55 }
 0x1c2   : > { %v8861_v59 = vsub.f32 %v8800_v4, %v963_v54  ;;  %v964_v60 = vmul.f32 0.03125, %v949_v57 }
 0x1c4   : > { %v8864_v61 = vsub.f32 %v8804_v6, %v964_v60  ;;  %v983_v62 = vmul.f32 %v8861_v59, %v8861_v59 }
 0x1c6   : > { %v1005_v63 = vsel %vm925_vm1, %v983_v62, 0.0  ;;  %v984_v0 = vmul.f32 %v8864_v61, %v8864_v61 }
 0x1c7   : > { %1006 = vadd.xlane.f32.xlu0 %v1005_v63  ;;  %v952_v1 = vpop.xlane.xlu0 %951 }
 0x1c8   : > { %v965_v2 = vmul.f32 0.03125, %v952_v1  ;;  %v1008_v3 = vsel %vm925_vm1, %v984_v0, 0.0 }
 0x1c9   : > { %v955_v5 = vpop.xlane.xlu1 %954  ;;  %1009 = vadd.xlane.f32.xlu1 %v1008_v3  ;;  %v8231_v3 = vld [vmem:[%s10888_s8] sm:$0xff]  }
 0x1ca   : > { %v8873_v7 = vsub.f32 %v8816_v16, %v965_v2  ;;  %v966_v8 = vmul.f32 0.03125, %v955_v5 }
 0x1cc   : > { %v8876_v9 = vsub.f32 %v8820_v18, %v966_v8  ;;  %v985_v10 = vmul.f32 %v8873_v7, %v8873_v7 }
 0x1ce   : > { %v1011_v11 = vsel %vm925_vm1, %v985_v10, 0.0  ;;  %v986_v12 = vmul.f32 %v8876_v9, %v8876_v9 }
 0x1cf   : > { %1012 = vadd.xlane.f32.xlu0 %v1011_v11 }
 0x1d0   : > { %v1014_v15 = vsel %vm925_vm1, %v986_v12, 0.0 }
 0x1d1   : > { %1015 = vadd.xlane.f32.xlu1 %v1014_v15 }
 0x23c   : > { %v989_v21 = vpop.xlane.xlu0 %988 }
 0x23d   : > { %v1017_v24 = vmul.f32 0.03125, %v989_v21 }
 0x23f   : > { %v1027_v23 = vadd.f32 1e-06, %v1017_v24 }
 0x240   : > { %v992_v25 = vpop.xlane.xlu1 %991 }
 0x241   : > { %8267 = vrsqrt.f32 %v1027_v23  ;;  %v1018_v27 = vmul.f32 0.03125, %v992_v25 }
 0x243   : > { %v1028_v28 = vadd.f32 1e-06, %v1018_v27 }
 0x244   : > { %v995_v29 = vpop.xlane.xlu0 %994 }
 0x245   : > { %8269 = vrsqrt.f32 %v1028_v28  ;;  %v1019_v30 = vmul.f32 0.03125, %v995_v29 }
 0x247   : > { %v1029_v33 = vadd.f32 1e-06, %v1019_v30 }
 0x248   : > { %v998_v35 = vpop.xlane.xlu1 %997 }
 0x249   : > { %8271 = vrsqrt.f32 %v1029_v33  ;;  %v1020_v36 = vmul.f32 0.03125, %v998_v35 }
 0x24b   : > { %v8268_v37 = vpop.eup %8267  ;;  %v1030_v39 = vadd.f32 1e-06, %v1020_v36 }
 0x24c   : > { %v1047_v40 = vmul.f32 %v8268_v37, %v8825_v22  ;;  %v1001_v41 = vpop.xlane.xlu0 %1000  ;;  %v8917_v22 = vld [vmem:[%s10886_s6] ss:$0 sm:$0xff] }
 0x24d   : > { %8273 = vrsqrt.f32 %v1030_v39  ;;  %v1021_v43 = vmul.f32 0.03125, %v1001_v41 }
 0x24e   : > { %v1004_v47 = vpop.xlane.xlu1 %1003  ;;  %v1063_v52 = vmul.f32 %v8910_v42, %v1047_v40 }
 0x24f   : > { %v8270_v48 = vpop.eup %8269  ;;  %v1031_v50 = vadd.f32 1e-06, %v1021_v43  ;;  %v1022_v51 = vmul.f32 0.03125, %v1004_v47 }
 0x250   : > { %v1048_v53 = vmul.f32 %v8270_v48, %v8830_v26  ;;  %v1079_v60 = vadd.f32 %v8917_v22, %v1063_v52 }
 0x251   : > { %8275 = vrsqrt.f32 %v1031_v50  ;;  %v1032_v54 = vadd.f32 1e-06, %v1022_v51 }
 0x252   : > { %v1064_v55 = vmul.f32 %v8910_v42, %v1048_v53 }
 0x253   : > { %v8272_v57 = vpop.eup %8271  ;;  %8277 = vrsqrt.f32 %v1032_v54 }
 0x254   : > { %v1080_v62 = vadd.f32 %v8917_v22, %v1064_v55  ;;  %v1049_v63 = vmul.f32 %v8272_v57, %v8836_v31  ;;  %v1007_v0 = vpop.xlane.xlu0 %1006 }
 0x255   : > { %v1023_v1 = vmul.f32 0.03125, %v1007_v0 }
 0x256   : > { %v1010_v26 = vpop.xlane.xlu1 %1009  ;;  %v8923_v2 = vpack.c.bf16 %v1080_v62, %v1079_v60  ;;  %v1065_v11 = vmul.f32 %v8910_v42, %v1049_v63  ;;  %v9032_v62 = vld [vmem:[%s10892_s12] ss:$0 sm:$0xff] }
 0x257   : > { %v8274_v5 = vpop.eup %8273  ;;  %v1033_v8 = vadd.f32 1e-06, %v1023_v1  ;;  %v1024_v10 = vmul.f32 0.03125, %v1010_v26 }
 0x258   : > { %v1050_v12 = vmul.f32 %v8274_v5, %v8842_v38  ;;  %7317 = vmatmul.mubr.msk.bf16.vlgmr.msra.gmra.mrb[0].mxu1 %vm925_vm1, %v8923_v2  ;;  %7365 = vmatmul.mubr.msk.bf16.vlgmr.msra.gmra.mrb[20].mxu0 %vm925_vm1, %v8923_v2  ;;  %v8232_v38 = vld [vmem:[%s10888_s8 + $0x8] sm:$0xff]   ;;  %v1081_v15 = vadd.f32 %v8917_v22, %v1065_v11 }
 0x259   : > { %8279 = vrsqrt.f32 %v1033_v8  ;;  %v1034_v31 = vadd.f32 1e-06, %v1024_v10  ;;  %7320 = vmatprep.mubr.msk.bf16.mxu1 %vm8557_vm2, %v8556_v17  ;;  %7368 = vmatprep.mubr.msk.bf16.mxu0 %vm8557_vm2, %v8556_v17 }
 0x25a   : > { %v1066_v13 = vmul.f32 %v8910_v42, %v1050_v12  ;;  %7337 = vmatpush3.bf16.msra.mxu1 %v8231_v3 }
 0x25b   : > { %v8276_v14 = vpop.eup %8275  ;;  %8281 = vrsqrt.f32 %v1034_v31  ;;  %7338 = vmatprep.subr.bf16.mxu1 %v8556_v17 }
 0x25c   : > { %v1082_v19 = vadd.f32 %v8917_v22, %v1066_v13  ;;  %v1051_v20 = vmul.f32 %v8276_v14, %v8848_v45  ;;  %v1013_v21 = vpop.xlane.xlu0 %1012 }
 0x25d   : > { %v8278_v24 = vpop.eup %8277  ;;  %v1025_v23 = vmul.f32 0.03125, %v1013_v21 }
 0x25e   : > { %v1052_v25 = vmul.f32 %v8278_v24, %v8852_v49  ;;  %v1016_v27 = vpop.xlane.xlu1 %1015  ;;  %v8947_v28 = vpack.c.bf16 %v1082_v19, %v1081_v15  ;;  %7339 = vmatpush3.bf16.msra.mxu1 %v8232_v38  ;;  %v1067_v33 = vmul.f32 %v8910_v42, %v1051_v20 }
 0x25f   : > { %v1035_v29 = vadd.f32 1e-06, %v1025_v23  ;;  %v1026_v30 = vmul.f32 0.03125, %v1016_v27  ;;  %7384 = vmatprep.subr.bf16.mxu1 %v8556_v17 }
 0x260   : > { %v1068_v35 = vmul.f32 %v8910_v42, %v1052_v25  ;;  %7321 = vmatmul.mubr.msk.bf16.gmra.mrb[4].mxu1 %vm925_vm1, %v8947_v28  ;;  %7369 = vmatmul.mubr.msk.bf16.gmra.mrb[24].mxu0 %vm925_vm1, %v8947_v28  ;;  %v1083_v37 = vadd.f32 %v8917_v22, %v1067_v33 }
 0x261   : > { %8283 = vrsqrt.f32 %v1035_v29  ;;  %v1036_v45 = vadd.f32 1e-06, %v1026_v30  ;;  %7324 = vmatprep.mubr.msk.bf16.mxu1 %vm8557_vm2, %v8556_v17  ;;  %7372 = vmatprep.mubr.msk.bf16.mxu0 %vm8557_vm2, %v8556_v17 }
 0x262   : > { %v1084_v49 = vadd.f32 %v8917_v22, %v1068_v35 }
 0x263   : > { %v8280_v36 = vpop.eup %8279  ;;  %8285 = vrsqrt.f32 %v1036_v45 }
 0x264   : > { %v1053_v39 = vmul.f32 %v8280_v36, %v8861_v59  ;;  %v8964_v43 = vpack.c.bf16 %v1084_v49, %v1083_v37 }
 0x265   : > { %v8282_v40 = vpop.eup %8281 }
 0x266   : > { %v1054_v41 = vmul.f32 %v8282_v40, %v8864_v61  ;;  %v1069_v47 = vmul.f32 %v8910_v42, %v1053_v39 }
 0x268   : > { %v1070_v48 = vmul.f32 %v8910_v42, %v1054_v41  ;;  %7325 = vmatmul.mubr.msk.bf16.gmra.mrb[8].mxu1 %vm925_vm1, %v8964_v43  ;;  %7373 = vmatmul.mubr.msk.bf16.gmra.mrb[28].mxu0 %vm925_vm1, %v8964_v43  ;;  %v1085_v50 = vadd.f32 %v8917_v22, %v1069_v47 }
 0x269   : > { %7328 = vmatprep.mubr.msk.bf16.mxu1 %vm8557_vm2, %v8556_v17  ;;  %7376 = vmatprep.mubr.msk.bf16.mxu0 %vm8557_vm2, %v8556_v17 }
 0x26a   : > { %v1086_v59 = vadd.f32 %v8917_v22, %v1070_v48 }
 0x26b   : > { %v8284_v61 = vpop.eup %8283 }
 0x26c   : > { %v1055_v51 = vmul.f32 %v8284_v61, %v8873_v7  ;;  %v8980_v54 = vpack.c.bf16 %v1086_v59, %v1085_v50 }
 0x26d   : > { %v8286_v52 = vpop.eup %8285 }
 0x26e   : > { %v1056_v53 = vmul.f32 %v8286_v52, %v8876_v9  ;;  %v1071_v55 = vmul.f32 %v8910_v42, %v1055_v51 }
 0x270   : > { %v1072_v57 = vmul.f32 %v8910_v42, %v1056_v53  ;;  %7329 = vmatmul.mubr.msk.bf16.gmra.mrb[12].mxu1 %vm925_vm1, %v8980_v54  ;;  %7377 = vmatmul.mubr.msk.bf16.gmra.mrb[32].mxu0 %vm925_vm1, %v8980_v54  ;;  %v1087_v9 = vadd.f32 %v8917_v22, %v1071_v55  ;;  %v9027_v42 = vld [vmem:[%s10890_s10] ss:$0 sm:$0xff] }
 0x271   : > { %7332 = vmatprep.mubr.msk.bf16.mxu1 %vm8557_vm2, %v8556_v17  ;;  %7380 = vmatprep.mubr.msk.bf16.mxu0 %vm8557_vm2, %v8556_v17 }
 0x272   : > { %v1088_v7 = vadd.f32 %v8917_v22, %v1072_v57 }
 0x274   : > { %v8994_v60 = vpack.c.bf16 %v1088_v7, %v1087_v9 }
 0x278   : > { %7333 = vmatmul.mubr.msk.bf16.gmra.mrb[16].mxu1 %vm925_vm1, %v8994_v60  ;;  %7381 = vmatmul.mubr.msk.bf16.gmra.mrb[36].mxu0 %vm925_vm1, %v8994_v60 }
 0x279   : > { %7340 = vmatprep.mubr.msk.bf16.mxu1 %vm8557_vm2, %v8556_v17  ;;  %7416 = vmatprep.mubr.msk.bf16.mxu0 %vm8557_vm2, %v8556_v17 }
 0x280   : > { %7341 = vmatmul.mubr.msk.bf16.vlgmr.msra.gmra.mrb[20].mxu1 %vm925_vm1, %v8923_v2 }
 0x281   : > { %7344 = vmatprep.mubr.msk.bf16.mxu1 %vm8557_vm2, %v8556_v17 }
 0x288   : > { %7345 = vmatmul.mubr.msk.bf16.gmra.mrb[24].mxu1 %vm925_vm1, %v8947_v28 }
 0x289   : > { %7348 = vmatprep.mubr.msk.bf16.mxu1 %vm8557_vm2, %v8556_v17 }
 0x290   : > { %7349 = vmatmul.mubr.msk.bf16.gmra.mrb[28].mxu1 %vm925_vm1, %v8964_v43 }
 0x291   : > { %7352 = vmatprep.mubr.msk.bf16.mxu1 %vm8557_vm2, %v8556_v17 }
 0x298   : > { %7353 = vmatmul.mubr.msk.bf16.gmra.mrb[32].mxu1 %vm925_vm1, %v8980_v54 }
 0x299   : > { %7356 = vmatprep.mubr.msk.bf16.mxu1 %vm8557_vm2, %v8556_v17 }
 0x2a0   : > { %7357 = vmatmul.mubr.msk.bf16.gmra.mrb[36].mxu1 %vm925_vm1, %v8994_v60 }
 0x2a1   : > { %7386 = vmatprep.mubr.msk.bf16.mxu1 %vm8557_vm2, %v8556_v17 }
 0x32b   : > { %v1167_v22 = vpop.f32.mrb[0].mxu1  ;;  %v1359_v63 = vpop.f32.mrb[20].mxu0 }
 0x32c   : > { %v7318_v0 = vpop.f32.mrb[1].mxu1  ;;  %v7366_v1 = vpop.f32.mrb[21].mxu0  ;;  %v9035_v5 = vadd.f32 %v9027_v42, %v1167_v22  ;;  %v1360_v8 = vadd.f32 %v9032_v62, %v1359_v63 }
 0x32d   : > { %v1170_v26 = vpop.f32.mrb[2].mxu1  ;;  %v1362_v3 = vpop.f32.mrb[22].mxu0 }
 0x32e   : > { %v9039_v10 = vadd.f32 %v9027_v42, %v1170_v26  ;;  %v1363_v11 = vadd.f32 %v9032_v62, %v1362_v3  ;;  %v7319_v12 = vpop.f32.mrb[3].mxu1  ;;  %v7367_v31 = vpop.f32.mrb[23].mxu0 }
 0x330   : > { %v1398_v13 = vpack.c.bf16 %v9039_v10, %v9035_v5  ;;  %v1769_v38 = vpack.c.bf16 %v1363_v11, %v1360_v8 }
 0x332   : > { %7415 = vmatpush3.bf16.msra.mxu0 %v1769_v38 }
 0x333   : > { %v1175_v14 = vpop.f32.mrb[4].mxu1  ;;  %v1367_v15 = vpop.f32.mrb[24].mxu0  ;;  %7426 = vmatprep.subr.bf16.mxu0 %v8556_v17 }
 0x334   : > { %v9046_v19 = vadd.f32 %v9032_v62, %v1367_v15  ;;  %v7322_v20 = vpop.f32.mrb[5].mxu1  ;;  %v7370_v21 = vpop.f32.mrb[25].mxu0  ;;  %v9049_v25 = vadd.f32 %v9027_v42, %v1175_v14 }
 0x335   : > { %v1178_v24 = vpop.f32.mrb[6].mxu1  ;;  %v1370_v23 = vpop.f32.mrb[26].mxu0 }
 0x336   : > { %v9052_v27 = vadd.f32 %v9027_v42, %v1178_v24  ;;  %v9055_v29 = vadd.f32 %v9032_v62, %v1370_v23  ;;  %v7323_v30 = vpop.f32.mrb[7].mxu1  ;;  %v7371_v33 = vpop.f32.mrb[27].mxu0 }
 0x338   : > { %v1399_v35 = vpack.c.bf16 %v9052_v27, %v9049_v25  ;;  %v1770_v45 = vpack.c.bf16 %v9055_v29, %v9046_v19 }
 0x33b   : > { %v1183_v49 = vpop.f32.mrb[8].mxu1  ;;  %v1375_v36 = vpop.f32.mrb[28].mxu0 }
 0x33c   : > { %v9062_v37 = vadd.f32 %v9032_v62, %v1375_v36  ;;  %v7326_v39 = vpop.f32.mrb[9].mxu1  ;;  %v7374_v40 = vpop.f32.mrb[29].mxu0  ;;  %v9065_v48 = vadd.f32 %v9027_v42, %v1183_v49 }
 0x33d   : > { %v1186_v41 = vpop.f32.mrb[10].mxu1  ;;  %v1378_v47 = vpop.f32.mrb[30].mxu0 }
 0x33e   : > { %v9068_v59 = vadd.f32 %v9027_v42, %v1186_v41  ;;  %v9071_v61 = vadd.f32 %v9032_v62, %v1378_v47  ;;  %v7327_v50 = vpop.f32.mrb[11].mxu1  ;;  %v7375_v51 = vpop.f32.mrb[31].mxu0  ;;  %v6773_v47 = vld [vmem:[%s10891_s11] ss:$0 sm:$0xff] }
 0x340   : > { %v1400_v52 = vpack.c.bf16 %v9068_v59, %v9065_v48  ;;  %v1771_v53 = vpack.c.bf16 %v9071_v61, %v9062_v37 }
 0x343   : > { %v1191_v55 = vpop.f32.mrb[12].mxu1  ;;  %v1383_v57 = vpop.f32.mrb[32].mxu0 }
 0x344   : > { %v9078_v7 = vadd.f32 %v9032_v62, %v1383_v57  ;;  %v7330_v9 = vpop.f32.mrb[13].mxu1  ;;  %v7378_v22 = vpop.f32.mrb[33].mxu0  ;;  %v9081_v1 = vadd.f32 %v9027_v42, %v1191_v55 }
 0x345   : > { %v1194_v63 = vpop.f32.mrb[14].mxu1  ;;  %v1386_v0 = vpop.f32.mrb[34].mxu0 }
 0x346   : > { %v9084_v26 = vadd.f32 %v9027_v42, %v1194_v63  ;;  %v9087_v3 = vadd.f32 %v9032_v62, %v1386_v0  ;;  %v7331_v8 = vpop.f32.mrb[15].mxu1  ;;  %v7379_v11 = vpop.f32.mrb[35].mxu0 }
 0x348   : > { %v1401_v12 = vpack.c.bf16 %v9084_v26, %v9081_v1  ;;  %v1772_v31 = vpack.c.bf16 %v9087_v3, %v9078_v7 }
 0x34b   : > { %v1199_v38 = vpop.f32.mrb[16].mxu1  ;;  %v1391_v14 = vpop.f32.mrb[36].mxu0 }
 0x34c   : > { %v9094_v15 = vadd.f32 %v9032_v62, %v1391_v14  ;;  %v7334_v20 = vpop.f32.mrb[17].mxu1  ;;  %v7382_v21 = vpop.f32.mrb[37].mxu0  ;;  %v9097_v30 = vadd.f32 %v9027_v42, %v1199_v38 }
 0x34d   : > { %v1202_v24 = vpop.f32.mrb[18].mxu1  ;;  %v1394_v23 = vpop.f32.mrb[38].mxu0 }
 0x34e   : > { %v9100_v33 = vadd.f32 %v9027_v42, %v1202_v24  ;;  %v9103_v49 = vadd.f32 %v9032_v62, %v1394_v23  ;;  %v7335_v36 = vpop.f32.mrb[19].mxu1  ;;  %v7383_v39 = vpop.f32.mrb[39].mxu0 }
 0x350   : > { %v1402_v40 = vpack.c.bf16 %v9100_v33, %v9097_v30  ;;  %v1773_v41 = vpack.c.bf16 %v9103_v49, %v9094_v15  ;;  %v8233_v49 = vld [vmem:[%s10887_s7 + $0x10] sm:$0xff]  }
 0x353   : > { %v1263_v50 = vpop.f32.mrb[20].mxu1 }
 0x354   : > { %v7342_v51 = vpop.f32.mrb[21].mxu1  ;;  %v1264_v42 = vadd.f32 %v6773_v47, %v1263_v50 }
 0x355   : > { %v1266_v55 = vpop.f32.mrb[22].mxu1 }
 0x356   : > { %v1267_v57 = vadd.f32 %v6773_v47, %v1266_v55  ;;  %v7343_v9 = vpop.f32.mrb[23].mxu1 }
 0x358   : > { %v1403_v62 = vpack.c.bf16 %v1267_v57, %v1264_v42 }
 0x35a   : > { %v1413_v22 = vsel %vm1408_vm3, %v1403_v62, 0 }
 0x35b   : > { %v1271_v63 = vpop.f32.mrb[24].mxu1  ;;  %7385 = vmatpush3.bf16.xpose.msra.mxu1 %v1413_v22 }
 0x35c   : > { %v7346_v0 = vpop.f32.mrb[25].mxu1  ;;  %7390 = vmatprep.subr.bf16.mxu1 %v8556_v17  ;;  %v1272_v11 = vadd.f32 %v6773_v47, %v1271_v63 }
 0x35d   : > { %v1274_v8 = vpop.f32.mrb[26].mxu1 }
 0x35e   : > { %v1275_v38 = vadd.f32 %v6773_v47, %v1274_v8  ;;  %v7347_v14 = vpop.f32.mrb[27].mxu1 }
 0x360   : > { %v1404_v20 = vpack.c.bf16 %v1275_v38, %v1272_v11 }
 0x362   : > { %7387 = vmatmul.mubr.msk.bf16.vlgmr.msra.gmra.mrb[40].mxu1 %vm1408_vm3, %v1398_v13  ;;  %v1460_v21 = vsel %vm1408_vm3, %v1404_v20, 0 }
 0x363   : > { %v1279_v24 = vpop.f32.mrb[28].mxu1  ;;  %7391 = vmatpush3.bf16.xpose.msra.mxu1 %v1460_v21  ;;  %7392 = vmatprep.mubr.msk.bf16.mxu1 %vm8557_vm2, %v8556_v17 }
 0x364   : > { %v7350_v23 = vpop.f32.mrb[29].mxu1  ;;  %7396 = vmatprep.subr.bf16.mxu1 %v8556_v17  ;;  %v1280_v33 = vadd.f32 %v6773_v47, %v1279_v24 }
 0x365   : > { %v1282_v30 = vpop.f32.mrb[30].mxu1 }
 0x366   : > { %v1283_v36 = vadd.f32 %v6773_v47, %v1282_v30  ;;  %v7351_v39 = vpop.f32.mrb[31].mxu1 }
 0x368   : > { %v1405_v50 = vpack.c.bf16 %v1283_v36, %v1280_v33 }
 0x36a   : > { %7393 = vmatmul.mubr.msk.bf16.vlgmr.msra.gmra.mrb[44].mxu1 %vm1408_vm3, %v1399_v35  ;;  %v1507_v5 = vsel %vm1408_vm3, %v1405_v50, 0 }
 0x36b   : > { %v1287_v10 = vpop.f32.mrb[32].mxu1  ;;  %7397 = vmatpush3.bf16.xpose.msra.mxu1 %v1507_v5  ;;  %7398 = vmatprep.mubr.msk.bf16.mxu1 %vm8557_vm2, %v8556_v17 }
 0x36c   : > { %v7354_v13 = vpop.f32.mrb[33].mxu1  ;;  %7402 = vmatprep.subr.bf16.mxu1 %v8556_v17  ;;  %v1288_v55 = vadd.f32 %v6773_v47, %v1287_v10 }
 0x36d   : > { %v1290_v51 = vpop.f32.mrb[34].mxu1 }
 0x36e   : > { %v1291_v42 = vadd.f32 %v6773_v47, %v1290_v51  ;;  %v7355_v57 = vpop.f32.mrb[35].mxu1 }
 0x370   : > { %v1406_v9 = vpack.c.bf16 %v1291_v42, %v1288_v55 }
 0x372   : > { %7399 = vmatmul.mubr.msk.bf16.vlgmr.msra.gmra.mrb[48].mxu1 %vm1408_vm3, %v1400_v52  ;;  %v1554_v25 = vsel %vm1408_vm3, %v1406_v9, 0 }
 0x373   : > { %v1295_v27 = vpop.f32.mrb[36].mxu1  ;;  %7403 = vmatpush3.bf16.xpose.msra.mxu1 %v1554_v25  ;;  %7404 = vmatprep.mubr.msk.bf16.mxu1 %vm8557_vm2, %v8556_v17 }
 0x374   : > { %v7358_v35 = vpop.f32.mrb[37].mxu1  ;;  %7408 = vmatprep.subr.bf16.mxu1 %v8556_v17  ;;  %v1296_v22 = vadd.f32 %v6773_v47, %v1295_v27 }
 0x375   : > { %v1298_v62 = vpop.f32.mrb[38].mxu1 }
 0x376   : > { %v1299_v63 = vadd.f32 %v6773_v47, %v1298_v62  ;;  %v7359_v0 = vpop.f32.mrb[39].mxu1 }
 0x378   : > { %v1407_v8 = vpack.c.bf16 %v1299_v63, %v1296_v22 }
 0x37a   : > { %7405 = vmatmul.mubr.msk.bf16.vlgmr.msra.gmra.mrb[52].mxu1 %vm1408_vm3, %v1401_v12  ;;  %v1601_v48 = vsel %vm1408_vm3, %v1407_v8, 0 }
 0x37b   : > { %7409 = vmatpush3.bf16.xpose.msra.mxu1 %v1601_v48  ;;  %7410 = vmatprep.mubr.msk.bf16.mxu1 %vm8557_vm2, %v8556_v17 }
 0x37c   : > { %7420 = vmatprep.subr.bf16.mxu1 %v8556_v17 }
 0x382   : > { %7411 = vmatmul.mubr.msk.bf16.vlgmr.msra.gmra.mrb[56].mxu1 %vm1408_vm3, %v1402_v40 }
 0x383   : > { %7421 = vmatpush3.bf16.msra.mxu1 %v1770_v45  ;;  %7422 = vmatprep.mubr.msk.bf16.mxu1 %vm8557_vm2, %v8556_v17 }
 0x384   : > { %7432 = vmatprep.subr.bf16.mxu1 %v8556_v17 }
 0x435   : > { %v1449_v59 = vpop.f32.mrb[40].mxu1 }
 0x436   : > { %v7388_v52 = vpop.f32.mrb[41].mxu1  ;;  %v1644_v1 = vmul.f32 0.25, %v1449_v59 }
 0x437   : > { %v1452_v26 = vpop.f32.mrb[42].mxu1 }
 0x438   : > { %v7389_v12 = vpop.f32.mrb[43].mxu1  ;;  %v1654_v47 = vsel %vm1408_vm3, %v1644_v1, -inf  ;;  %v1645_v11 = vmul.f32 0.25, %v1452_v26 }
 0x439   : > { %1655 = vmax.xlane.f32.xlu0 %v1654_v47 }
 0x43a   : > { %v1657_v40 = vsel %vm1408_vm3, %v1645_v11, -inf }
 0x43b   : > { %1658 = vmax.xlane.f32.xlu1 %v1657_v40 }
 0x43d   : > { %v1496_v38 = vpop.f32.mrb[44].mxu1 }
 0x43e   : > { %v7394_v19 = vpop.f32.mrb[45].mxu1  ;;  %v1646_v29 = vmul.f32 0.25, %v1496_v38 }
 0x43f   : > { %v1499_v45 = vpop.f32.mrb[46].mxu1 }
 0x440   : > { %v7395_v14 = vpop.f32.mrb[47].mxu1  ;;  %v1660_v20 = vsel %vm1408_vm3, %v1646_v29, -inf  ;;  %v1647_v21 = vmul.f32 0.25, %v1499_v45 }
 0x441   : > { %1661 = vmax.xlane.f32.xlu0 %v1660_v20 }
 0x442   : > { %v1663_v24 = vsel %vm1408_vm3, %v1647_v21, -inf }
 0x443   : > { %1664 = vmax.xlane.f32.xlu1 %v1663_v24 }
 0x445   : > { %v1543_v23 = vpop.f32.mrb[48].mxu1 }
 0x446   : > { %v7400_v30 = vpop.f32.mrb[49].mxu1  ;;  %v1648_v33 = vmul.f32 0.25, %v1543_v23 }
 0x447   : > { %v1546_v36 = vpop.f32.mrb[50].mxu1 }
 0x448   : > { %v7401_v39 = vpop.f32.mrb[51].mxu1  ;;  %v1666_v50 = vsel %vm1408_vm3, %v1648_v33, -inf  ;;  %v1649_v5 = vmul.f32 0.25, %v1546_v36 }
 0x449   : > { %1667 = vmax.xlane.f32.xlu0 %v1666_v50 }
 0x44a   : > { %v1669_v10 = vsel %vm1408_vm3, %v1649_v5, -inf }
 0x44b   : > { %1670 = vmax.xlane.f32.xlu1 %v1669_v10 }
 0x44d   : > { %v1590_v13 = vpop.f32.mrb[52].mxu1 }
 0x44e   : > { %v7406_v51 = vpop.f32.mrb[53].mxu1  ;;  %v1650_v55 = vmul.f32 0.25, %v1590_v13 }
 0x44f   : > { %v1593_v42 = vpop.f32.mrb[54].mxu1 }
 0x450   : > { %v1651_v57 = vmul.f32 0.25, %v1593_v42  ;;  %v7407_v9 = vpop.f32.mrb[55].mxu1  ;;  %v1672_v25 = vsel %vm1408_vm3, %v1650_v55, -inf }
 0x451   : > { %1673 = vmax.xlane.f32.xlu0 %v1672_v25 }
 0x452   : > { %v1675_v27 = vsel %vm1408_vm3, %v1651_v57, -inf }
 0x453   : > { %1676 = vmax.xlane.f32.xlu1 %v1675_v27 }
 0x455   : > { %v1637_v35 = vpop.f32.mrb[56].mxu1 }
 0x456   : > { %v1652_v62 = vmul.f32 0.25, %v1637_v35  ;;  %v7412_v22 = vpop.f32.mrb[57].mxu1 }
 0x457   : > { %v1640_v63 = vpop.f32.mrb[58].mxu1 }
 0x458   : > { %v1653_v0 = vmul.f32 0.25, %v1640_v63  ;;  %v7413_v8 = vpop.f32.mrb[59].mxu1  ;;  %v1678_v48 = vsel %vm1408_vm3, %v1652_v62, -inf }
 0x459   : > { %1679 = vmax.xlane.f32.xlu0 %v1678_v48 }
 0x45a   : > { %v1681_v59 = vsel %vm1408_vm3, %v1653_v0, -inf }
 0x45b   : > { %1682 = vmax.xlane.f32.xlu1 %v1681_v59 }
 0x4c6   : > { %v1656_v52 = vpop.xlane.xlu0 %1655 }
 0x4c7   : > { %v1684_v26 = vsub.f32 %v1644_v1, %v1656_v52 }
 0x4c8   : > { %v1659_v12 = vpop.xlane.xlu1 %1658 }
 0x4c9   : > { %v1694_v47 = vmul.f32 1.442695, %v1684_v26  ;;  %v1685_v40 = vsub.f32 %v1645_v11, %v1659_v12 }
 0x4cb   : > { %8287 = vpow2.f32 %v1694_v47  ;;  %v1696_v38 = vmul.f32 1.442695, %v1685_v40 }
 0x4cd   : > { %8289 = vpow2.f32 %v1696_v38 }
 0x4ce   : > { %v1662_v19 = vpop.xlane.xlu0 %1661 }
 0x4cf   : > { %v1686_v45 = vsub.f32 %v1646_v29, %v1662_v19 }
 0x4d0   : > { %v1665_v14 = vpop.xlane.xlu1 %1664 }
 0x4d1   : > { %v1698_v20 = vmul.f32 1.442695, %v1686_v45  ;;  %v1687_v24 = vsub.f32 %v1647_v21, %v1665_v14 }
 0x4d3   : > { %8291 = vpow2.f32 %v1698_v20  ;;  %v1700_v23 = vmul.f32 1.442695, %v1687_v24 }
 0x4d5   : > { %v9163_v30 = vpop.eup %8287  ;;  %8293 = vpow2.f32 %v1700_v23 }
 0x4d6   : > { %v1668_v36 = vpop.xlane.xlu0 %1667  ;;  %v1714_v1 = vsel %vm1408_vm3, %v9163_v30, 0.0 }
 0x4d7   : > { %v8290_v39 = vpop.eup %8289  ;;  %v1688_v50 = vsub.f32 %v1648_v33, %v1668_v36  ;;  %1715 = vadd.xlane.f32.xlu0 %v1714_v1 }
 0x4d8   : > { %v1671_v11 = vpop.xlane.xlu1 %1670  ;;  %v1717_v10 = vsel %vm1408_vm3, %v8290_v39, 0.0 }
 0x4d9   : > { %v1702_v13 = vmul.f32 1.442695, %v1688_v50  ;;  %v1689_v29 = vsub.f32 %v1649_v5, %v1671_v11  ;;  %1718 = vadd.xlane.f32.xlu1 %v1717_v10 }
 0x4db   : > { %8295 = vpow2.f32 %v1702_v13  ;;  %v1704_v21 = vmul.f32 1.442695, %v1689_v29 }
 0x4dd   : > { %v9168_v51 = vpop.eup %8291  ;;  %8297 = vpow2.f32 %v1704_v21 }
 0x4de   : > { %v1674_v42 = vpop.xlane.xlu0 %1673  ;;  %v1720_v9 = vsel %vm1408_vm3, %v9168_v51, 0.0 }
 0x4df   : > { %v8294_v25 = vpop.eup %8293  ;;  %v1690_v27 = vsub.f32 %v1650_v55, %v1674_v42  ;;  %1721 = vadd.xlane.f32.xlu0 %v1720_v9 }
 0x4e0   : > { %v1677_v33 = vpop.xlane.xlu1 %1676  ;;  %v1723_v35 = vsel %vm1408_vm3, %v8294_v25, 0.0 }
 0x4e1   : > { %v1706_v22 = vmul.f32 1.442695, %v1690_v27  ;;  %v1691_v63 = vsub.f32 %v1651_v57, %v1677_v33  ;;  %1724 = vadd.xlane.f32.xlu1 %v1723_v35 }
 0x4e3   : > { %8299 = vpow2.f32 %v1706_v22  ;;  %v1708_v5 = vmul.f32 1.442695, %v1691_v63 }
 0x4e5   : > { %v9173_v8 = vpop.eup %8295  ;;  %8301 = vpow2.f32 %v1708_v5 }
 0x4e6   : > { %v1680_v48 = vpop.xlane.xlu0 %1679  ;;  %v1726_v59 = vsel %vm1408_vm3, %v9173_v8, 0.0 }
 0x4e7   : > { %v8298_v52 = vpop.eup %8297  ;;  %v1692_v26 = vsub.f32 %v1652_v62, %v1680_v48  ;;  %1727 = vadd.xlane.f32.xlu0 %v1726_v59 }
 0x4e8   : > { %v1683_v55 = vpop.xlane.xlu1 %1682  ;;  %v1729_v12 = vsel %vm1408_vm3, %v8298_v52, 0.0 }
 0x4e9   : > { %v1710_v47 = vmul.f32 1.442695, %v1692_v26  ;;  %v1693_v40 = vsub.f32 %v1653_v0, %v1683_v55  ;;  %1730 = vadd.xlane.f32.xlu1 %v1729_v12  ;;  %v8234_v12 = vld [vmem:[%s10887_s7 + $0x18] sm:$0xff]  }
 0x4eb   : > { %8303 = vpow2.f32 %v1710_v47  ;;  %v1712_v57 = vmul.f32 1.442695, %v1693_v40  ;;  %v8235_v47 = vld [vmem:[%s10889_s9 + $0x10] sm:$0xff]   ;;  %v8236_v40 = vld [vmem:[%s10889_s9 + $0x18] sm:$0xff]  }
 0x4ed   : > { %v8300_v38 = vpop.eup %8299  ;;  %8305 = vpow2.f32 %v1712_v57  ;;  %v8237_v57 = vld [vmem:[%s10893_s13] sm:$0xff]  }
 0x4ee   : > { %v1732_v19 = vsel %vm1408_vm3, %v8300_v38, 0.0 }
 0x4ef   : > { %v8302_v45 = vpop.eup %8301  ;;  %1733 = vadd.xlane.f32.xlu0 %v1732_v19 }
 0x4f0   : > { %v1735_v14 = vsel %vm1408_vm3, %v8302_v45, 0.0 }
 0x4f1   : > { %1736 = vadd.xlane.f32.xlu1 %v1735_v14  ;;  %v8238_v14 = vld [vmem:[%s10888_s8 + $0x10] sm:$0xff]  }
 0x4f5   : > { %v8304_v20 = vpop.eup %8303 }
 0x4f6   : > { %v1738_v62 = vsel %vm1408_vm3, %v8304_v20, 0.0 }
 0x4f7   : > { %v8306_v24 = vpop.eup %8305  ;;  %1739 = vadd.xlane.f32.xlu0 %v1738_v62 }
 0x4f8   : > { %v1741_v23 = vsel %vm1408_vm3, %v8306_v24, 0.0 }
 0x4f9   : > { %1742 = vadd.xlane.f32.xlu1 %v1741_v23 }
 0x564   : > { %v1716_v0 = vpop.xlane.xlu0 %1715 }
 0x565   : > { %8307 = vrcp.f32 %v1716_v0 }
 0x566   : > { %v1719_v36 = vpop.xlane.xlu1 %1718 }
 0x567   : > { %8309 = vrcp.f32 %v1719_v36 }
 0x56c   : > { %v1722_v1 = vpop.xlane.xlu0 %1721 }
 0x56d   : > { %8311 = vrcp.f32 %v1722_v1 }
 0x56e   : > { %v1725_v50 = vpop.xlane.xlu1 %1724 }
 0x56f   : > { %v8308_v11 = vpop.eup %8307  ;;  %8313 = vrcp.f32 %v1725_v50 }
 0x570   : > { %v1754_v13 = vmul.f32 %v8308_v11, %v9163_v30 }
 0x571   : > { %v8310_v10 = vpop.eup %8309 }
 0x572   : > { %v1755_v29 = vmul.f32 %v8310_v10, %v8290_v39 }
 0x574   : > { %v1764_v21 = vpack.c.bf16 %v1755_v29, %v1754_v13  ;;  %v1728_v42 = vpop.xlane.xlu0 %1727 }
 0x575   : > { %8315 = vrcp.f32 %v1728_v42 }
 0x576   : > { %7417 = vmatmul.mubr.msk.bf16.vlgmr.msra.gmra.mrb[40].mxu0 %vm1408_vm3, %v1764_v21  ;;  %v1731_v9 = vpop.xlane.xlu1 %1730 }
 0x577   : > { %v8312_v27 = vpop.eup %8311  ;;  %7427 = vmatpush3.bf16.msra.mxu0 %v1771_v53  ;;  %8317 = vrcp.f32 %v1731_v9  ;;  %7428 = vmatprep.mubr.msk.bf16.mxu0 %vm8557_vm2, %v8556_v17 }
 0x578   : > { %7438 = vmatprep.subr.bf16.mxu0 %v8556_v17  ;;  %v1756_v30 = vmul.f32 %v8312_v27, %v9168_v51 }
 0x579   : > { %v8314_v33 = vpop.eup %8313 }
 0x57a   : > { %v1757_v39 = vmul.f32 %v8314_v33, %v8294_v25 }
 0x57c   : > { %v1734_v35 = vpop.xlane.xlu0 %1733  ;;  %v1765_v22 = vpack.c.bf16 %v1757_v39, %v1756_v30 }
 0x57d   : > { %8319 = vrcp.f32 %v1734_v35 }
 0x57e   : > { %7423 = vmatmul.mubr.msk.bf16.vlgmr.msra.gmra.mrb[60].mxu1 %vm1408_vm3, %v1765_v22  ;;  %v1737_v63 = vpop.xlane.xlu1 %1736 }
 0x57f   : > { %v8316_v5 = vpop.eup %8315  ;;  %7433 = vmatpush3.bf16.msra.mxu1 %v1772_v31  ;;  %8321 = vrcp.f32 %v1737_v63  ;;  %7434 = vmatprep.mubr.msk.bf16.mxu1 %vm8557_vm2, %v8556_v17 }
 0x580   : > { %7444 = vmatprep.subr.bf16.mxu1 %v8556_v17  ;;  %v1758_v61 = vmul.f32 %v8316_v5, %v9173_v8 }
 0x581   : > { %v8318_v37 = vpop.eup %8317 }
 0x582   : > { %v1759_v53 = vmul.f32 %v8318_v37, %v8298_v52  ;;  %v6811_v37 = vld [vmem:[%s10890_s10 + $0x1] ss:$0 sm:$0xff] }
 0x584   : > { %v1740_v51 = vpop.xlane.xlu0 %1739  ;;  %v1766_v25 = vpack.c.bf16 %v1759_v53, %v1758_v61 }
 0x585   : > { %8323 = vrcp.f32 %v1740_v51 }
 0x586   : > { %7429 = vmatmul.mubr.msk.bf16.vlgmr.msra.gmra.mrb[44].mxu0 %vm1408_vm3, %v1766_v25  ;;  %v1743_v48 = vpop.xlane.xlu1 %1742 }
 0x587   : > { %v8320_v59 = vpop.eup %8319  ;;  %7439 = vmatpush3.bf16.msra.mxu0 %v1773_v41  ;;  %8325 = vrcp.f32 %v1743_v48  ;;  %7440 = vmatprep.mubr.msk.bf16.mxu0 %vm8557_vm2, %v8556_v17 }
 0x588   : > { %7466 = vmatprep.subr.bf16.mxu0 %v8556_v17  ;;  %v1760_v3 = vmul.f32 %v8320_v59, %v8300_v38 }
 0x589   : > { %v8322_v7 = vpop.eup %8321 }
 0x58a   : > { %v1761_v31 = vmul.f32 %v8322_v7, %v8302_v45 }
 0x58c   : > { %v1767_v8 = vpack.c.bf16 %v1761_v31, %v1760_v3 }
 0x58e   : > { %7435 = vmatmul.mubr.msk.bf16.vlgmr.msra.gmra.mrb[64].mxu1 %vm1408_vm3, %v1767_v8 }
 0x58f   : > { %v8324_v52 = vpop.eup %8323  ;;  %7446 = vmatprep.mubr.msk.bf16.mxu1 %vm8557_vm2, %v8556_v17  ;;  %7445 = vmatpush3.bf16.msra.mxu1 %v8237_v57 }
 0x590   : > { %v1762_v55 = vmul.f32 %v8324_v52, %v8304_v20  ;;  %7490 = vmatprep.subr.bf16.mxu1 %v8556_v17 }
 0x591   : > { %v8326_v26 = vpop.eup %8325 }
 0x592   : > { %v1763_v15 = vmul.f32 %v8326_v26, %v8306_v24  ;;  %v8239_v24 = vld [vmem:[%s10888_s8 + $0x18] sm:$0xff]  }
 0x594   : > { %v1768_v41 = vpack.c.bf16 %v1763_v15, %v1762_v55 }
 0x596   : > { %7441 = vmatmul.mubr.msk.bf16.vlgmr.msra.gmra.mrb[48].mxu0 %vm1408_vm3, %v1768_v41 }
 0x597   : > { %7467 = vmatpush3.bf16.msra.mxu0 %v8233_v49  ;;  %7470 = vmatprep.mubr.msk.bf16.mxu0 %vm8557_vm2, %v8556_v17 }
 0x598   : > { %7468 = vmatprep.subr.bf16.mxu0 %v8556_v17 }
 0x59b   : > { %7469 = vmatpush3.bf16.msra.mxu0 %v8234_v12 }
 0x59c   : > { %7514 = vmatprep.subr.bf16.mxu0 %v8556_v17 }
 0x59e   : > { %7471 = vmatmul.mubr.msk.bf16.vlgmr.msra.gmra.mrb[52].mxu0 %vm925_vm1, %v8923_v2 }
 0x59f   : > { %7474 = vmatprep.mubr.msk.bf16.mxu0 %vm8557_vm2, %v8556_v17  ;;  %7515 = vmatpush3.bf16.msra.mxu0 %v8235_v47 }
 0x5a0   : > { %7516 = vmatprep.subr.bf16.mxu0 %v8556_v17 }
 0x5a3   : > { %7517 = vmatpush3.bf16.msra.mxu0 %v8236_v40 }
 0x5a4   : > { %7544 = vmatprep.subr.bf16.mxu0 %v8556_v17 }
 0x5a6   : > { %7475 = vmatmul.mubr.msk.bf16.gmra.mrb[56].mxu0 %vm925_vm1, %v8947_v28 }
 0x5a7   : > { %7478 = vmatprep.mubr.msk.bf16.mxu0 %vm8557_vm2, %v8556_v17 }
 0x5ae   : > { %7479 = vmatmul.mubr.msk.bf16.gmra.mrb[60].mxu0 %vm925_vm1, %v8964_v43 }
 0x5af   : > { %7482 = vmatprep.mubr.msk.bf16.mxu0 %vm8557_vm2, %v8556_v17 }
 0x5b6   : > { %7483 = vmatmul.mubr.msk.bf16.gmra.mrb[64].mxu0 %vm925_vm1, %v8980_v54 }
 0x5b7   : > { %7486 = vmatprep.mubr.msk.bf16.mxu0 %vm8557_vm2, %v8556_v17 }
 0x5be   : > { %7487 = vmatmul.mubr.msk.bf16.gmra.mrb[68].mxu0 %vm925_vm1, %v8994_v60 }
 0x5bf   : > { %7518 = vmatprep.mubr.msk.bf16.mxu0 %vm8557_vm2, %v8556_v17 }
 0x5c6   : > { %7519 = vmatmul.mubr.msk.bf16.vlgmr.msra.gmra.mrb[72].mxu0 %vm925_vm1, %v8923_v2 }
 0x5c7   : > { %7522 = vmatprep.mubr.msk.bf16.mxu0 %vm8557_vm2, %v8556_v17 }
 0x5ce   : > { %7523 = vmatmul.mubr.msk.bf16.gmra.mrb[76].mxu0 %vm925_vm1, %v8947_v28 }
 0x5cf   : > { %7526 = vmatprep.mubr.msk.bf16.mxu0 %vm8557_vm2, %v8556_v17 }
 0x5d6   : > { %7527 = vmatmul.mubr.msk.bf16.gmra.mrb[80].mxu0 %vm925_vm1, %v8964_v43 }
 0x5d7   : > { %7530 = vmatprep.mubr.msk.bf16.mxu0 %vm8557_vm2, %v8556_v17 }
 0x5de   : > { %7531 = vmatmul.mubr.msk.bf16.gmra.mrb[84].mxu0 %vm925_vm1, %v8980_v54 }
 0x5df   : > { %7534 = vmatprep.mubr.msk.bf16.mxu0 %vm8557_vm2, %v8556_v17 }
 0x5e6   : > { %7535 = vmatmul.mubr.msk.bf16.gmra.mrb[88].mxu0 %vm925_vm1, %v8994_v60 }
 0x5e7   : > { %7546 = vmatprep.mubr.msk.bf16.mxu0 %vm8557_vm2, %v8556_v17 }
 0x649   : > { %v1811_v38 = vpop.f32.mrb[40].mxu0 }
 0x64a   : > { %v7418_v19 = vpop.f32.mrb[41].mxu0 }
 0x64b   : > { %v1814_v45 = vpop.f32.mrb[42].mxu0 }
 0x64c   : > { %v1994_v20 = vpack.c.bf16 %v1814_v45, %v1811_v38  ;;  %v7419_v62 = vpop.f32.mrb[43].mxu0 }
 0x64e   : > { %7447 = vmatmul.mubr.msk.bf16.vlgmr.msra.gmra.mrb[68].mxu1 %vm1408_vm3, %v1994_v20 }
 0x64f   : > { %7450 = vmatprep.mubr.msk.bf16.mxu1 %vm8557_vm2, %v8556_v17  ;;  %7491 = vmatpush3.bf16.msra.mxu1 %v8238_v14 }
 0x650   : > { %7492 = vmatprep.subr.bf16.mxu1 %v8556_v17 }
 0x651   : > { %v1855_v23 = vpop.f32.mrb[60].mxu1 }
 0x652   : > { %v7424_v0 = vpop.f32.mrb[61].mxu1 }
 0x653   : > { %v1858_v36 = vpop.f32.mrb[62].mxu1  ;;  %7493 = vmatpush3.bf16.msra.mxu1 %v8239_v24 }
 0x654   : > { %v1995_v1 = vpack.c.bf16 %v1858_v36, %v1855_v23  ;;  %v7425_v50 = vpop.f32.mrb[63].mxu1  ;;  %7538 = vmatprep.subr.bf16.mxu1 %v8556_v17 }
 0x656   : > { %7451 = vmatmul.mubr.msk.bf16.gmra.mrb[72].mxu1 %vm1408_vm3, %v1995_v1 }
 0x657   : > { %7454 = vmatprep.mubr.msk.bf16.mxu1 %vm8557_vm2, %v8556_v17 }
 0x659   : > { %v1899_v11 = vpop.f32.mrb[44].mxu0 }
 0x65a   : > { %v7430_v10 = vpop.f32.mrb[45].mxu0 }
 0x65b   : > { %v1902_v13 = vpop.f32.mrb[46].mxu0 }
 0x65c   : > { %v1996_v29 = vpack.c.bf16 %v1902_v13, %v1899_v11  ;;  %v7431_v21 = vpop.f32.mrb[47].mxu0 }
 0x65e   : > { %7455 = vmatmul.mubr.msk.bf16.gmra.mrb[76].mxu1 %vm1408_vm3, %v1996_v29 }
 0x65f   : > { %7458 = vmatprep.mubr.msk.bf16.mxu1 %vm8557_vm2, %v8556_v17 }
 0x661   : > { %v1943_v42 = vpop.f32.mrb[64].mxu1 }
 0x662   : > { %v7436_v9 = vpop.f32.mrb[65].mxu1 }
 0x663   : > { %v1946_v27 = vpop.f32.mrb[66].mxu1 }
 0x664   : > { %v1997_v33 = vpack.c.bf16 %v1946_v27, %v1943_v42  ;;  %v7437_v30 = vpop.f32.mrb[67].mxu1 }
 0x666   : > { %7459 = vmatmul.mubr.msk.bf16.gmra.mrb[80].mxu1 %vm1408_vm3, %v1997_v33 }
 0x667   : > { %7462 = vmatprep.mubr.msk.bf16.mxu1 %vm8557_vm2, %v8556_v17 }
 0x669   : > { %v1987_v39 = vpop.f32.mrb[48].mxu0 }
 0x66a   : > { %v7442_v35 = vpop.f32.mrb[49].mxu0 }
 0x66b   : > { %v1990_v22 = vpop.f32.mrb[50].mxu0 }
 0x66c   : > { %v1998_v63 = vpack.c.bf16 %v1990_v22, %v1987_v39  ;;  %v7443_v5 = vpop.f32.mrb[51].mxu0 }
 0x66e   : > { %7463 = vmatmul.mubr.msk.bf16.gmra.mrb[84].mxu1 %vm1408_vm3, %v1998_v63 }
 0x66f   : > { %7494 = vmatprep.mubr.msk.bf16.mxu1 %vm8557_vm2, %v8556_v17 }
 0x671   : > { %v2170_v61 = vpop.f32.mrb[52].mxu0 }
 0x672   : > { %v7472_v53 = vpop.f32.mrb[53].mxu0  ;;  %v9298_v25 = vadd.f32 %v6811_v37, %v2170_v61 }
 0x673   : > { %v2173_v51 = vpop.f32.mrb[54].mxu0 }
 0x674   : > { %v9300_v48 = vadd.f32 %v6811_v37, %v2173_v51  ;;  %v7473_v59 = vpop.f32.mrb[55].mxu0 }
 0x676   : > { %v2405_v7 = vpack.c.bf16 %v9300_v48, %v9298_v25  ;;  %7495 = vmatmul.mubr.msk.bf16.vlgmr.msra.gmra.mrb[88].mxu1 %vm925_vm1, %v8923_v2 }
 0x677   : > { %7498 = vmatprep.mubr.msk.bf16.mxu1 %vm8557_vm2, %v8556_v17 }
 0x679   : > { %v2178_v3 = vpop.f32.mrb[56].mxu0 }
 0x67a   : > { %v7476_v31 = vpop.f32.mrb[57].mxu0  ;;  %v9308_v52 = vadd.f32 %v6811_v37, %v2178_v3 }
 0x67b   : > { %v2181_v8 = vpop.f32.mrb[58].mxu0 }
 0x67c   : > { %v9310_v26 = vadd.f32 %v6811_v37, %v2181_v8  ;;  %v7477_v55 = vpop.f32.mrb[59].mxu0 }
 0x67e   : > { %v2406_v15 = vpack.c.bf16 %v9310_v26, %v9308_v52  ;;  %7499 = vmatmul.mubr.msk.bf16.gmra.mrb[92].mxu1 %vm925_vm1, %v8947_v28 }
 0x67f   : > { %7502 = vmatprep.mubr.msk.bf16.mxu1 %vm8557_vm2, %v8556_v17 }
 0x681   : > { %v2186_v2 = vpop.f32.mrb[60].mxu0 }
 0x682   : > { %v7480_v49 = vpop.f32.mrb[61].mxu0  ;;  %v9318_v12 = vadd.f32 %v6811_v37, %v2186_v2 }
 0x683   : > { %v2189_v41 = vpop.f32.mrb[62].mxu0 }
 0x684   : > { %v9320_v47 = vadd.f32 %v6811_v37, %v2189_v41  ;;  %v7481_v40 = vpop.f32.mrb[63].mxu0 }
 0x686   : > { %v2407_v57 = vpack.c.bf16 %v9320_v47, %v9318_v12  ;;  %7503 = vmatmul.mubr.msk.bf16.gmra.mrb[96].mxu1 %vm925_vm1, %v8964_v43 }
 0x687   : > { %7506 = vmatprep.mubr.msk.bf16.mxu1 %vm8557_vm2, %v8556_v17 }
 0x689   : > { %v2194_v28 = vpop.f32.mrb[64].mxu0 }
 0x68a   : > { %v7484_v38 = vpop.f32.mrb[65].mxu0  ;;  %v9328_v45 = vadd.f32 %v6811_v37, %v2194_v28 }
 0x68b   : > { %v2197_v19 = vpop.f32.mrb[66].mxu0 }
 0x68c   : > { %v9330_v14 = vadd.f32 %v6811_v37, %v2197_v19  ;;  %v7485_v20 = vpop.f32.mrb[67].mxu0 }
 0x68e   : > { %v2408_v62 = vpack.c.bf16 %v9330_v14, %v9328_v45  ;;  %7507 = vmatmul.mubr.msk.bf16.gmra.mrb[100].mxu1 %vm925_vm1, %v8980_v54  ;;  %v6837_v54 = vld [vmem:[%s10892_s12 + $0x1] ss:$0 sm:$0xff] }
 0x68f   : > { %7510 = vmatprep.mubr.msk.bf16.mxu1 %vm8557_vm2, %v8556_v17 }
 0x691   : > { %v2202_v43 = vpop.f32.mrb[68].mxu0 }
 0x692   : > { %v7488_v24 = vpop.f32.mrb[69].mxu0  ;;  %v9338_v0 = vadd.f32 %v6811_v37, %v2202_v43 }
 0x693   : > { %v2205_v23 = vpop.f32.mrb[70].mxu0 }
 0x694   : > { %v9340_v36 = vadd.f32 %v6811_v37, %v2205_v23  ;;  %v7489_v1 = vpop.f32.mrb[71].mxu0 }
 0x696   : > { %v2409_v50 = vpack.c.bf16 %v9340_v36, %v9338_v0  ;;  %7511 = vmatmul.mubr.msk.bf16.gmra.mrb[104].mxu1 %vm925_vm1, %v8994_v60 }
 0x697   : > { %7540 = vmatprep.mubr.msk.bf16.mxu1 %vm8557_vm2, %v8556_v17 }
 0x699   : > { %v2366_v11 = vpop.f32.mrb[72].mxu0 }
 0x69a   : > { %v7520_v10 = vpop.f32.mrb[73].mxu0  ;;  %v9351_v29 = vadd.f32 %v6837_v54, %v2366_v11 }
 0x69b   : > { %v2369_v13 = vpop.f32.mrb[74].mxu0 }
 0x69c   : > { %v9353_v21 = vadd.f32 %v6837_v54, %v2369_v13  ;;  %v7521_v42 = vpop.f32.mrb[75].mxu0 }
 0x69e   : > { %v2775_v9 = vpack.c.bf16 %v9353_v21, %v9351_v29 }
 0x6a1   : > { %v2374_v27 = vpop.f32.mrb[76].mxu0 }
 0x6a2   : > { %v7524_v60 = vpop.f32.mrb[77].mxu0  ;;  %v9357_v30 = vadd.f32 %v6837_v54, %v2374_v27 }
 0x6a3   : > { %v2377_v33 = vpop.f32.mrb[78].mxu0 }
 0x6a4   : > { %v9359_v39 = vadd.f32 %v6837_v54, %v2377_v33  ;;  %v7525_v35 = vpop.f32.mrb[79].mxu0 }
 0x6a6   : > { %v2776_v22 = vpack.c.bf16 %v9359_v39, %v9357_v30 }
 0x6a9   : > { %v2382_v63 = vpop.f32.mrb[80].mxu0 }
 0x6aa   : > { %v9363_v5 = vadd.f32 %v6837_v54, %v2382_v63  ;;  %v7528_v37 = vpop.f32.mrb[81].mxu0 }
 0x6ab   : > { %v2385_v61 = vpop.f32.mrb[82].mxu0 }
 0x6ac   : > { %v9365_v53 = vadd.f32 %v6837_v54, %v2385_v61  ;;  %v7529_v51 = vpop.f32.mrb[83].mxu0 }
 0x6b1   : > { %v2390_v3 = vpop.f32.mrb[84].mxu0 }
 0x6b2   : > { %v9369_v31 = vadd.f32 %v6837_v54, %v2390_v3  ;;  %v7532_v8 = vpop.f32.mrb[85].mxu0 }
 0x6b3   : > { %v2393_v55 = vpop.f32.mrb[86].mxu0 }
 0x6b4   : > { %v9371_v2 = vadd.f32 %v6837_v54, %v2393_v55  ;;  %v7533_v49 = vpop.f32.mrb[87].mxu0 }
 0x6b9   : > { %v2398_v40 = vpop.f32.mrb[88].mxu0 }
 0x6ba   : > { %v9375_v28 = vadd.f32 %v6837_v54, %v2398_v40  ;;  %v7536_v38 = vpop.f32.mrb[89].mxu0 }
 0x6bb   : > { %v2401_v19 = vpop.f32.mrb[90].mxu0  ;;  %v6824_v38 = vld [vmem:[%s10891_s11 + $0x1] ss:$0 sm:$0xff] }
 0x6bc   : > { %v9377_v20 = vadd.f32 %v6837_v54, %v2401_v19  ;;  %v7537_v43 = vpop.f32.mrb[91].mxu0 }
 0x721   : > { %v9381_v23 = vpop.f32.mrb[68].mxu1 }
 0x722   : > { %v7448_v1 = vpop.f32.mrb[69].mxu1 }
 0x723   : > { %v9383_v11 = vpop.f32.mrb[70].mxu1 }
 0x724   : > { %v7449_v10 = vpop.f32.mrb[71].mxu1 }
 0x729   : > { %v9385_v13 = vpop.f32.mrb[72].mxu1 }
 0x72a   : > { %v7452_v42 = vpop.f32.mrb[73].mxu1 }
 0x72b   : > { %v9387_v27 = vpop.f32.mrb[74].mxu1 }
 0x72c   : > { %v7453_v60 = vpop.f32.mrb[75].mxu1 }
 0x731   : > { %v9389_v33 = vpop.f32.mrb[76].mxu1 }
 0x732   : > { %v7456_v54 = vpop.f32.mrb[77].mxu1 }
 0x733   : > { %v9391_v35 = vpop.f32.mrb[78].mxu1 }
 0x734   : > { %v7457_v63 = vpop.f32.mrb[79].mxu1 }
 0x739   : > { %v9393_v37 = vpop.f32.mrb[80].mxu1 }
 0x73a   : > { %v7460_v61 = vpop.f32.mrb[81].mxu1 }
 0x73b   : > { %v9395_v51 = vpop.f32.mrb[82].mxu1 }
 0x73c   : > { %v7461_v3 = vpop.f32.mrb[83].mxu1 }
 0x741   : > { %v9397_v8 = vpop.f32.mrb[84].mxu1 }
 0x742   : > { %v7464_v55 = vpop.f32.mrb[85].mxu1 }
 0x743   : > { %v9399_v49 = vpop.f32.mrb[86].mxu1 }
 0x744   : > { %v7465_v40 = vpop.f32.mrb[87].mxu1 }
 0x749   : > { %v2268_v19 = vpop.f32.mrb[88].mxu1 }
 0x74a   : > { %v7496_v43 = vpop.f32.mrb[89].mxu1  ;;  %v2269_v10 = vadd.f32 %v6824_v38, %v2268_v19 }
 0x74b   : > { %v2271_v1 = vpop.f32.mrb[90].mxu1 }
 0x74c   : > { %v2272_v42 = vadd.f32 %v6824_v38, %v2271_v1  ;;  %v7497_v60 = vpop.f32.mrb[91].mxu1 }
 0x74e   : > { %v2410_v54 = vpack.c.bf16 %v2272_v42, %v2269_v10 }
 0x750   : > { %v2419_v63 = vsel %vm1408_vm3, %v2410_v54, 0 }
 0x751   : > { %v2276_v61 = vpop.f32.mrb[92].mxu1  ;;  %7539 = vmatpush3.bf16.xpose.msra.mxu1 %v2419_v63 }
 0x752   : > { %v7500_v3 = vpop.f32.mrb[93].mxu1  ;;  %7550 = vmatprep.subr.bf16.mxu1 %v8556_v17  ;;  %v2277_v40 = vadd.f32 %v6824_v38, %v2276_v61 }
 0x753   : > { %v2279_v55 = vpop.f32.mrb[94].mxu1 }
 0x754   : > { %v2280_v24 = vadd.f32 %v6824_v38, %v2279_v55  ;;  %v7501_v41 = vpop.f32.mrb[95].mxu1 }
 0x756   : > { %v2411_v59 = vpack.c.bf16 %v2280_v24, %v2277_v40 }
 0x758   : > { %7541 = vmatmul.mubr.msk.bf16.vlgmr.msra.gmra.mrb[108].mxu1 %vm1408_vm3, %v2405_v7  ;;  %v2466_v19 = vsel %vm1408_vm3, %v2411_v59, 0 }
 0x759   : > { %v2284_v43 = vpop.f32.mrb[96].mxu1  ;;  %7545 = vmatpush3.bf16.xpose.msra.mxu0 %v2466_v19  ;;  %7552 = vmatprep.mubr.msk.bf16.mxu1 %vm8557_vm2, %v8556_v17 }
 0x75a   : > { %v7504_v1 = vpop.f32.mrb[97].mxu1  ;;  %7556 = vmatprep.subr.bf16.mxu0 %v8556_v17  ;;  %v2285_v42 = vadd.f32 %v6824_v38, %v2284_v43 }
 0x75b   : > { %v2287_v10 = vpop.f32.mrb[98].mxu1 }
 0x75c   : > { %v2288_v60 = vadd.f32 %v6824_v38, %v2287_v10  ;;  %v7505_v41 = vpop.f32.mrb[99].mxu1 }
 0x75e   : > { %v2412_v24 = vpack.c.bf16 %v2288_v60, %v2285_v42 }
 0x760   : > { %7547 = vmatmul.mubr.msk.bf16.vlgmr.msra.gmra.mrb[92].mxu0 %vm1408_vm3, %v2406_v15  ;;  %v2513_v25 = vsel %vm1408_vm3, %v2412_v24, 0 }
 0x761   : > { %v2292_v48 = vpop.f32.mrb[100].mxu1  ;;  %7551 = vmatpush3.bf16.xpose.msra.mxu1 %v2513_v25  ;;  %7558 = vmatprep.mubr.msk.bf16.mxu0 %vm8557_vm2, %v8556_v17 }
 0x762   : > { %v7508_v7 = vpop.f32.mrb[101].mxu1  ;;  %7562 = vmatprep.subr.bf16.mxu1 %v8556_v17  ;;  %v2293_v54 = vadd.f32 %v6824_v38, %v2292_v48 }
 0x763   : > { %v2295_v59 = vpop.f32.mrb[102].mxu1 }
 0x764   : > { %v2296_v63 = vadd.f32 %v6824_v38, %v2295_v59  ;;  %v7509_v61 = vpop.f32.mrb[103].mxu1 }
 0x766   : > { %v2413_v3 = vpack.c.bf16 %v2296_v63, %v2293_v54 }
 0x768   : > { %7553 = vmatmul.mubr.msk.bf16.vlgmr.msra.gmra.mrb[112].mxu1 %vm1408_vm3, %v2407_v57  ;;  %v2560_v52 = vsel %vm1408_vm3, %v2413_v3, 0 }
 0x769   : > { %v2300_v26 = vpop.f32.mrb[104].mxu1  ;;  %7557 = vmatpush3.bf16.xpose.msra.mxu0 %v2560_v52  ;;  %7564 = vmatprep.mubr.msk.bf16.mxu1 %vm8557_vm2, %v8556_v17 }
 0x76a   : > { %v7512_v15 = vpop.f32.mrb[105].mxu1  ;;  %7568 = vmatprep.subr.bf16.mxu0 %v8556_v17  ;;  %v2301_v40 = vadd.f32 %v6824_v38, %v2300_v26 }
 0x76b   : > { %v2303_v55 = vpop.f32.mrb[106].mxu1 }
 0x76c   : > { %v2304_v19 = vadd.f32 %v6824_v38, %v2303_v55  ;;  %v7513_v43 = vpop.f32.mrb[107].mxu1 }
 0x76e   : > { %v2414_v1 = vpack.c.bf16 %v2304_v19, %v2301_v40 }
 0x770   : > { %7559 = vmatmul.mubr.msk.bf16.vlgmr.msra.gmra.mrb[96].mxu0 %vm1408_vm3, %v2408_v62  ;;  %v2607_v12 = vsel %vm1408_vm3, %v2414_v1, 0 }
 0x771   : > { %7563 = vmatpush3.bf16.xpose.msra.mxu1 %v2607_v12  ;;  %7569 = vmatpush3.bf16.msra.mxu0 %v2775_v9 }
 0x772   : > { %7574 = vmatprep.subr.bf16.mxu1 %v8556_v17  ;;  %7570 = vmatprep.mubr.msk.bf16.mxu0 %vm8557_vm2, %v8556_v17 }
 0x773   : > { %7580 = vmatprep.subr.bf16.mxu0 %v8556_v17 }
 0x778   : > { %7565 = vmatmul.mubr.msk.bf16.vlgmr.msra.gmra.mrb[116].mxu1 %vm1408_vm3, %v2409_v50 }
 0x779   : > { %7575 = vmatpush3.bf16.msra.mxu1 %v2776_v22  ;;  %7576 = vmatprep.mubr.msk.bf16.mxu1 %vm8557_vm2, %v8556_v17 }
 0x77a   : > { %7586 = vmatprep.subr.bf16.mxu1 %v8556_v17 }
 0x82b   : > { %v2455_v47 = vpop.f32.mrb[108].mxu1 }
 0x82c   : > { %v2650_v57 = vmul.f32 0.25, %v2455_v47  ;;  %v7542_v45 = vpop.f32.mrb[109].mxu1 }
 0x82d   : > { %v2458_v14 = vpop.f32.mrb[110].mxu1 }
 0x82e   : > { %v2651_v62 = vmul.f32 0.25, %v2458_v14  ;;  %v7543_v29 = vpop.f32.mrb[111].mxu1  ;;  %v2660_v21 = vsel %vm1408_vm3, %v2650_v57, -inf }
 0x82f   : > { %2661 = vmax.xlane.f32.xlu0 %v2660_v21 }
 0x830   : > { %v2663_v0 = vsel %vm1408_vm3, %v2651_v62, -inf }
 0x831   : > { %2664 = vmax.xlane.f32.xlu1 %v2663_v0 }
 0x833   : > { %v2502_v36 = vpop.f32.mrb[92].mxu0 }
 0x834   : > { %v2652_v50 = vmul.f32 0.25, %v2502_v36  ;;  %v7548_v9 = vpop.f32.mrb[93].mxu0 }
 0x835   : > { %v2505_v30 = vpop.f32.mrb[94].mxu0 }
 0x836   : > { %v2653_v39 = vmul.f32 0.25, %v2505_v30  ;;  %v7549_v22 = vpop.f32.mrb[95].mxu0  ;;  %v2666_v38 = vsel %vm1408_vm3, %v2652_v50, -inf }
 0x837   : > { %2667 = vmax.xlane.f32.xlu0 %v2666_v38 }
 0x838   : > { %v2669_v10 = vsel %vm1408_vm3, %v2653_v39, -inf }
 0x839   : > { %2670 = vmax.xlane.f32.xlu1 %v2669_v10 }
 0x83b   : > { %v2549_v42 = vpop.f32.mrb[112].mxu1 }
 0x83c   : > { %v2654_v60 = vmul.f32 0.25, %v2549_v42  ;;  %v7554_v41 = vpop.f32.mrb[113].mxu1 }
 0x83d   : > { %v2552_v24 = vpop.f32.mrb[114].mxu1 }
 0x83e   : > { %v2655_v25 = vmul.f32 0.25, %v2552_v24  ;;  %v7555_v48 = vpop.f32.mrb[115].mxu1  ;;  %v2672_v7 = vsel %vm1408_vm3, %v2654_v60, -inf }
 0x83f   : > { %2673 = vmax.xlane.f32.xlu0 %v2672_v7 }
 0x840   : > { %v2675_v59 = vsel %vm1408_vm3, %v2655_v25, -inf }
 0x841   : > { %2676 = vmax.xlane.f32.xlu1 %v2675_v59 }
 0x843   : > { %v2596_v54 = vpop.f32.mrb[96].mxu0 }
 0x844   : > { %v2656_v63 = vmul.f32 0.25, %v2596_v54  ;;  %v7560_v61 = vpop.f32.mrb[97].mxu0 }
 0x845   : > { %v2599_v3 = vpop.f32.mrb[98].mxu0 }
 0x846   : > { %v2657_v52 = vmul.f32 0.25, %v2599_v3  ;;  %v7561_v26 = vpop.f32.mrb[99].mxu0  ;;  %v2678_v15 = vsel %vm1408_vm3, %v2656_v63, -inf }
 0x847   : > { %2679 = vmax.xlane.f32.xlu0 %v2678_v15 }
 0x848   : > { %v2681_v55 = vsel %vm1408_vm3, %v2657_v52, -inf }
 0x849   : > { %2682 = vmax.xlane.f32.xlu1 %v2681_v55 }
 0x84b   : > { %v2643_v40 = vpop.f32.mrb[116].mxu1 }
 0x84c   : > { %v2658_v19 = vmul.f32 0.25, %v2643_v40  ;;  %v7566_v43 = vpop.f32.mrb[117].mxu1 }
 0x84d   : > { %v2646_v1 = vpop.f32.mrb[118].mxu1 }
 0x84e   : > { %v2659_v12 = vmul.f32 0.25, %v2646_v1  ;;  %v7567_v47 = vpop.f32.mrb[119].mxu1  ;;  %v2684_v45 = vsel %vm1408_vm3, %v2658_v19, -inf }
 0x84f   : > { %2685 = vmax.xlane.f32.xlu0 %v2684_v45 }
 0x850   : > { %v2687_v14 = vsel %vm1408_vm3, %v2659_v12, -inf }
 0x851   : > { %2688 = vmax.xlane.f32.xlu1 %v2687_v14 }
 0x8bc   : > { %v2662_v29 = vpop.xlane.xlu0 %2661 }
 0x8bd   : > { %v2690_v21 = vsub.f32 %v2650_v57, %v2662_v29 }
 0x8be   : > { %v2665_v0 = vpop.xlane.xlu1 %2664 }
 0x8bf   : > { %v2700_v36 = vmul.f32 1.442695, %v2690_v21  ;;  %v2691_v9 = vsub.f32 %v2651_v62, %v2665_v0 }
 0x8c1   : > { %8327 = vpow2.f32 %v2700_v36  ;;  %v2702_v30 = vmul.f32 1.442695, %v2691_v9 }
 0x8c3   : > { %8329 = vpow2.f32 %v2702_v30 }
 0x8c4   : > { %v2668_v22 = vpop.xlane.xlu0 %2667 }
 0x8c5   : > { %v2692_v38 = vsub.f32 %v2652_v50, %v2668_v22 }
 0x8c6   : > { %v2671_v10 = vpop.xlane.xlu1 %2670 }
 0x8c7   : > { %v2704_v42 = vmul.f32 1.442695, %v2692_v38  ;;  %v2693_v41 = vsub.f32 %v2653_v39, %v2671_v10 }
 0x8c9   : > { %8331 = vpow2.f32 %v2704_v42  ;;  %v2706_v24 = vmul.f32 1.442695, %v2693_v41 }
 0x8cb   : > { %v9462_v48 = vpop.eup %8327  ;;  %8333 = vpow2.f32 %v2706_v24 }
 0x8cc   : > { %v2674_v7 = vpop.xlane.xlu0 %2673  ;;  %v2720_v57 = vsel %vm1408_vm3, %v9462_v48, 0.0 }
 0x8cd   : > { %v8330_v59 = vpop.eup %8329  ;;  %v2694_v54 = vsub.f32 %v2654_v60, %v2674_v7  ;;  %2721 = vadd.xlane.f32.xlu0 %v2720_v57 }
 0x8ce   : > { %v2677_v62 = vpop.xlane.xlu1 %2676  ;;  %v2723_v61 = vsel %vm1408_vm3, %v8330_v59, 0.0 }
 0x8cf   : > { %v2708_v3 = vmul.f32 1.442695, %v2694_v54  ;;  %v2695_v50 = vsub.f32 %v2655_v25, %v2677_v62  ;;  %2724 = vadd.xlane.f32.xlu1 %v2723_v61 }
 0x8d1   : > { %8335 = vpow2.f32 %v2708_v3  ;;  %v2710_v39 = vmul.f32 1.442695, %v2695_v50 }
 0x8d3   : > { %v9467_v26 = vpop.eup %8331  ;;  %8337 = vpow2.f32 %v2710_v39 }
 0x8d4   : > { %v2680_v15 = vpop.xlane.xlu0 %2679  ;;  %v2726_v55 = vsel %vm1408_vm3, %v9467_v26, 0.0 }
 0x8d5   : > { %v8334_v40 = vpop.eup %8333  ;;  %v2696_v43 = vsub.f32 %v2656_v63, %v2680_v15  ;;  %2727 = vadd.xlane.f32.xlu0 %v2726_v55 }
 0x8d6   : > { %v2683_v60 = vpop.xlane.xlu1 %2682  ;;  %v2729_v1 = vsel %vm1408_vm3, %v8334_v40, 0.0 }
 0x8d7   : > { %v2712_v47 = vmul.f32 1.442695, %v2696_v43  ;;  %v2697_v45 = vsub.f32 %v2657_v52, %v2683_v60  ;;  %2730 = vadd.xlane.f32.xlu1 %v2729_v1 }
 0x8d9   : > { %8339 = vpow2.f32 %v2712_v47  ;;  %v2714_v25 = vmul.f32 1.442695, %v2697_v45  ;;  %v10917_v47 = vpack.c.bf16 %v9365_v53, %v9363_v5  ;;  %v10918_v5 = vpack.c.bf16 %v9371_v2, %v9369_v31 }
 0x8da   : > { %v10919_v31 = vpack.c.bf16 %v9377_v20, %v9375_v28 }
 0x8db   : > { %v9472_v14 = vpop.eup %8335  ;;  %8341 = vpow2.f32 %v2714_v25 }
 0x8dc   : > { %v2686_v29 = vpop.xlane.xlu0 %2685  ;;  %v2732_v21 = vsel %vm1408_vm3, %v9472_v14, 0.0 }
 0x8dd   : > { %v8338_v0 = vpop.eup %8337  ;;  %v2698_v36 = vsub.f32 %v2658_v19, %v2686_v29  ;;  %2733 = vadd.xlane.f32.xlu0 %v2732_v21 }
 0x8de   : > { %v2689_v63 = vpop.xlane.xlu1 %2688  ;;  %v2735_v9 = vsel %vm1408_vm3, %v8338_v0, 0.0 }
 0x8df   : > { %v2716_v30 = vmul.f32 1.442695, %v2698_v36  ;;  %v2699_v22 = vsub.f32 %v2659_v12, %v2689_v63  ;;  %2736 = vadd.xlane.f32.xlu1 %v2735_v9 }
 0x8e1   : > { %8343 = vpow2.f32 %v2716_v30  ;;  %v2718_v52 = vmul.f32 1.442695, %v2699_v22 }
 0x8e3   : > { %v8340_v38 = vpop.eup %8339  ;;  %8345 = vpow2.f32 %v2718_v52 }
 0x8e4   : > { %v2738_v10 = vsel %vm1408_vm3, %v8340_v38, 0.0 }
 0x8e5   : > { %v8342_v42 = vpop.eup %8341  ;;  %2739 = vadd.xlane.f32.xlu0 %v2738_v10 }
 0x8e6   : > { %v2741_v41 = vsel %vm1408_vm3, %v8342_v42, 0.0 }
 0x8e7   : > { %2742 = vadd.xlane.f32.xlu1 %v2741_v41 }
 0x8eb   : > { %v8344_v24 = vpop.eup %8343 }
 0x8ec   : > { %v2744_v19 = vsel %vm1408_vm3, %v8344_v24, 0.0 }
 0x8ed   : > { %v8346_v7 = vpop.eup %8345  ;;  %2745 = vadd.xlane.f32.xlu0 %v2744_v19 }
 0x8ee   : > { %v2747_v57 = vsel %vm1408_vm3, %v8346_v7, 0.0 }
 0x8ef   : > { %2748 = vadd.xlane.f32.xlu1 %v2747_v57 }
 0x95a   : > { %v2722_v12 = vpop.xlane.xlu0 %2721 }
 0x95b   : > { %8347 = vrcp.f32 %v2722_v12 }
 0x95c   : > { %v2725_v54 = vpop.xlane.xlu1 %2724 }
 0x95d   : > { %8349 = vrcp.f32 %v2725_v54 }
 0x962   : > { %v2728_v62 = vpop.xlane.xlu0 %2727 }
 0x963   : > { %8351 = vrcp.f32 %v2728_v62 }
 0x964   : > { %v2731_v61 = vpop.xlane.xlu1 %2730 }
 0x965   : > { %v8348_v3 = vpop.eup %8347  ;;  %8353 = vrcp.f32 %v2731_v61 }
 0x966   : > { %v2760_v39 = vmul.f32 %v8348_v3, %v9462_v48 }
 0x967   : > { %v8350_v50 = vpop.eup %8349 }
 0x968   : > { %v2761_v15 = vmul.f32 %v8350_v50, %v8330_v59 }
 0x96a   : > { %v2734_v55 = vpop.xlane.xlu0 %2733  ;;  %v2770_v43 = vpack.c.bf16 %v2761_v15, %v2760_v39 }
 0x96b   : > { %8355 = vrcp.f32 %v2734_v55 }
 0x96c   : > { %7571 = vmatmul.mubr.msk.bf16.vlgmr.msra.gmra.mrb[100].mxu0 %vm1408_vm3, %v2770_v43  ;;  %v2737_v60 = vpop.xlane.xlu1 %2736 }
 0x96d   : > { %v8352_v1 = vpop.eup %8351  ;;  %7581 = vmatpush3.bf16.msra.mxu0 %v10917_v47  ;;  %8357 = vrcp.f32 %v2737_v60  ;;  %7582 = vmatprep.mubr.msk.bf16.mxu0 %vm8557_vm2, %v8556_v17 }
 0x96e   : > { %7592 = vmatprep.subr.bf16.mxu0 %v8556_v17  ;;  %v2762_v48 = vmul.f32 %v8352_v1, %v9467_v26 }
 0x96f   : > { %v8354_v45 = vpop.eup %8353 }
 0x970   : > { %v2763_v59 = vmul.f32 %v8354_v45, %v8334_v40 }
 0x972   : > { %v2740_v25 = vpop.xlane.xlu0 %2739  ;;  %v2771_v29 = vpack.c.bf16 %v2763_v59, %v2762_v48 }
 0x973   : > { %8359 = vrcp.f32 %v2740_v25 }
 0x974   : > { %7577 = vmatmul.mubr.msk.bf16.vlgmr.msra.gmra.mrb[120].mxu1 %vm1408_vm3, %v2771_v29  ;;  %v2743_v21 = vpop.xlane.xlu1 %2742 }
 0x975   : > { %v8356_v36 = vpop.eup %8355  ;;  %7587 = vmatpush3.bf16.msra.mxu1 %v10918_v5  ;;  %8361 = vrcp.f32 %v2743_v21  ;;  %7588 = vmatprep.mubr.msk.bf16.mxu1 %vm8557_vm2, %v8556_v17 }
 0x976   : > { %7598 = vmatprep.subr.bf16.mxu1 %v8556_v17  ;;  %v2764_v26 = vmul.f32 %v8356_v36, %v9472_v14 }
 0x977   : > { %v8358_v53 = vpop.eup %8357 }
 0x978   : > { %v2765_v40 = vmul.f32 %v8358_v53, %v8338_v0  ;;  %v6805_v53 = vld [vmem:[%s10894_s14] ss:$0 sm:$0xff] }
 0x97a   : > { %v2746_v63 = vpop.xlane.xlu0 %2745  ;;  %v2772_v9 = vpack.c.bf16 %v2765_v40, %v2764_v26  ;;  %v2101_v26 = vadd.f32 %v6805_v53, %v9381_v23  ;;  %v2103_v23 = vadd.f32 %v6805_v53, %v9385_v13 }
 0x97b   : > { %8363 = vrcp.f32 %v2746_v63  ;;  %v2102_v63 = vadd.f32 %v6805_v53, %v9383_v11 }
 0x97c   : > { %7583 = vmatmul.mubr.msk.bf16.vlgmr.msra.gmra.mrb[104].mxu0 %vm1408_vm3, %v2772_v9  ;;  %v2749_v30 = vpop.xlane.xlu1 %2748 }
 0x97d   : > { %v8360_v22 = vpop.eup %8359  ;;  %7593 = vmatpush3.bf16.msra.mxu0 %v10919_v31  ;;  %8365 = vrcp.f32 %v2749_v30  ;;  %7594 = vmatprep.mubr.msk.bf16.mxu0 %vm8557_vm2, %v8556_v17 }
 0x97e   : > { %7620 = vmatprep.subr.bf16.mxu0 %v8556_v17  ;;  %v2766_v14 = vmul.f32 %v8360_v22, %v8340_v38  ;;  %v8240_v38 = vld [vmem:[%s10893_s13 + $0x8] sm:$0xff]  }
 0x97f   : > { %v8362_v2 = vpop.eup %8361 }
 0x980   : > { %v2767_v0 = vmul.f32 %v8362_v2, %v8342_v42 }
 0x982   : > { %v2773_v52 = vpack.c.bf16 %v2767_v0, %v2766_v14 }
 0x984   : > { %7589 = vmatmul.mubr.msk.bf16.vlgmr.msra.gmra.mrb[124].mxu1 %vm1408_vm3, %v2773_v52 }
 0x985   : > { %v8364_v10 = vpop.eup %8363  ;;  %7600 = vmatprep.mubr.msk.bf16.mxu1 %vm8557_vm2, %v8556_v17  ;;  %7599 = vmatpush3.bf16.msra.mxu1 %v8240_v38 }
 0x986   : > { %v2768_v19 = vmul.f32 %v8364_v10, %v8344_v24  ;;  %7644 = vmatprep.subr.bf16.mxu1 %v8556_v17 }
 0x987   : > { %v8366_v41 = vpop.eup %8365 }
 0x988   : > { %v2769_v28 = vmul.f32 %v8366_v41, %v8346_v7  ;;  %v2104_v41 = vadd.f32 %v6805_v53, %v9387_v27 }
 0x98a   : > { %v2774_v20 = vpack.c.bf16 %v2769_v28, %v2768_v19 }
 0x98c   : > { %7595 = vmatmul.mubr.msk.bf16.vlgmr.msra.gmra.mrb[108].mxu0 %vm1408_vm3, %v2774_v20 }
 0x98d   : > { %7624 = vmatprep.mubr.msk.bf16.mxu0 %vm8557_vm2, %v8556_v17 }
 0xa3f   : > { %v2817_v42 = vpop.f32.mrb[100].mxu0 }
 0xa40   : > { %v7572_v57 = vpop.f32.mrb[101].mxu0 }
 0xa41   : > { %v2820_v12 = vpop.f32.mrb[102].mxu0  ;;  %v2105_v57 = vadd.f32 %v6805_v53, %v9389_v33 }
 0xa42   : > { %v3000_v54 = vpack.c.bf16 %v2820_v12, %v2817_v42  ;;  %v7573_v62 = vpop.f32.mrb[103].mxu0 }
 0xa44   : > { %7601 = vmatmul.mubr.msk.bf16.vlgmr.msra.gmra.mrb[128].mxu1 %vm1408_vm3, %v3000_v54  ;;  %v2106_v54 = vadd.f32 %v6805_v53, %v9391_v35 }
 0xa45   : > { %7604 = vmatprep.mubr.msk.bf16.mxu1 %vm8557_vm2, %v8556_v17 }
 0xa47   : > { %v2861_v24 = vpop.f32.mrb[120].mxu1 }
 0xa48   : > { %v7578_v7 = vpop.f32.mrb[121].mxu1 }
 0xa49   : > { %v2864_v61 = vpop.f32.mrb[122].mxu1 }
 0xa4a   : > { %v3001_v3 = vpack.c.bf16 %v2864_v61, %v2861_v24  ;;  %v7579_v50 = vpop.f32.mrb[123].mxu1 }
 0xa4b   : > { %v2107_v50 = vadd.f32 %v6805_v53, %v9393_v37 }
 0xa4c   : > { %7605 = vmatmul.mubr.msk.bf16.gmra.mrb[132].mxu1 %vm1408_vm3, %v3001_v3 }
 0xa4d   : > { %7608 = vmatprep.mubr.msk.bf16.mxu1 %vm8557_vm2, %v8556_v17 }
 0xa4f   : > { %v2905_v39 = vpop.f32.mrb[104].mxu0 }
 0xa50   : > { %v7584_v15 = vpop.f32.mrb[105].mxu0 }
 0xa51   : > { %v2908_v55 = vpop.f32.mrb[106].mxu0  ;;  %v2108_v15 = vadd.f32 %v6805_v53, %v9395_v51 }
 0xa52   : > { %v3002_v43 = vpack.c.bf16 %v2908_v55, %v2905_v39  ;;  %v7585_v60 = vpop.f32.mrb[107].mxu0 }
 0xa54   : > { %7609 = vmatmul.mubr.msk.bf16.gmra.mrb[136].mxu1 %vm1408_vm3, %v3002_v43 }
 0xa55   : > { %7612 = vmatprep.mubr.msk.bf16.mxu1 %vm8557_vm2, %v8556_v17 }
 0xa57   : > { %v2949_v1 = vpop.f32.mrb[124].mxu1 }
 0xa58   : > { %v7590_v47 = vpop.f32.mrb[125].mxu1 }
 0xa59   : > { %v2952_v45 = vpop.f32.mrb[126].mxu1 }
 0xa5a   : > { %v3003_v48 = vpack.c.bf16 %v2952_v45, %v2949_v1  ;;  %v7591_v59 = vpop.f32.mrb[127].mxu1  ;;  %v2109_v45 = vadd.f32 %v6805_v53, %v9397_v8 }
 0xa5b   : > { %v2110_v59 = vadd.f32 %v6805_v53, %v9399_v49 }
 0xa5c   : > { %7613 = vmatmul.mubr.msk.bf16.gmra.mrb[140].mxu1 %vm1408_vm3, %v3003_v48 }
 0xa5d   : > { %7616 = vmatprep.mubr.msk.bf16.mxu1 %vm8557_vm2, %v8556_v17 }
 0xa5f   : > { %v2993_v25 = vpop.f32.mrb[108].mxu0 }
 0xa60   : > { %v7596_v29 = vpop.f32.mrb[109].mxu0 }
 0xa61   : > { %v2996_v21 = vpop.f32.mrb[110].mxu0 }
 0xa62   : > { %v3004_v36 = vpack.c.bf16 %v2996_v21, %v2993_v25  ;;  %v7597_v5 = vpop.f32.mrb[111].mxu0 }
 0xa64   : > { %7617 = vmatmul.mubr.msk.bf16.gmra.mrb[144].mxu1 %vm1408_vm3, %v3004_v36 }
 0xa65   : > { %7652 = vmatprep.mubr.msk.bf16.mxu1 %vm8557_vm2, %v8556_v17 }
 0xb17   : > { %v3063_v40 = vpop.f32.mrb[128].mxu1 }
 0xb18   : > { %v3102_v9 = vadd.f32 %v3063_v40, %v2101_v26  ;;  %v7602_v30 = vpop.f32.mrb[129].mxu1 }
 0xb19   : > { %v3066_v22 = vpop.f32.mrb[130].mxu1 }
 0xb1a   : > { %v9536_v31 = vadd.f32 %v3102_v9, %v8752_v32  ;;  %v3103_v2 = vadd.f32 %v3066_v22, %v2102_v63  ;;  %v7603_v14 = vpop.f32.mrb[131].mxu1 }
 0xb1c   : > { %v9539_v0 = vadd.f32 %v3103_v2, %v8756_v34  ;;  %v3124_v52 = vsel %vm925_vm1, %v9536_v31, 0.0 }
 0xb1d   : > { %3125 = vadd.xlane.f32.xlu0 %v3124_v52 }
 0xb1e   : > { %v3127_v11 = vsel %vm925_vm1, %v9539_v0, 0.0 }
 0xb1f   : > { %3128 = vadd.xlane.f32.xlu1 %v3127_v11  ;;  %v3071_v10 = vpop.f32.mrb[132].mxu1 }
 0xb20   : > { %v3104_v32 = vadd.f32 %v3071_v10, %v2103_v23  ;;  %v7606_v19 = vpop.f32.mrb[133].mxu1 }
 0xb21   : > { %v3074_v28 = vpop.f32.mrb[134].mxu1 }
 0xb22   : > { %v9548_v20 = vadd.f32 %v3104_v32, %v8768_v44  ;;  %v3105_v34 = vadd.f32 %v3074_v28, %v2104_v41  ;;  %v7607_v38 = vpop.f32.mrb[135].mxu1 }
 0xb24   : > { %v9551_v42 = vadd.f32 %v3105_v34, %v8772_v46  ;;  %v3130_v13 = vsel %vm925_vm1, %v9548_v20, 0.0 }
 0xb25   : > { %3131 = vadd.xlane.f32.xlu0 %v3130_v13 }
 0xb26   : > { %v3133_v27 = vsel %vm925_vm1, %v9551_v42, 0.0 }
 0xb27   : > { %3134 = vadd.xlane.f32.xlu1 %v3133_v27  ;;  %v3079_v12 = vpop.f32.mrb[136].mxu1 }
 0xb28   : > { %v3106_v44 = vadd.f32 %v3079_v12, %v2105_v57  ;;  %v7610_v62 = vpop.f32.mrb[137].mxu1 }
 0xb29   : > { %v3082_v24 = vpop.f32.mrb[138].mxu1 }
 0xb2a   : > { %v9560_v7 = vadd.f32 %v3106_v44, %v8784_v56  ;;  %v3107_v46 = vadd.f32 %v3082_v24, %v2106_v54  ;;  %v7611_v61 = vpop.f32.mrb[139].mxu1 }
 0xb2c   : > { %v9563_v3 = vadd.f32 %v3107_v46, %v8788_v58  ;;  %v3136_v33 = vsel %vm925_vm1, %v9560_v7, 0.0 }
 0xb2d   : > { %3137 = vadd.xlane.f32.xlu0 %v3136_v33 }
 0xb2e   : > { %v3139_v35 = vsel %vm925_vm1, %v9563_v3, 0.0 }
 0xb2f   : > { %3140 = vadd.xlane.f32.xlu1 %v3139_v35  ;;  %v3087_v39 = vpop.f32.mrb[140].mxu1 }
 0xb30   : > { %v3108_v56 = vadd.f32 %v3087_v39, %v2107_v50  ;;  %v7614_v55 = vpop.f32.mrb[141].mxu1 }
 0xb31   : > { %v3090_v43 = vpop.f32.mrb[142].mxu1 }
 0xb32   : > { %v9572_v60 = vadd.f32 %v3108_v56, %v8800_v4  ;;  %v3109_v58 = vadd.f32 %v3090_v43, %v2108_v15  ;;  %v7615_v1 = vpop.f32.mrb[143].mxu1 }
 0xb34   : > { %v9575_v47 = vadd.f32 %v3109_v58, %v8804_v6  ;;  %v3142_v37 = vsel %vm925_vm1, %v9572_v60, 0.0 }
 0xb35   : > { %3143 = vadd.xlane.f32.xlu0 %v3142_v37 }
 0xb36   : > { %v3145_v51 = vsel %vm925_vm1, %v9575_v47, 0.0 }
 0xb37   : > { %3146 = vadd.xlane.f32.xlu1 %v3145_v51  ;;  %v3095_v48 = vpop.f32.mrb[144].mxu1 }
 0xb38   : > { %v3110_v4 = vadd.f32 %v3095_v48, %v2109_v45  ;;  %v7618_v25 = vpop.f32.mrb[145].mxu1 }
 0xb39   : > { %v3098_v29 = vpop.f32.mrb[146].mxu1 }
 0xb3a   : > { %v9584_v21 = vadd.f32 %v3110_v4, %v8816_v16  ;;  %v3111_v6 = vadd.f32 %v3098_v29, %v2110_v59  ;;  %v7619_v36 = vpop.f32.mrb[147].mxu1 }
 0xb3c   : > { %v9587_v5 = vadd.f32 %v3111_v6, %v8820_v18  ;;  %v3148_v8 = vsel %vm925_vm1, %v9584_v21, 0.0  ;;  %v8241_v6 = vld [vmem:[%s10897_s17] sm:$0xff]  }
 0xb3d   : > { %3149 = vadd.xlane.f32.xlu0 %v3148_v8  ;;  %7621 = vmatpush3.bf16.msra.mxu0 %v8241_v6  ;;  %v8242_v8 = vld [vmem:[%s10897_s17 + $0x8] sm:$0xff]  }
 0xb3e   : > { %v3151_v26 = vsel %vm925_vm1, %v9587_v5, 0.0  ;;  %7622 = vmatprep.subr.bf16.mxu0 %v8556_v17 }
 0xb3f   : > { %3152 = vadd.xlane.f32.xlu1 %v3151_v26 }
 0xb41   : > { %7623 = vmatpush3.bf16.msra.mxu0 %v8242_v8 }
 0xb42   : > { %7672 = vmatprep.subr.bf16.mxu0 %v8556_v17 }
 0xbaa   : > { %v3126_v49 = vpop.xlane.xlu0 %3125 }
 0xbab   : > { %v3154_v53 = vmul.f32 0.03125, %v3126_v49 }
 0xbac   : > { %v3129_v40 = vpop.xlane.xlu1 %3128 }
 0xbad   : > { %v9594_v63 = vsub.f32 %v9536_v31, %v3154_v53  ;;  %v3155_v16 = vmul.f32 0.03125, %v3129_v40 }
 0xbaf   : > { %v9597_v9 = vsub.f32 %v9539_v0, %v3155_v16  ;;  %v3174_v18 = vmul.f32 %v9594_v63, %v9594_v63 }
 0xbb1   : > { %v3184_v30 = vsel %vm925_vm1, %v3174_v18, 0.0  ;;  %v3175_v22 = vmul.f32 %v9597_v9, %v9597_v9 }
 0xbb2   : > { %v3132_v2 = vpop.xlane.xlu0 %3131  ;;  %3185 = vadd.xlane.f32.xlu0 %v3184_v30 }
 0xbb3   : > { %v3156_v14 = vmul.f32 0.03125, %v3132_v2  ;;  %v3187_v52 = vsel %vm925_vm1, %v3175_v22, 0.0 }
 0xbb4   : > { %v3135_v23 = vpop.xlane.xlu1 %3134  ;;  %3188 = vadd.xlane.f32.xlu1 %v3187_v52 }
 0xbb5   : > { %v9606_v11 = vsub.f32 %v9548_v20, %v3156_v14  ;;  %v3157_v10 = vmul.f32 0.03125, %v3135_v23 }
 0xbb7   : > { %v9609_v41 = vsub.f32 %v9551_v42, %v3157_v10  ;;  %v3176_v32 = vmul.f32 %v9606_v11, %v9606_v11 }
 0xbb9   : > { %v3190_v19 = vsel %vm925_vm1, %v3176_v32, 0.0  ;;  %v3177_v28 = vmul.f32 %v9609_v41, %v9609_v41  ;;  %v9664_v32 = vld [vmem:[%s10895_s15] ss:$0 sm:$0xff] }
 0xbba   : > { %v3138_v34 = vpop.xlane.xlu0 %3137  ;;  %3191 = vadd.xlane.f32.xlu0 %v3190_v19 }
 0xbbb   : > { %v3158_v38 = vmul.f32 0.03125, %v3138_v34  ;;  %v3193_v13 = vsel %vm925_vm1, %v3177_v28, 0.0 }
 0xbbc   : > { %v3141_v57 = vpop.xlane.xlu1 %3140  ;;  %3194 = vadd.xlane.f32.xlu1 %v3193_v13 }
 0xbbd   : > { %v9618_v27 = vsub.f32 %v9560_v7, %v3158_v38  ;;  %v3159_v12 = vmul.f32 0.03125, %v3141_v57 }
 0xbbf   : > { %v9621_v54 = vsub.f32 %v9563_v3, %v3159_v12  ;;  %v3178_v44 = vmul.f32 %v9618_v27, %v9618_v27 }
 0xbc1   : > { %v3196_v62 = vsel %vm925_vm1, %v3178_v44, 0.0  ;;  %v3179_v24 = vmul.f32 %v9621_v54, %v9621_v54 }
 0xbc2   : > { %v3144_v46 = vpop.xlane.xlu0 %3143  ;;  %3197 = vadd.xlane.f32.xlu0 %v3196_v62 }
 0xbc3   : > { %v3160_v61 = vmul.f32 0.03125, %v3144_v46  ;;  %v3199_v33 = vsel %vm925_vm1, %v3179_v24, 0.0  ;;  %v9672_v24 = vld [vmem:[%s10896_s16] ss:$0 sm:$0xff] }
 0xbc4   : > { %v3147_v50 = vpop.xlane.xlu1 %3146  ;;  %3200 = vadd.xlane.f32.xlu1 %v3199_v33 }
 0xbc5   : > { %v9630_v35 = vsub.f32 %v9572_v60, %v3160_v61  ;;  %v3161_v39 = vmul.f32 0.03125, %v3147_v50 }
 0xbc7   : > { %v9633_v15 = vsub.f32 %v9575_v47, %v3161_v39  ;;  %v3180_v56 = vmul.f32 %v9630_v35, %v9630_v35 }
 0xbc9   : > { %v3202_v55 = vsel %vm925_vm1, %v3180_v56, 0.0  ;;  %v3181_v43 = vmul.f32 %v9633_v15, %v9633_v15 }
 0xbca   : > { %3203 = vadd.xlane.f32.xlu0 %v3202_v55  ;;  %v3150_v58 = vpop.xlane.xlu0 %3149 }
 0xbcb   : > { %v3162_v1 = vmul.f32 0.03125, %v3150_v58  ;;  %v3205_v37 = vsel %vm925_vm1, %v3181_v43, 0.0 }
 0xbcc   : > { %3206 = vadd.xlane.f32.xlu1 %v3205_v37  ;;  %v3153_v45 = vpop.xlane.xlu1 %3152 }
 0xbcd   : > { %v9642_v51 = vsub.f32 %v9584_v21, %v3162_v1  ;;  %v3163_v48 = vmul.f32 0.03125, %v3153_v45 }
 0xbcf   : > { %v9645_v59 = vsub.f32 %v9587_v5, %v3163_v48  ;;  %v3182_v4 = vmul.f32 %v9642_v51, %v9642_v51 }
 0xbd1   : > { %v3208_v25 = vsel %vm925_vm1, %v3182_v4, 0.0  ;;  %v3183_v29 = vmul.f32 %v9645_v59, %v9645_v59 }
 0xbd2   : > { %3209 = vadd.xlane.f32.xlu0 %v3208_v25 }
 0xbd3   : > { %v3211_v36 = vsel %vm925_vm1, %v3183_v29, 0.0 }
 0xbd4   : > { %3212 = vadd.xlane.f32.xlu1 %v3211_v36 }
 0xc3f   : > { %v3186_v26 = vpop.xlane.xlu0 %3185 }
 0xc40   : > { %v3214_v49 = vmul.f32 0.03125, %v3186_v26 }
 0xc41   : > { %v3189_v53 = vpop.xlane.xlu1 %3188 }
 0xc42   : > { %v3224_v40 = vadd.f32 1e-06, %v3214_v49  ;;  %v3215_v16 = vmul.f32 0.03125, %v3189_v53 }
 0xc44   : > { %8367 = vrsqrt.f32 %v3224_v40  ;;  %v3225_v18 = vadd.f32 1e-06, %v3215_v16 }
 0xc46   : > { %8369 = vrsqrt.f32 %v3225_v18 }
 0xc47   : > { %v3192_v30 = vpop.xlane.xlu0 %3191 }
 0xc48   : > { %v3216_v22 = vmul.f32 0.03125, %v3192_v30 }
 0xc49   : > { %v3195_v2 = vpop.xlane.xlu1 %3194 }
 0xc4a   : > { %v3226_v14 = vadd.f32 1e-06, %v3216_v22  ;;  %v3217_v52 = vmul.f32 0.03125, %v3195_v2 }
 0xc4c   : > { %8371 = vrsqrt.f32 %v3226_v14  ;;  %v3227_v23 = vadd.f32 1e-06, %v3217_v52 }
 0xc4e   : > { %v8368_v10 = vpop.eup %8367  ;;  %8373 = vrsqrt.f32 %v3227_v23 }
 0xc4f   : > { %v3244_v19 = vmul.f32 %v8368_v10, %v9594_v63  ;;  %v3198_v28 = vpop.xlane.xlu0 %3197 }
 0xc50   : > { %v8370_v34 = vpop.eup %8369  ;;  %v3218_v38 = vmul.f32 0.03125, %v3198_v28 }
 0xc51   : > { %v3260_v13 = vmul.f32 %v9664_v32, %v3244_v19  ;;  %v3245_v57 = vmul.f32 %v8370_v34, %v9597_v9  ;;  %v3201_v12 = vpop.xlane.xlu1 %3200 }
 0xc52   : > { %v3228_v44 = vadd.f32 1e-06, %v3218_v38  ;;  %v3219_v62 = vmul.f32 0.03125, %v3201_v12 }
 0xc53   : > { %v3261_v46 = vmul.f32 %v9664_v32, %v3245_v57  ;;  %v3276_v63 = vadd.f32 %v9672_v24, %v3260_v13 }
 0xc54   : > { %8375 = vrsqrt.f32 %v3228_v44  ;;  %v3229_v61 = vadd.f32 1e-06, %v3219_v62 }
 0xc55   : > { %v3277_v33 = vadd.f32 %v9672_v24, %v3261_v46 }
 0xc56   : > { %v8372_v50 = vpop.eup %8371  ;;  %8377 = vrsqrt.f32 %v3229_v61 }
 0xc57   : > { %v3246_v9 = vmul.f32 %v8372_v50, %v9606_v11  ;;  %v3204_v39 = vpop.xlane.xlu0 %3203  ;;  %v3286_v56 = vpack.c.bf16 %v3277_v33, %v3276_v63  ;;  %v9735_v50 = vld [vmem:[%s10898_s18] ss:$0 sm:$0xff] }
 0xc58   : > { %v8374_v55 = vpop.eup %8373  ;;  %v3220_v43 = vmul.f32 0.03125, %v3204_v39 }
 0xc59   : > { %v3247_v58 = vmul.f32 %v8374_v55, %v9609_v41  ;;  %7625 = vmatmul.mubr.msk.bf16.vlgmr.msra.gmra.mrb[112].mxu0 %vm925_vm1, %v3286_v56  ;;  %v3207_v1 = vpop.xlane.xlu1 %3206  ;;  %v3262_v37 = vmul.f32 %v9664_v32, %v3246_v9 }
 0xc5a   : > { %v3230_v45 = vadd.f32 1e-06, %v3220_v43  ;;  %v3221_v48 = vmul.f32 0.03125, %v3207_v1  ;;  %7628 = vmatprep.mubr.msk.bf16.mxu0 %vm8557_vm2, %v8556_v17 }
 0xc5b   : > { %v3263_v4 = vmul.f32 %v9664_v32, %v3247_v58  ;;  %v3278_v25 = vadd.f32 %v9672_v24, %v3262_v37 }
 0xc5c   : > { %8379 = vrsqrt.f32 %v3230_v45  ;;  %v3231_v11 = vadd.f32 1e-06, %v3221_v48 }
 0xc5d   : > { %v3279_v29 = vadd.f32 %v9672_v24, %v3263_v4 }
 0xc5e   : > { %v8376_v6 = vpop.eup %8375  ;;  %8381 = vrsqrt.f32 %v3231_v11 }
 0xc5f   : > { %v3248_v41 = vmul.f32 %v8376_v6, %v9618_v27  ;;  %v3210_v36 = vpop.xlane.xlu0 %3209  ;;  %v3287_v8 = vpack.c.bf16 %v3279_v29, %v3278_v25 }
 0xc60   : > { %v8378_v26 = vpop.eup %8377  ;;  %v3222_v49 = vmul.f32 0.03125, %v3210_v36 }
 0xc61   : > { %v3249_v53 = vmul.f32 %v8378_v26, %v9621_v54  ;;  %7629 = vmatmul.mubr.msk.bf16.gmra.mrb[116].mxu0 %vm925_vm1, %v3287_v8  ;;  %v3213_v40 = vpop.xlane.xlu1 %3212  ;;  %v3264_v16 = vmul.f32 %v9664_v32, %v3248_v41 }
 0xc62   : > { %v3232_v18 = vadd.f32 1e-06, %v3222_v49  ;;  %v3223_v30 = vmul.f32 0.03125, %v3213_v40  ;;  %7632 = vmatprep.mubr.msk.bf16.mxu0 %vm8557_vm2, %v8556_v17 }
 0xc63   : > { %v3265_v22 = vmul.f32 %v9664_v32, %v3249_v53  ;;  %v3280_v2 = vadd.f32 %v9672_v24, %v3264_v16 }
 0xc64   : > { %8383 = vrsqrt.f32 %v3232_v18  ;;  %v3233_v27 = vadd.f32 1e-06, %v3223_v30 }
 0xc65   : > { %v3281_v14 = vadd.f32 %v9672_v24, %v3265_v22 }
 0xc66   : > { %v8380_v52 = vpop.eup %8379  ;;  %8385 = vrsqrt.f32 %v3233_v27 }
 0xc67   : > { %v3250_v54 = vmul.f32 %v8380_v52, %v9630_v35  ;;  %v3288_v23 = vpack.c.bf16 %v3281_v14, %v3280_v2 }
 0xc68   : > { %v8382_v10 = vpop.eup %8381 }
 0xc69   : > { %v3251_v19 = vmul.f32 %v8382_v10, %v9633_v15  ;;  %7633 = vmatmul.mubr.msk.bf16.gmra.mrb[120].mxu0 %vm925_vm1, %v3288_v23  ;;  %v3266_v28 = vmul.f32 %v9664_v32, %v3250_v54 }
 0xc6a   : > { %7636 = vmatprep.mubr.msk.bf16.mxu0 %vm8557_vm2, %v8556_v17 }
 0xc6b   : > { %v3267_v34 = vmul.f32 %v9664_v32, %v3251_v19  ;;  %v3282_v38 = vadd.f32 %v9672_v24, %v3266_v28 }
 0xc6d   : > { %v3283_v13 = vadd.f32 %v9672_v24, %v3267_v34 }
 0xc6e   : > { %v8384_v57 = vpop.eup %8383 }
 0xc6f   : > { %v3252_v35 = vmul.f32 %v8384_v57, %v9642_v51  ;;  %v3289_v12 = vpack.c.bf16 %v3283_v13, %v3282_v38  ;;  %v8243_v51 = vld [vmem:[%s10899_s19] sm:$0xff]  }
 0xc70   : > { %v8386_v44 = vpop.eup %8385  ;;  %7645 = vmatpush3.bf16.msra.mxu1 %v8243_v51 }
 0xc71   : > { %v3253_v15 = vmul.f32 %v8386_v44, %v9645_v59  ;;  %7637 = vmatmul.mubr.msk.bf16.gmra.mrb[124].mxu0 %vm925_vm1, %v3289_v12  ;;  %v3268_v62 = vmul.f32 %v9664_v32, %v3252_v35  ;;  %7646 = vmatprep.subr.bf16.mxu1 %v8556_v17  ;;  %v8244_v59 = vld [vmem:[%s10899_s19 + $0x8] sm:$0xff]  }
 0xc72   : > { %7640 = vmatprep.mubr.msk.bf16.mxu0 %vm8557_vm2, %v8556_v17 }
 0xc73   : > { %v3269_v46 = vmul.f32 %v9664_v32, %v3253_v15  ;;  %v3284_v61 = vadd.f32 %v9672_v24, %v3268_v62  ;;  %v8245_v32 = vld [vmem:[%s10899_s19 + $0x10] sm:$0xff]  }
 0xc74   : > { %7647 = vmatpush3.bf16.msra.mxu1 %v8244_v59 }
 0xc75   : > { %v3285_v63 = vadd.f32 %v9672_v24, %v3269_v46  ;;  %7648 = vmatprep.subr.bf16.mxu1 %v8556_v17  ;;  %v8246_v24 = vld [vmem:[%s10899_s19 + $0x18] sm:$0xff]  }
 0xc77   : > { %v3290_v33 = vpack.c.bf16 %v3285_v63, %v3284_v61 }
 0xc78   : > { %7649 = vmatpush3.bf16.msra.mxu1 %v8245_v32 }
 0xc79   : > { %7641 = vmatmul.mubr.msk.bf16.gmra.mrb[128].mxu0 %vm925_vm1, %v3290_v33  ;;  %7650 = vmatprep.subr.bf16.mxu1 %v8556_v17 }
 0xc7a   : > { %7676 = vmatprep.mubr.msk.bf16.mxu0 %vm8557_vm2, %v8556_v17 }
 0xc7c   : > { %7651 = vmatpush3.bf16.msra.mxu1 %v8246_v24 }
 0xc7d   : > { %7696 = vmatprep.subr.bf16.mxu1 %v8556_v17 }
 0xd2c   : > { %v3363_v9 = vpop.f32.mrb[112].mxu0 }
 0xd2d   : > { %v9738_v39 = vadd.f32 %v9735_v50, %v3363_v9  ;;  %v7626_v56 = vpop.f32.mrb[113].mxu0 }
 0xd2e   : > { %v3366_v55 = vpop.f32.mrb[114].mxu0 }
 0xd2f   : > { %v3402_v43 = vmul.f32 %v9738_v39, %v9738_v39  ;;  %v9743_v58 = vadd.f32 %v9735_v50, %v3366_v55  ;;  %v7627_v1 = vpop.f32.mrb[115].mxu0 }
 0xd31   : > { %v3412_v37 = vmul.f32 %v3402_v43, %v9738_v39  ;;  %v3403_v45 = vmul.f32 %v9743_v58, %v9743_v58 }
 0xd33   : > { %v3422_v48 = vmul.f32 0.044715, %v3412_v37  ;;  %v3413_v4 = vmul.f32 %v3403_v45, %v9743_v58 }
 0xd34   : > { %v3371_v11 = vpop.f32.mrb[116].mxu0 }
 0xd35   : > { %v3432_v25 = vadd.f32 %v3422_v48, %v9738_v39  ;;  %v3423_v29 = vmul.f32 0.044715, %v3413_v4  ;;  %v9751_v6 = vadd.f32 %v9735_v50, %v3371_v11  ;;  %v7630_v41 = vpop.f32.mrb[117].mxu0 }
 0xd36   : > { %v3374_v36 = vpop.f32.mrb[118].mxu0 }
 0xd37   : > { %v3442_v8 = vmul.f32 0.7978846, %v3432_v25  ;;  %v3433_v26 = vadd.f32 %v3423_v29, %v9743_v58  ;;  %v3404_v49 = vmul.f32 %v9751_v6, %v9751_v6  ;;  %v9757_v53 = vadd.f32 %v9735_v50, %v3374_v36  ;;  %v7631_v40 = vpop.f32.mrb[119].mxu0 }
 0xd39   : > { %8387 = vtanh.f32 %v3442_v8  ;;  %v3443_v16 = vmul.f32 0.7978846, %v3433_v26  ;;  %v3414_v18 = vmul.f32 %v3404_v49, %v9751_v6  ;;  %v3405_v30 = vmul.f32 %v9757_v53, %v9757_v53 }
 0xd3b   : > { %8389 = vtanh.f32 %v3443_v16  ;;  %v3424_v22 = vmul.f32 0.044715, %v3414_v18  ;;  %v3415_v27 = vmul.f32 %v3405_v30, %v9757_v53 }
 0xd3c   : > { %v3379_v2 = vpop.f32.mrb[120].mxu0 }
 0xd3d   : > { %v3434_v14 = vadd.f32 %v3424_v22, %v9751_v6  ;;  %v3425_v52 = vmul.f32 0.044715, %v3415_v27  ;;  %v9765_v54 = vadd.f32 %v9735_v50, %v3379_v2  ;;  %v7634_v23 = vpop.f32.mrb[121].mxu0 }
 0xd3e   : > { %v3382_v10 = vpop.f32.mrb[122].mxu0 }
 0xd3f   : > { %v3444_v19 = vmul.f32 0.7978846, %v3434_v14  ;;  %v3435_v28 = vadd.f32 %v3425_v52, %v9757_v53  ;;  %v3406_v34 = vmul.f32 %v9765_v54, %v9765_v54  ;;  %v9771_v38 = vadd.f32 %v9735_v50, %v3382_v10  ;;  %v7635_v13 = vpop.f32.mrb[123].mxu0 }
 0xd41   : > { %8391 = vtanh.f32 %v3444_v19  ;;  %v3445_v57 = vmul.f32 0.7978846, %v3435_v28  ;;  %v3416_v35 = vmul.f32 %v3406_v34, %v9765_v54  ;;  %v3407_v12 = vmul.f32 %v9771_v38, %v9771_v38 }
 0xd43   : > { %v8388_v44 = vpop.eup %8387  ;;  %8393 = vtanh.f32 %v3445_v57  ;;  %v3426_v15 = vmul.f32 0.044715, %v3416_v35  ;;  %v3417_v62 = vmul.f32 %v3407_v12, %v9771_v38 }
 0xd44   : > { %v3462_v46 = vadd.f32 1.0, %v8388_v44  ;;  %v3387_v61 = vpop.f32.mrb[124].mxu0 }
 0xd45   : > { %v8390_v63 = vpop.eup %8389  ;;  %v3436_v33 = vadd.f32 %v3426_v15, %v9765_v54  ;;  %v3427_v51 = vmul.f32 0.044715, %v3417_v62  ;;  %v9779_v59 = vadd.f32 %v9735_v50, %v3387_v61  ;;  %v7638_v32 = vpop.f32.mrb[125].mxu0 }
 0xd46   : > { %v3472_v24 = vmul.f32 0.5, %v3462_v46  ;;  %v3463_v9 = vadd.f32 1.0, %v8390_v63  ;;  %v3390_v56 = vpop.f32.mrb[126].mxu0 }
 0xd47   : > { %v3446_v55 = vmul.f32 0.7978846, %v3436_v33  ;;  %v3437_v43 = vadd.f32 %v3427_v51, %v9771_v38  ;;  %v3408_v1 = vmul.f32 %v9779_v59, %v9779_v59  ;;  %v9785_v37 = vadd.f32 %v9735_v50, %v3390_v56  ;;  %v7639_v45 = vpop.f32.mrb[127].mxu0 }
 0xd48   : > { %v3473_v48 = vmul.f32 0.5, %v3463_v9  ;;  %v3482_v29 = vmul.f32 %v3472_v24, %v9738_v39 }
 0xd49   : > { %8395 = vtanh.f32 %v3446_v55  ;;  %v3447_v4 = vmul.f32 0.7978846, %v3437_v43  ;;  %v3418_v11 = vmul.f32 %v3408_v1, %v9779_v59  ;;  %v3409_v25 = vmul.f32 %v9785_v37, %v9785_v37 }
 0xd4a   : > { %v3483_v41 = vmul.f32 %v3473_v48, %v9743_v58 }
 0xd4b   : > { %v8392_v36 = vpop.eup %8391  ;;  %8397 = vtanh.f32 %v3447_v4  ;;  %v3428_v8 = vmul.f32 0.044715, %v3418_v11  ;;  %v3419_v26 = vmul.f32 %v3409_v25, %v9785_v37 }
 0xd4c   : > { %v3492_v49 = vpack.c.bf16 %v3483_v41, %v3482_v29  ;;  %v3464_v40 = vadd.f32 1.0, %v8392_v36  ;;  %v3395_v16 = vpop.f32.mrb[128].mxu0 }
 0xd4d   : > { %v8394_v18 = vpop.eup %8393  ;;  %v3438_v30 = vadd.f32 %v3428_v8, %v9779_v59  ;;  %v3429_v22 = vmul.f32 0.044715, %v3419_v26  ;;  %v3396_v27 = vadd.f32 %v9735_v50, %v3395_v16  ;;  %v7642_v2 = vpop.f32.mrb[129].mxu0 }
 0xd4e   : > { %v3474_v14 = vmul.f32 0.5, %v3464_v40  ;;  %v3465_v52 = vadd.f32 1.0, %v8394_v18  ;;  %v3398_v39 = vpop.f32.mrb[130].mxu0  ;;  %7653 = vmatmul.mubr.msk.bf16.vlgmr.msra.gmra.mrb[148].mxu1 %vm814_vm0, %v3492_v49 }
 0xd4f   : > { %v3448_v58 = vmul.f32 0.7978846, %v3438_v30  ;;  %v3439_v23 = vadd.f32 %v3429_v22, %v9785_v37  ;;  %v3410_v10 = vmul.f32 %v3396_v27, %v3396_v27  ;;  %v3399_v19 = vadd.f32 %v9735_v50, %v3398_v39  ;;  %v7643_v28 = vpop.f32.mrb[131].mxu0  ;;  %7656 = vmatprep.mubr.msk.bf16.mxu1 %vm8557_vm2, %v8556_v17 }
 0xd50   : > { %v3475_v34 = vmul.f32 0.5, %v3465_v52  ;;  %v3484_v12 = vmul.f32 %v3474_v14, %v9751_v6 }
 0xd51   : > { %8399 = vtanh.f32 %v3448_v58  ;;  %v3449_v13 = vmul.f32 0.7978846, %v3439_v23  ;;  %v3420_v57 = vmul.f32 %v3410_v10, %v3396_v27  ;;  %v3411_v35 = vmul.f32 %v3399_v19, %v3399_v19 }
 0xd52   : > { %v3485_v44 = vmul.f32 %v3475_v34, %v9757_v53 }
 0xd53   : > { %v8396_v15 = vpop.eup %8395  ;;  %8401 = vtanh.f32 %v3449_v13  ;;  %v3430_v62 = vmul.f32 0.044715, %v3420_v57  ;;  %v3421_v46 = vmul.f32 %v3411_v35, %v3399_v19 }
 0xd54   : > { %v3466_v61 = vadd.f32 1.0, %v8396_v15  ;;  %v3493_v63 = vpack.c.bf16 %v3485_v44, %v3484_v12 }
 0xd55   : > { %v8398_v50 = vpop.eup %8397  ;;  %v3440_v33 = vadd.f32 %v3430_v62, %v3396_v27  ;;  %v3431_v51 = vmul.f32 0.044715, %v3421_v46 }
 0xd56   : > { %v3476_v32 = vmul.f32 0.5, %v3466_v61  ;;  %v3467_v24 = vadd.f32 1.0, %v8398_v50  ;;  %7657 = vmatmul.mubr.msk.bf16.gmra.mrb[152].mxu1 %vm814_vm0, %v3493_v63 }
 0xd57   : > { %v3450_v9 = vmul.f32 0.7978846, %v3440_v33  ;;  %v3441_v56 = vadd.f32 %v3431_v51, %v3399_v19  ;;  %7660 = vmatprep.mubr.msk.bf16.mxu1 %vm8557_vm2, %v8556_v17 }
 0xd58   : > { %v3477_v6 = vmul.f32 0.5, %v3467_v24  ;;  %v3486_v55 = vmul.f32 %v3476_v32, %v9765_v54 }
 0xd59   : > { %8403 = vtanh.f32 %v3450_v9  ;;  %v3451_v53 = vmul.f32 0.7978846, %v3441_v56 }
 0xd5a   : > { %v3487_v43 = vmul.f32 %v3477_v6, %v9771_v38 }
 0xd5b   : > { %v8400_v1 = vpop.eup %8399  ;;  %8405 = vtanh.f32 %v3451_v53 }
 0xd5c   : > { %v3468_v45 = vadd.f32 1.0, %v8400_v1  ;;  %v3494_v48 = vpack.c.bf16 %v3487_v43, %v3486_v55 }
 0xd5d   : > { %v8402_v4 = vpop.eup %8401 }
 0xd5e   : > { %v3478_v11 = vmul.f32 0.5, %v3468_v45  ;;  %v3469_v25 = vadd.f32 1.0, %v8402_v4  ;;  %7661 = vmatmul.mubr.msk.bf16.gmra.mrb[156].mxu1 %vm814_vm0, %v3494_v48 }
 0xd5f   : > { %7664 = vmatprep.mubr.msk.bf16.mxu1 %vm8557_vm2, %v8556_v17 }
 0xd60   : > { %v3479_v29 = vmul.f32 0.5, %v3469_v25  ;;  %v3488_v41 = vmul.f32 %v3478_v11, %v9779_v59  ;;  %v6873_v59 = vld [vmem:[%s10900_s20] ss:$0 sm:$0xff] }
 0xd62   : > { %v3489_v36 = vmul.f32 %v3479_v29, %v9785_v37 }
 0xd63   : > { %v8404_v54 = vpop.eup %8403 }
 0xd64   : > { %v3470_v8 = vadd.f32 1.0, %v8404_v54  ;;  %v3495_v38 = vpack.c.bf16 %v3489_v36, %v3488_v41 }
 0xd65   : > { %v8406_v26 = vpop.eup %8405 }
 0xd66   : > { %v3480_v49 = vmul.f32 0.5, %v3470_v8  ;;  %v3471_v40 = vadd.f32 1.0, %v8406_v26  ;;  %7665 = vmatmul.mubr.msk.bf16.gmra.mrb[160].mxu1 %vm814_vm0, %v3495_v38 }
 0xd67   : > { %7668 = vmatprep.mubr.msk.bf16.mxu1 %vm8557_vm2, %v8556_v17 }
 0xd68   : > { %v3481_v16 = vmul.f32 0.5, %v3471_v40  ;;  %v3490_v18 = vmul.f32 %v3480_v49, %v3396_v27 }
 0xd6a   : > { %v3491_v30 = vmul.f32 %v3481_v16, %v3399_v19 }
 0xd6c   : > { %v3496_v22 = vpack.c.bf16 %v3491_v30, %v3490_v18 }
 0xd6e   : > { %7669 = vmatmul.mubr.msk.bf16.gmra.mrb[164].mxu1 %vm814_vm0, %v3496_v22 }
 0xd6f   : > { %7700 = vmatprep.mubr.msk.bf16.mxu1 %vm8557_vm2, %v8556_v17 }
 0xe21   : > { %v3585_v37 = vpop.f32.mrb[148].mxu1 }
 0xe22   : > { %v3586_v2 = vadd.f32 %v6873_v59, %v3585_v37  ;;  %v7654_v14 = vpop.f32.mrb[149].mxu1 }
 0xe23   : > { %v3588_v52 = vpop.f32.mrb[150].mxu1 }
 0xe24   : > { %v9822_v39 = vadd.f32 %v3586_v2, %v9536_v31  ;;  %v3589_v58 = vadd.f32 %v6873_v59, %v3588_v52  ;;  %v7655_v27 = vpop.f32.mrb[151].mxu1 }
 0xe26   : > { %v9825_v23 = vadd.f32 %v3589_v58, %v9539_v0  ;;  %v3638_v10 = vsel %vm925_vm1, %v9822_v39, 0.0 }
 0xe27   : > { %3639 = vadd.xlane.f32.xlu0 %v3638_v10 }
 0xe28   : > { %v3641_v19 = vsel %vm925_vm1, %v9825_v23, 0.0 }
 0xe29   : > { %3642 = vadd.xlane.f32.xlu1 %v3641_v19  ;;  %v3593_v28 = vpop.f32.mrb[152].mxu1 }
 0xe2a   : > { %v3594_v34 = vadd.f32 %v6873_v59, %v3593_v28  ;;  %v7658_v13 = vpop.f32.mrb[153].mxu1 }
 0xe2b   : > { %v3596_v57 = vpop.f32.mrb[154].mxu1 }
 0xe2c   : > { %v9832_v31 = vadd.f32 %v3594_v34, %v9548_v20  ;;  %v3597_v35 = vadd.f32 %v6873_v59, %v3596_v57  ;;  %v7659_v12 = vpop.f32.mrb[155].mxu1 }
 0xe2e   : > { %v9835_v0 = vadd.f32 %v3597_v35, %v9551_v42  ;;  %v3644_v44 = vsel %vm925_vm1, %v9832_v31, 0.0 }
 0xe2f   : > { %3645 = vadd.xlane.f32.xlu0 %v3644_v44 }
 0xe30   : > { %v3647_v15 = vsel %vm925_vm1, %v9835_v0, 0.0 }
 0xe31   : > { %3648 = vadd.xlane.f32.xlu1 %v3647_v15  ;;  %v3601_v62 = vpop.f32.mrb[156].mxu1 }
 0xe32   : > { %v3602_v46 = vadd.f32 %v6873_v59, %v3601_v62  ;;  %v7662_v61 = vpop.f32.mrb[157].mxu1 }
 0xe33   : > { %v3604_v63 = vpop.f32.mrb[158].mxu1 }
 0xe34   : > { %v9842_v20 = vadd.f32 %v3602_v46, %v9560_v7  ;;  %v3605_v50 = vadd.f32 %v6873_v59, %v3604_v63  ;;  %v7663_v33 = vpop.f32.mrb[159].mxu1 }
 0xe36   : > { %v9845_v42 = vadd.f32 %v3605_v50, %v9563_v3  ;;  %v3650_v51 = vsel %vm925_vm1, %v9842_v20, 0.0 }
 0xe37   : > { %3651 = vadd.xlane.f32.xlu0 %v3650_v51 }
 0xe38   : > { %v3653_v32 = vsel %vm925_vm1, %v9845_v42, 0.0 }
 0xe39   : > { %3654 = vadd.xlane.f32.xlu1 %v3653_v32  ;;  %v3609_v24 = vpop.f32.mrb[160].mxu1 }
 0xe3a   : > { %v3610_v9 = vadd.f32 %v6873_v59, %v3609_v24  ;;  %v7666_v56 = vpop.f32.mrb[161].mxu1 }
 0xe3b   : > { %v3612_v6 = vpop.f32.mrb[162].mxu1 }
 0xe3c   : > { %v9852_v7 = vadd.f32 %v3610_v9, %v9572_v60  ;;  %v3613_v53 = vadd.f32 %v6873_v59, %v3612_v6  ;;  %v7667_v55 = vpop.f32.mrb[163].mxu1 }
 0xe3e   : > { %v9855_v3 = vadd.f32 %v3613_v53, %v9575_v47  ;;  %v3656_v43 = vsel %vm925_vm1, %v9852_v7, 0.0 }
 0xe3f   : > { %3657 = vadd.xlane.f32.xlu0 %v3656_v43 }
 0xe40   : > { %v3659_v1 = vsel %vm925_vm1, %v9855_v3, 0.0 }
 0xe41   : > { %3660 = vadd.xlane.f32.xlu1 %v3659_v1  ;;  %v3617_v45 = vpop.f32.mrb[164].mxu1 }
 0xe42   : > { %v3618_v48 = vadd.f32 %v6873_v59, %v3617_v45  ;;  %v7670_v4 = vpop.f32.mrb[165].mxu1 }
 0xe43   : > { %v3620_v11 = vpop.f32.mrb[166].mxu1 }
 0xe44   : > { %v9862_v60 = vadd.f32 %v3618_v48, %v9584_v21  ;;  %v3621_v25 = vadd.f32 %v6873_v59, %v3620_v11  ;;  %v7671_v29 = vpop.f32.mrb[167].mxu1 }
 0xe45   : > { %v8248_v29 = vld [vmem:[%s10888_s8 + $0x20] sm:$0xff]  }
 0xe46   : > { %v9865_v47 = vadd.f32 %v3621_v25, %v9587_v5  ;;  %v3662_v41 = vsel %vm925_vm1, %v9862_v60, 0.0  ;;  %v8247_v25 = vld [vmem:[%s10887_s7 + $0x20] sm:$0xff]   ;;  %7697 = vmatpush3.bf16.msra.mxu1 %v8248_v29 }
 0xe47   : > { %3663 = vadd.xlane.f32.xlu0 %v3662_v41  ;;  %7673 = vmatpush3.bf16.msra.mxu0 %v8247_v25 }
 0xe48   : > { %v3665_v36 = vsel %vm925_vm1, %v9865_v47, 0.0  ;;  %7674 = vmatprep.subr.bf16.mxu0 %v8556_v17  ;;  %7698 = vmatprep.subr.bf16.mxu1 %v8556_v17 }
 0xe49   : > { %3666 = vadd.xlane.f32.xlu1 %v3665_v36  ;;  %v8249_v36 = vld [vmem:[%s10887_s7 + $0x28] sm:$0xff]  }
 0xe4b   : > { %7675 = vmatpush3.bf16.msra.mxu0 %v8249_v36 }
 0xe4c   : > { %7720 = vmatprep.subr.bf16.mxu0 %v8556_v17 }
 0xeb4   : > { %v3640_v54 = vpop.xlane.xlu0 %3639 }
 0xeb5   : > { %v3668_v8 = vmul.f32 0.03125, %v3640_v54  ;;  %v8250_v54 = vld [vmem:[%s10888_s8 + $0x28] sm:$0xff]  }
 0xeb6   : > { %v3643_v38 = vpop.xlane.xlu1 %3642  ;;  %7699 = vmatpush3.bf16.msra.mxu1 %v8250_v54 }
 0xeb7   : > { %v9872_v26 = vsub.f32 %v9822_v39, %v3668_v8  ;;  %v3669_v21 = vmul.f32 0.03125, %v3643_v38  ;;  %7744 = vmatprep.subr.bf16.mxu1 %v8556_v17 }
 0xeb9   : > { %v9875_v49 = vsub.f32 %v9825_v23, %v3669_v21  ;;  %v3688_v5 = vmul.f32 %v9872_v26, %v9872_v26 }
 0xebb   : > { %v3698_v40 = vsel %vm925_vm1, %v3688_v5, 0.0  ;;  %v3689_v16 = vmul.f32 %v9875_v49, %v9875_v49 }
 0xebc   : > { %v3646_v18 = vpop.xlane.xlu0 %3645  ;;  %3699 = vadd.xlane.f32.xlu0 %v3698_v40 }
 0xebd   : > { %v3670_v30 = vmul.f32 0.03125, %v3646_v18  ;;  %v3701_v22 = vsel %vm925_vm1, %v3689_v16, 0.0 }
 0xebe   : > { %v3649_v59 = vpop.xlane.xlu1 %3648  ;;  %3702 = vadd.xlane.f32.xlu1 %v3701_v22 }
 0xebf   : > { %v9884_v37 = vsub.f32 %v9832_v31, %v3670_v30  ;;  %v3671_v2 = vmul.f32 0.03125, %v3649_v59 }
 0xec1   : > { %v9887_v14 = vsub.f32 %v9835_v0, %v3671_v2  ;;  %v3690_v52 = vmul.f32 %v9884_v37, %v9884_v37 }
 0xec3   : > { %v3704_v58 = vsel %vm925_vm1, %v3690_v52, 0.0  ;;  %v3691_v27 = vmul.f32 %v9887_v14, %v9887_v14 }
 0xec4   : > { %v3652_v10 = vpop.xlane.xlu0 %3651  ;;  %3705 = vadd.xlane.f32.xlu0 %v3704_v58 }
 0xec5   : > { %v3672_v19 = vmul.f32 0.03125, %v3652_v10  ;;  %v3707_v28 = vsel %vm925_vm1, %v3691_v27, 0.0  ;;  %v9950_v27 = vld [vmem:[%s10916_s30 + $0x1] ss:$0 sm:$0xff] }
 0xec6   : > { %v3655_v34 = vpop.xlane.xlu1 %3654  ;;  %3708 = vadd.xlane.f32.xlu1 %v3707_v28 }
 0xec7   : > { %v9896_v13 = vsub.f32 %v9842_v20, %v3672_v19  ;;  %v3673_v57 = vmul.f32 0.03125, %v3655_v34 }
 0xec9   : > { %v9899_v35 = vsub.f32 %v9845_v42, %v3673_v57  ;;  %v3692_v12 = vmul.f32 %v9896_v13, %v9896_v13 }
 0xecb   : > { %v3710_v44 = vsel %vm925_vm1, %v3692_v12, 0.0  ;;  %v3693_v15 = vmul.f32 %v9899_v35, %v9899_v35 }
 0xecc   : > { %v3658_v62 = vpop.xlane.xlu0 %3657  ;;  %3711 = vadd.xlane.f32.xlu0 %v3710_v44 }
 0xecd   : > { %v3674_v46 = vmul.f32 0.03125, %v3658_v62  ;;  %v3713_v61 = vsel %vm925_vm1, %v3693_v15, 0.0  ;;  %v9958_v15 = vld [vmem:[%s10886_s6 + $0x1] ss:$0 sm:$0xff] }
 0xece   : > { %v3661_v63 = vpop.xlane.xlu1 %3660  ;;  %3714 = vadd.xlane.f32.xlu1 %v3713_v61 }
 0xecf   : > { %v9908_v50 = vsub.f32 %v9852_v7, %v3674_v46  ;;  %v3675_v33 = vmul.f32 0.03125, %v3661_v63 }
 0xed1   : > { %v9911_v51 = vsub.f32 %v9855_v3, %v3675_v33  ;;  %v3694_v32 = vmul.f32 %v9908_v50, %v9908_v50 }
 0xed3   : > { %v3716_v24 = vsel %vm925_vm1, %v3694_v32, 0.0  ;;  %v3695_v9 = vmul.f32 %v9911_v51, %v9911_v51 }
 0xed4   : > { %3717 = vadd.xlane.f32.xlu0 %v3716_v24  ;;  %v3664_v56 = vpop.xlane.xlu0 %3663 }
 0xed5   : > { %v3676_v6 = vmul.f32 0.03125, %v3664_v56  ;;  %v3719_v53 = vsel %vm925_vm1, %v3695_v9, 0.0  ;;  %v8251_v56 = vld [vmem:[%s10889_s9 + $0x20] sm:$0xff]  }
 0xed6   : > { %3720 = vadd.xlane.f32.xlu1 %v3719_v53  ;;  %v3667_v55 = vpop.xlane.xlu1 %3666 }
 0xed7   : > { %v9920_v43 = vsub.f32 %v9862_v60, %v3676_v6  ;;  %v3677_v1 = vmul.f32 0.03125, %v3667_v55 }
 0xed9   : > { %v9923_v45 = vsub.f32 %v9865_v47, %v3677_v1  ;;  %v3696_v48 = vmul.f32 %v9920_v43, %v9920_v43 }
 0xedb   : > { %v3722_v4 = vsel %vm925_vm1, %v3696_v48, 0.0  ;;  %v3697_v11 = vmul.f32 %v9923_v45, %v9923_v45 }
 0xedc   : > { %3723 = vadd.xlane.f32.xlu0 %v3722_v4 }
 0xedd   : > { %v3725_v41 = vsel %vm925_vm1, %v3697_v11, 0.0 }
 0xede   : > { %3726 = vadd.xlane.f32.xlu1 %v3725_v41 }
 0xf49   : > { %v3700_v8 = vpop.xlane.xlu0 %3699 }
 0xf4a   : > { %v3728_v38 = vmul.f32 0.03125, %v3700_v8 }
 0xf4b   : > { %v3703_v21 = vpop.xlane.xlu1 %3702 }
 0xf4c   : > { %v3738_v5 = vadd.f32 1e-06, %v3728_v38  ;;  %v3729_v40 = vmul.f32 0.03125, %v3703_v21 }
 0xf4e   : > { %8407 = vrsqrt.f32 %v3738_v5  ;;  %v3739_v16 = vadd.f32 1e-06, %v3729_v40 }
 0xf50   : > { %8409 = vrsqrt.f32 %v3739_v16 }
 0xf51   : > { %v3706_v18 = vpop.xlane.xlu0 %3705 }
 0xf52   : > { %v3730_v30 = vmul.f32 0.03125, %v3706_v18 }
 0xf53   : > { %v3709_v22 = vpop.xlane.xlu1 %3708 }
 0xf54   : > { %v3740_v59 = vadd.f32 1e-06, %v3730_v30  ;;  %v3731_v2 = vmul.f32 0.03125, %v3709_v22 }
 0xf56   : > { %8411 = vrsqrt.f32 %v3740_v59  ;;  %v3741_v52 = vadd.f32 1e-06, %v3731_v2 }
 0xf58   : > { %v8408_v58 = vpop.eup %8407  ;;  %8413 = vrsqrt.f32 %v3741_v52 }
 0xf59   : > { %v3758_v10 = vmul.f32 %v8408_v58, %v9872_v26  ;;  %v3712_v19 = vpop.xlane.xlu0 %3711 }
 0xf5a   : > { %v8410_v28 = vpop.eup %8409  ;;  %v3732_v34 = vmul.f32 0.03125, %v3712_v19 }
 0xf5b   : > { %v3774_v57 = vmul.f32 %v9950_v27, %v3758_v10  ;;  %v3759_v12 = vmul.f32 %v8410_v28, %v9875_v49  ;;  %v3715_v44 = vpop.xlane.xlu1 %3714 }
 0xf5c   : > { %v3742_v62 = vadd.f32 1e-06, %v3732_v34  ;;  %v3733_v46 = vmul.f32 0.03125, %v3715_v44 }
 0xf5d   : > { %v3775_v61 = vmul.f32 %v9950_v27, %v3759_v12  ;;  %v3790_v26 = vadd.f32 %v9958_v15, %v3774_v57 }
 0xf5e   : > { %8415 = vrsqrt.f32 %v3742_v62  ;;  %v3743_v63 = vadd.f32 1e-06, %v3733_v46 }
 0xf5f   : > { %v3791_v33 = vadd.f32 %v9958_v15, %v3775_v61 }
 0xf60   : > { %v8412_v32 = vpop.eup %8411  ;;  %8417 = vrsqrt.f32 %v3743_v63 }
 0xf61   : > { %v3760_v49 = vmul.f32 %v8412_v32, %v9884_v37  ;;  %v3718_v24 = vpop.xlane.xlu0 %3717  ;;  %v9964_v9 = vpack.c.bf16 %v3791_v33, %v3790_v26 }
 0xf62   : > { %v8414_v6 = vpop.eup %8413  ;;  %v3734_v53 = vmul.f32 0.03125, %v3718_v24 }
 0xf63   : > { %v3776_v55 = vmul.f32 %v9950_v27, %v3760_v49  ;;  %v3761_v1 = vmul.f32 %v8414_v6, %v9887_v14  ;;  %7677 = vmatmul.mubr.msk.bf16.vlgmr.msra.gmra.mrb[132].mxu0 %vm925_vm1, %v9964_v9  ;;  %7701 = vmatmul.mubr.msk.bf16.vlgmr.msra.gmra.mrb[168].mxu1 %vm925_vm1, %v9964_v9  ;;  %v3721_v37 = vpop.xlane.xlu1 %3720  ;;  %v8252_v14 = vld [vmem:[%s10889_s9 + $0x28] sm:$0xff]  }
 0xf64   : > { %v3744_v48 = vadd.f32 1e-06, %v3734_v53  ;;  %v3735_v4 = vmul.f32 0.03125, %v3721_v37  ;;  %7680 = vmatprep.mubr.msk.bf16.mxu0 %vm8557_vm2, %v8556_v17  ;;  %7704 = vmatprep.mubr.msk.bf16.mxu1 %vm8557_vm2, %v8556_v17 }
 0xf65   : > { %v3777_v11 = vmul.f32 %v9950_v27, %v3761_v1  ;;  %7721 = vmatpush3.bf16.msra.mxu0 %v8251_v56  ;;  %v3792_v29 = vadd.f32 %v9958_v15, %v3776_v55 }
 0xf66   : > { %8419 = vrsqrt.f32 %v3744_v48  ;;  %v3745_v25 = vadd.f32 1e-06, %v3735_v4  ;;  %7722 = vmatprep.subr.bf16.mxu0 %v8556_v17 }
 0xf67   : > { %v3793_v41 = vadd.f32 %v9958_v15, %v3777_v11 }
 0xf68   : > { %v8416_v36 = vpop.eup %8415  ;;  %8421 = vrsqrt.f32 %v3745_v25 }
 0xf69   : > { %v3762_v54 = vmul.f32 %v8416_v36, %v9896_v13  ;;  %v3724_v8 = vpop.xlane.xlu0 %3723  ;;  %v9987_v38 = vpack.c.bf16 %v3793_v41, %v3792_v29  ;;  %7723 = vmatpush3.bf16.msra.mxu0 %v8252_v14 }
 0xf6a   : > { %v8418_v21 = vpop.eup %8417  ;;  %v3736_v5 = vmul.f32 0.03125, %v3724_v8  ;;  %7750 = vmatprep.subr.bf16.mxu0 %v8556_v17 }
 0xf6b   : > { %v3778_v40 = vmul.f32 %v9950_v27, %v3762_v54  ;;  %v3763_v16 = vmul.f32 %v8418_v21, %v9899_v35  ;;  %7681 = vmatmul.mubr.msk.bf16.gmra.mrb[136].mxu0 %vm925_vm1, %v9987_v38  ;;  %7705 = vmatmul.mubr.msk.bf16.gmra.mrb[172].mxu1 %vm925_vm1, %v9987_v38  ;;  %v3727_v18 = vpop.xlane.xlu1 %3726 }
 0xf6c   : > { %v3746_v13 = vadd.f32 1e-06, %v3736_v5  ;;  %v3737_v30 = vmul.f32 0.03125, %v3727_v18  ;;  %7684 = vmatprep.mubr.msk.bf16.mxu0 %vm8557_vm2, %v8556_v17  ;;  %7708 = vmatprep.mubr.msk.bf16.mxu1 %vm8557_vm2, %v8556_v17 }
 0xf6d   : > { %v3779_v22 = vmul.f32 %v9950_v27, %v3763_v16  ;;  %v3794_v35 = vadd.f32 %v9958_v15, %v3778_v40 }
 0xf6e   : > { %8423 = vrsqrt.f32 %v3746_v13  ;;  %v3747_v59 = vadd.f32 1e-06, %v3737_v30 }
 0xf6f   : > { %v3795_v2 = vadd.f32 %v9958_v15, %v3779_v22 }
 0xf70   : > { %v8420_v52 = vpop.eup %8419  ;;  %8425 = vrsqrt.f32 %v3747_v59 }
 0xf71   : > { %v3764_v58 = vmul.f32 %v8420_v52, %v9908_v50  ;;  %v10004_v10 = vpack.c.bf16 %v3795_v2, %v3794_v35 }
 0xf72   : > { %v8422_v19 = vpop.eup %8421 }
 0xf73   : > { %v3780_v28 = vmul.f32 %v9950_v27, %v3764_v58  ;;  %v3765_v34 = vmul.f32 %v8422_v19, %v9911_v51  ;;  %7685 = vmatmul.mubr.msk.bf16.gmra.mrb[140].mxu0 %vm925_vm1, %v10004_v10  ;;  %7709 = vmatmul.mubr.msk.bf16.gmra.mrb[176].mxu1 %vm925_vm1, %v10004_v10 }
 0xf74   : > { %7688 = vmatprep.mubr.msk.bf16.mxu0 %vm8557_vm2, %v8556_v17  ;;  %7712 = vmatprep.mubr.msk.bf16.mxu1 %vm8557_vm2, %v8556_v17 }
 0xf75   : > { %v3781_v50 = vmul.f32 %v9950_v27, %v3765_v34  ;;  %v3796_v57 = vadd.f32 %v9958_v15, %v3780_v28 }
 0xf77   : > { %v3797_v12 = vadd.f32 %v9958_v15, %v3781_v50 }
 0xf78   : > { %v8424_v44 = vpop.eup %8423 }
 0xf79   : > { %v3766_v51 = vmul.f32 %v8424_v44, %v9920_v43  ;;  %v10020_v62 = vpack.c.bf16 %v3797_v12, %v3796_v57 }
 0xf7a   : > { %v8426_v46 = vpop.eup %8425 }
 0xf7b   : > { %v3782_v61 = vmul.f32 %v9950_v27, %v3766_v51  ;;  %v3767_v63 = vmul.f32 %v8426_v46, %v9923_v45  ;;  %7689 = vmatmul.mubr.msk.bf16.gmra.mrb[144].mxu0 %vm925_vm1, %v10020_v62  ;;  %7713 = vmatmul.mubr.msk.bf16.gmra.mrb[180].mxu1 %vm925_vm1, %v10020_v62  ;;  %v10068_v45 = vld [vmem:[%s10890_s10 + $0x2] ss:$0 sm:$0xff] }
 0xf7c   : > { %7692 = vmatprep.mubr.msk.bf16.mxu0 %vm8557_vm2, %v8556_v17  ;;  %7716 = vmatprep.mubr.msk.bf16.mxu1 %vm8557_vm2, %v8556_v17 }
 0xf7d   : > { %v3783_v43 = vmul.f32 %v9950_v27, %v3767_v63  ;;  %v3798_v26 = vadd.f32 %v9958_v15, %v3782_v61 }
 0xf7f   : > { %v3799_v33 = vadd.f32 %v9958_v15, %v3783_v43  ;;  %v10073_v15 = vld [vmem:[%s10891_s11 + $0x2] ss:$0 sm:$0xff] }
 0xf81   : > { %v10035_v32 = vpack.c.bf16 %v3799_v33, %v3798_v26 }
 0xf83   : > { %7693 = vmatmul.mubr.msk.bf16.gmra.mrb[148].mxu0 %vm925_vm1, %v10035_v32  ;;  %7717 = vmatmul.mubr.msk.bf16.gmra.mrb[184].mxu1 %vm925_vm1, %v10035_v32 }
 0xf84   : > { %7724 = vmatprep.mubr.msk.bf16.mxu0 %vm8557_vm2, %v8556_v17  ;;  %7746 = vmatprep.mubr.msk.bf16.mxu1 %vm8557_vm2, %v8556_v17 }
 0xf8b   : > { %7725 = vmatmul.mubr.msk.bf16.vlgmr.msra.gmra.mrb[152].mxu0 %vm925_vm1, %v9964_v9 }
 0xf8c   : > { %7728 = vmatprep.mubr.msk.bf16.mxu0 %vm8557_vm2, %v8556_v17 }
 0xf93   : > { %7729 = vmatmul.mubr.msk.bf16.gmra.mrb[156].mxu0 %vm925_vm1, %v9987_v38 }
 0xf94   : > { %7732 = vmatprep.mubr.msk.bf16.mxu0 %vm8557_vm2, %v8556_v17 }
 0xf9b   : > { %7733 = vmatmul.mubr.msk.bf16.gmra.mrb[160].mxu0 %vm925_vm1, %v10004_v10 }
 0xf9c   : > { %7736 = vmatprep.mubr.msk.bf16.mxu0 %vm8557_vm2, %v8556_v17 }
 0xfa3   : > { %7737 = vmatmul.mubr.msk.bf16.gmra.mrb[164].mxu0 %vm925_vm1, %v10020_v62 }
 0xfa4   : > { %7740 = vmatprep.mubr.msk.bf16.mxu0 %vm8557_vm2, %v8556_v17 }
 0xfab   : > { %7741 = vmatmul.mubr.msk.bf16.gmra.mrb[168].mxu0 %vm925_vm1, %v10035_v32 }
 0xfac   : > { %7752 = vmatprep.mubr.msk.bf16.mxu0 %vm8557_vm2, %v8556_v17 }
0x1036   : > { %v3881_v27 = vpop.f32.mrb[132].mxu0  ;;  %v3979_v49 = vpop.f32.mrb[168].mxu1 }
0x1037   : > { %v7678_v24 = vpop.f32.mrb[133].mxu0  ;;  %v7702_v56 = vpop.f32.mrb[169].mxu1  ;;  %v3882_v55 = vadd.f32 %v10068_v45, %v3881_v27  ;;  %v3980_v1 = vadd.f32 %v10073_v15, %v3979_v49 }
0x1038   : > { %v3884_v6 = vpop.f32.mrb[134].mxu0  ;;  %v3982_v53 = vpop.f32.mrb[170].mxu1 }
0x1039   : > { %v3885_v37 = vadd.f32 %v10068_v45, %v3884_v6  ;;  %v3983_v48 = vadd.f32 %v10073_v15, %v3982_v53  ;;  %v7679_v4 = vpop.f32.mrb[135].mxu0  ;;  %v7703_v11 = vpop.f32.mrb[171].mxu1 }
0x103b   : > { %v4116_v14 = vpack.c.bf16 %v3885_v37, %v3882_v55  ;;  %v4121_v25 = vpack.c.bf16 %v3983_v48, %v3980_v1 }
0x103d   : > { %v4130_v29 = vsel %vm1408_vm3, %v4121_v25, 0 }
0x103e   : > { %v3889_v41 = vpop.f32.mrb[136].mxu0  ;;  %v3987_v36 = vpop.f32.mrb[172].mxu1  ;;  %7745 = vmatpush3.bf16.xpose.msra.mxu1 %v4130_v29 }
0x103f   : > { %v7682_v54 = vpop.f32.mrb[137].mxu0  ;;  %v7706_v8 = vpop.f32.mrb[173].mxu1  ;;  %7756 = vmatprep.subr.bf16.mxu1 %v8556_v17  ;;  %v3890_v40 = vadd.f32 %v10068_v45, %v3889_v41  ;;  %v3988_v16 = vadd.f32 %v10073_v15, %v3987_v36 }
0x1040   : > { %v3892_v21 = vpop.f32.mrb[138].mxu0  ;;  %v3990_v5 = vpop.f32.mrb[174].mxu1 }
0x1041   : > { %v3893_v18 = vadd.f32 %v10068_v45, %v3892_v21  ;;  %v3991_v13 = vadd.f32 %v10073_v15, %v3990_v5  ;;  %v7683_v30 = vpop.f32.mrb[139].mxu0  ;;  %v7707_v22 = vpop.f32.mrb[175].mxu1 }
0x1043   : > { %v4117_v59 = vpack.c.bf16 %v3893_v18, %v3890_v40  ;;  %v4122_v35 = vpack.c.bf16 %v3991_v13, %v3988_v16 }
0x1045   : > { %7747 = vmatmul.mubr.msk.bf16.vlgmr.msra.gmra.mrb[188].mxu1 %vm1408_vm3, %v4116_v14  ;;  %v4177_v2 = vsel %vm1408_vm3, %v4122_v35, 0 }
0x1046   : > { %v3897_v52 = vpop.f32.mrb[140].mxu0  ;;  %v3995_v58 = vpop.f32.mrb[176].mxu1  ;;  %7751 = vmatpush3.bf16.xpose.msra.mxu0 %v4177_v2  ;;  %7758 = vmatprep.mubr.msk.bf16.mxu1 %vm8557_vm2, %v8556_v17  ;;  %v6919_v2 = vld [vmem:[%s10892_s12 + $0x2] ss:$0 sm:$0xff] }
0x1047   : > { %v7686_v19 = vpop.f32.mrb[141].mxu0  ;;  %v7710_v28 = vpop.f32.mrb[177].mxu1  ;;  %7762 = vmatprep.subr.bf16.mxu0 %v8556_v17  ;;  %v3898_v57 = vadd.f32 %v10068_v45, %v3897_v52  ;;  %v3996_v12 = vadd.f32 %v10073_v15, %v3995_v58 }
0x1048   : > { %v3900_v34 = vpop.f32.mrb[142].mxu0  ;;  %v3998_v50 = vpop.f32.mrb[178].mxu1 }
0x1049   : > { %v3901_v44 = vadd.f32 %v10068_v45, %v3900_v34  ;;  %v3999_v51 = vadd.f32 %v10073_v15, %v3998_v50  ;;  %v7687_v46 = vpop.f32.mrb[143].mxu0  ;;  %v7711_v61 = vpop.f32.mrb[179].mxu1 }
0x104b   : > { %v4118_v63 = vpack.c.bf16 %v3901_v44, %v3898_v57  ;;  %v4123_v43 = vpack.c.bf16 %v3999_v51, %v3996_v12 }
0x104d   : > { %7753 = vmatmul.mubr.msk.bf16.vlgmr.msra.gmra.mrb[172].mxu0 %vm1408_vm3, %v4117_v59  ;;  %v4224_v26 = vsel %vm1408_vm3, %v4123_v43, 0 }
0x104e   : > { %v3905_v33 = vpop.f32.mrb[144].mxu0  ;;  %v4003_v27 = vpop.f32.mrb[180].mxu1  ;;  %7757 = vmatpush3.bf16.xpose.msra.mxu1 %v4224_v26  ;;  %7764 = vmatprep.mubr.msk.bf16.mxu0 %vm8557_vm2, %v8556_v17 }
0x104f   : > { %v7690_v49 = vpop.f32.mrb[145].mxu0  ;;  %v7714_v24 = vpop.f32.mrb[181].mxu1  ;;  %7768 = vmatprep.subr.bf16.mxu1 %v8556_v17  ;;  %v3906_v53 = vadd.f32 %v10068_v45, %v3905_v33  ;;  %v4004_v55 = vadd.f32 %v10073_v15, %v4003_v27 }
0x1050   : > { %v3908_v56 = vpop.f32.mrb[146].mxu0  ;;  %v4006_v6 = vpop.f32.mrb[182].mxu1 }
0x1051   : > { %v3909_v1 = vadd.f32 %v10068_v45, %v3908_v56  ;;  %v4007_v37 = vadd.f32 %v10073_v15, %v4006_v6  ;;  %v7691_v48 = vpop.f32.mrb[147].mxu0  ;;  %v7715_v4 = vpop.f32.mrb[183].mxu1 }
0x1053   : > { %v4119_v11 = vpack.c.bf16 %v3909_v1, %v3906_v53  ;;  %v4124_v14 = vpack.c.bf16 %v4007_v37, %v4004_v55 }
0x1055   : > { %7759 = vmatmul.mubr.msk.bf16.vlgmr.msra.gmra.mrb[192].mxu1 %vm1408_vm3, %v4118_v63  ;;  %v4271_v25 = vsel %vm1408_vm3, %v4124_v14, 0 }
0x1056   : > { %v3913_v29 = vpop.f32.mrb[148].mxu0  ;;  %v4011_v41 = vpop.f32.mrb[184].mxu1  ;;  %7763 = vmatpush3.bf16.xpose.msra.mxu0 %v4271_v25  ;;  %7770 = vmatprep.mubr.msk.bf16.mxu1 %vm8557_vm2, %v8556_v17 }
0x1057   : > { %v7694_v36 = vpop.f32.mrb[149].mxu0  ;;  %v7718_v54 = vpop.f32.mrb[185].mxu1  ;;  %7774 = vmatprep.subr.bf16.mxu0 %v8556_v17  ;;  %v3914_v5 = vadd.f32 %v10068_v45, %v3913_v29  ;;  %v4012_v40 = vadd.f32 %v10073_v15, %v4011_v41 }
0x1058   : > { %v3916_v8 = vpop.f32.mrb[150].mxu0  ;;  %v4014_v21 = vpop.f32.mrb[186].mxu1 }
0x1059   : > { %v3917_v16 = vadd.f32 %v10068_v45, %v3916_v8  ;;  %v4015_v18 = vadd.f32 %v10073_v15, %v4014_v21  ;;  %v7695_v13 = vpop.f32.mrb[151].mxu0  ;;  %v7719_v30 = vpop.f32.mrb[187].mxu1 }
0x105b   : > { %v4120_v22 = vpack.c.bf16 %v3917_v16, %v3914_v5  ;;  %v4125_v59 = vpack.c.bf16 %v4015_v18, %v4012_v40 }
0x105d   : > { %7765 = vmatmul.mubr.msk.bf16.vlgmr.msra.gmra.mrb[176].mxu0 %vm1408_vm3, %v4119_v11  ;;  %v4318_v35 = vsel %vm1408_vm3, %v4125_v59, 0 }
0x105e   : > { %v4077_v52 = vpop.f32.mrb[152].mxu0  ;;  %7769 = vmatpush3.bf16.xpose.msra.mxu1 %v4318_v35  ;;  %7776 = vmatprep.mubr.msk.bf16.mxu0 %vm8557_vm2, %v8556_v17 }
0x105f   : > { %v7726_v45 = vpop.f32.mrb[153].mxu0  ;;  %7780 = vmatprep.subr.bf16.mxu1 %v8556_v17  ;;  %v4078_v58 = vadd.f32 %v6919_v2, %v4077_v52 }
0x1060   : > { %v4080_v15 = vpop.f32.mrb[154].mxu0 }
0x1061   : > { %v4081_v19 = vadd.f32 %v6919_v2, %v4080_v15  ;;  %v7727_v28 = vpop.f32.mrb[155].mxu0 }
0x1063   : > { %v4486_v34 = vpack.c.bf16 %v4081_v19, %v4078_v58 }
0x1065   : > { %7771 = vmatmul.mubr.msk.bf16.vlgmr.msra.gmra.mrb[196].mxu1 %vm1408_vm3, %v4120_v22  ;;  %7775 = vmatpush3.bf16.msra.mxu0 %v4486_v34 }
0x1066   : > { %v4085_v50 = vpop.f32.mrb[156].mxu0  ;;  %7786 = vmatprep.subr.bf16.mxu0 %v8556_v17  ;;  %7782 = vmatprep.mubr.msk.bf16.mxu1 %vm8557_vm2, %v8556_v17 }
0x1067   : > { %v7730_v57 = vpop.f32.mrb[157].mxu0  ;;  %v4086_v44 = vadd.f32 %v6919_v2, %v4085_v50 }
0x1068   : > { %v4088_v12 = vpop.f32.mrb[158].mxu0 }
0x1069   : > { %v4089_v51 = vadd.f32 %v6919_v2, %v4088_v12  ;;  %v7731_v46 = vpop.f32.mrb[159].mxu0 }
0x106b   : > { %v4487_v61 = vpack.c.bf16 %v4089_v51, %v4086_v44 }
0x106d   : > { %7781 = vmatpush3.bf16.msra.mxu1 %v4487_v61 }
0x106e   : > { %v4093_v63 = vpop.f32.mrb[160].mxu0  ;;  %7792 = vmatprep.subr.bf16.mxu1 %v8556_v17 }
0x106f   : > { %v10125_v43 = vadd.f32 %v6919_v2, %v4093_v63  ;;  %v7734_v26 = vpop.f32.mrb[161].mxu0 }
0x1070   : > { %v4096_v33 = vpop.f32.mrb[162].mxu0 }
0x1071   : > { %v10127_v27 = vadd.f32 %v6919_v2, %v4096_v33  ;;  %v7735_v49 = vpop.f32.mrb[163].mxu0 }
0x1073   : > { %v4488_v24 = vpack.c.bf16 %v10127_v27, %v10125_v43 }
0x1076   : > { %v4101_v56 = vpop.f32.mrb[164].mxu0 }
0x1077   : > { %v10131_v6 = vadd.f32 %v6919_v2, %v4101_v56  ;;  %v7738_v53 = vpop.f32.mrb[165].mxu0 }
0x1078   : > { %v4104_v55 = vpop.f32.mrb[166].mxu0 }
0x1079   : > { %v10133_v1 = vadd.f32 %v6919_v2, %v4104_v55  ;;  %v7739_v37 = vpop.f32.mrb[167].mxu0 }
0x107b   : > { %v4489_v48 = vpack.c.bf16 %v10133_v1, %v10131_v6 }
0x107e   : > { %v4109_v4 = vpop.f32.mrb[168].mxu0 }
0x107f   : > { %v10137_v11 = vadd.f32 %v6919_v2, %v4109_v4  ;;  %v7742_v14 = vpop.f32.mrb[169].mxu0 }
0x1080   : > { %v4112_v25 = vpop.f32.mrb[170].mxu0 }
0x1081   : > { %v10139_v29 = vadd.f32 %v6919_v2, %v4112_v25  ;;  %v7743_v41 = vpop.f32.mrb[171].mxu0 }
0x1083   : > { %v4490_v36 = vpack.c.bf16 %v10139_v29, %v10137_v11  ;;  %v8253_v29 = vld [vmem:[%s10887_s7 + $0x30] sm:$0xff]  }
0x1118   : > { %v4166_v54 = vpop.f32.mrb[188].mxu1 }
0x1119   : > { %v4361_v8 = vmul.f32 0.25, %v4166_v54  ;;  %v7748_v21 = vpop.f32.mrb[189].mxu1 }
0x111a   : > { %v4169_v5 = vpop.f32.mrb[190].mxu1 }
0x111b   : > { %v4362_v40 = vmul.f32 0.25, %v4169_v5  ;;  %v7749_v16 = vpop.f32.mrb[191].mxu1  ;;  %v4371_v18 = vsel %vm1408_vm3, %v4361_v8, -inf }
0x111c   : > { %4372 = vmax.xlane.f32.xlu0 %v4371_v18 }
0x111d   : > { %v4374_v13 = vsel %vm1408_vm3, %v4362_v40, -inf }
0x111e   : > { %4375 = vmax.xlane.f32.xlu1 %v4374_v13 }
0x1120   : > { %v4213_v30 = vpop.f32.mrb[172].mxu0 }
0x1121   : > { %v4363_v22 = vmul.f32 0.25, %v4213_v30  ;;  %v7754_v59 = vpop.f32.mrb[173].mxu0 }
0x1122   : > { %v4216_v35 = vpop.f32.mrb[174].mxu0 }
0x1123   : > { %v4364_v2 = vmul.f32 0.25, %v4216_v35  ;;  %v7755_v52 = vpop.f32.mrb[175].mxu0  ;;  %v4377_v45 = vsel %vm1408_vm3, %v4363_v22, -inf }
0x1124   : > { %4378 = vmax.xlane.f32.xlu0 %v4377_v45 }
0x1125   : > { %v4380_v15 = vsel %vm1408_vm3, %v4364_v2, -inf }
0x1126   : > { %4381 = vmax.xlane.f32.xlu1 %v4380_v15 }
0x1128   : > { %v4260_v58 = vpop.f32.mrb[192].mxu1 }
0x1129   : > { %v4365_v19 = vmul.f32 0.25, %v4260_v58  ;;  %v7760_v28 = vpop.f32.mrb[193].mxu1 }
0x112a   : > { %v4263_v34 = vpop.f32.mrb[194].mxu1 }
0x112b   : > { %v4366_v50 = vmul.f32 0.25, %v4263_v34  ;;  %v7761_v57 = vpop.f32.mrb[195].mxu1  ;;  %v4383_v12 = vsel %vm1408_vm3, %v4365_v19, -inf }
0x112c   : > { %4384 = vmax.xlane.f32.xlu0 %v4383_v12 }
0x112d   : > { %v4386_v44 = vsel %vm1408_vm3, %v4366_v50, -inf }
0x112e   : > { %4387 = vmax.xlane.f32.xlu1 %v4386_v44 }
0x1130   : > { %v4307_v51 = vpop.f32.mrb[176].mxu0 }
0x1131   : > { %v4367_v46 = vmul.f32 0.25, %v4307_v51  ;;  %v7766_v61 = vpop.f32.mrb[177].mxu0 }
0x1132   : > { %v4310_v63 = vpop.f32.mrb[178].mxu0 }
0x1133   : > { %v4368_v26 = vmul.f32 0.25, %v4310_v63  ;;  %v7767_v33 = vpop.f32.mrb[179].mxu0  ;;  %v4389_v49 = vsel %vm1408_vm3, %v4367_v46, -inf }
0x1134   : > { %4390 = vmax.xlane.f32.xlu0 %v4389_v49 }
0x1135   : > { %v4392_v56 = vsel %vm1408_vm3, %v4368_v26, -inf }
0x1136   : > { %4393 = vmax.xlane.f32.xlu1 %v4392_v56 }
0x1138   : > { %v4354_v53 = vpop.f32.mrb[196].mxu1 }
0x1139   : > { %v4369_v55 = vmul.f32 0.25, %v4354_v53  ;;  %v7772_v37 = vpop.f32.mrb[197].mxu1 }
0x113a   : > { %v4357_v4 = vpop.f32.mrb[198].mxu1 }
0x113b   : > { %v4370_v14 = vmul.f32 0.25, %v4357_v4  ;;  %v7773_v25 = vpop.f32.mrb[199].mxu1  ;;  %v4395_v41 = vsel %vm1408_vm3, %v4369_v55, -inf }
0x113c   : > { %4396 = vmax.xlane.f32.xlu0 %v4395_v41 }
0x113d   : > { %v4398_v54 = vsel %vm1408_vm3, %v4370_v14, -inf }
0x113e   : > { %4399 = vmax.xlane.f32.xlu1 %v4398_v54 }
0x11a9   : > { %v4373_v21 = vpop.xlane.xlu0 %4372 }
0x11aa   : > { %v4401_v5 = vsub.f32 %v4361_v8, %v4373_v21 }
0x11ab   : > { %v4376_v16 = vpop.xlane.xlu1 %4375 }
0x11ac   : > { %v4411_v18 = vmul.f32 1.442695, %v4401_v5  ;;  %v4402_v13 = vsub.f32 %v4362_v40, %v4376_v16 }
0x11ae   : > { %8427 = vpow2.f32 %v4411_v18  ;;  %v4413_v30 = vmul.f32 1.442695, %v4402_v13 }
0x11b0   : > { %8429 = vpow2.f32 %v4413_v30 }
0x11b1   : > { %v4379_v59 = vpop.xlane.xlu0 %4378 }
0x11b2   : > { %v4403_v35 = vsub.f32 %v4363_v22, %v4379_v59 }
0x11b3   : > { %v4382_v52 = vpop.xlane.xlu1 %4381 }
0x11b4   : > { %v4415_v45 = vmul.f32 1.442695, %v4403_v35  ;;  %v4404_v15 = vsub.f32 %v4364_v2, %v4382_v52 }
0x11b6   : > { %8431 = vpow2.f32 %v4415_v45  ;;  %v4417_v58 = vmul.f32 1.442695, %v4404_v15 }
0x11b8   : > { %v10153_v28 = vpop.eup %8427  ;;  %8433 = vpow2.f32 %v4417_v58 }
0x11b9   : > { %v4385_v34 = vpop.xlane.xlu0 %4384  ;;  %v4431_v8 = vsel %vm1408_vm3, %v10153_v28, 0.0 }
0x11ba   : > { %v8430_v57 = vpop.eup %8429  ;;  %v4405_v12 = vsub.f32 %v4365_v19, %v4385_v34  ;;  %4432 = vadd.xlane.f32.xlu0 %v4431_v8 }
0x11bb   : > { %v4388_v40 = vpop.xlane.xlu1 %4387  ;;  %v4434_v44 = vsel %vm1408_vm3, %v8430_v57, 0.0 }
0x11bc   : > { %v4419_v51 = vmul.f32 1.442695, %v4405_v12  ;;  %v4406_v22 = vsub.f32 %v4366_v50, %v4388_v40  ;;  %4435 = vadd.xlane.f32.xlu1 %v4434_v44 }
0x11be   : > { %8435 = vpow2.f32 %v4419_v51  ;;  %v4421_v2 = vmul.f32 1.442695, %v4406_v22 }
0x11c0   : > { %v10158_v61 = vpop.eup %8431  ;;  %8437 = vpow2.f32 %v4421_v2 }
0x11c1   : > { %v4391_v63 = vpop.xlane.xlu0 %4390  ;;  %v4437_v33 = vsel %vm1408_vm3, %v10158_v61, 0.0 }
0x11c2   : > { %v8434_v49 = vpop.eup %8433  ;;  %v4407_v56 = vsub.f32 %v4367_v46, %v4391_v63  ;;  %4438 = vadd.xlane.f32.xlu0 %v4437_v33 }
0x11c3   : > { %v4394_v19 = vpop.xlane.xlu1 %4393  ;;  %v4440_v53 = vsel %vm1408_vm3, %v8434_v49, 0.0 }
0x11c4   : > { %v4423_v37 = vmul.f32 1.442695, %v4407_v56  ;;  %v4408_v4 = vsub.f32 %v4368_v26, %v4394_v19  ;;  %4441 = vadd.xlane.f32.xlu1 %v4440_v53 }
0x11c6   : > { %8439 = vpow2.f32 %v4423_v37  ;;  %v4425_v50 = vmul.f32 1.442695, %v4408_v4 }
0x11c8   : > { %v10163_v25 = vpop.eup %8435  ;;  %8441 = vpow2.f32 %v4425_v50 }
0x11c9   : > { %v4397_v41 = vpop.xlane.xlu0 %4396  ;;  %v4443_v54 = vsel %vm1408_vm3, %v10163_v25, 0.0 }
0x11ca   : > { %v8438_v21 = vpop.eup %8437  ;;  %v4409_v5 = vsub.f32 %v4369_v55, %v4397_v41  ;;  %4444 = vadd.xlane.f32.xlu0 %v4443_v54 }
0x11cb   : > { %v4400_v46 = vpop.xlane.xlu1 %4399  ;;  %v4446_v16 = vsel %vm1408_vm3, %v8438_v21, 0.0 }
0x11cc   : > { %v4427_v18 = vmul.f32 1.442695, %v4409_v5  ;;  %v4410_v13 = vsub.f32 %v4370_v14, %v4400_v46  ;;  %4447 = vadd.xlane.f32.xlu1 %v4446_v16  ;;  %v8254_v16 = vld [vmem:[%s10887_s7 + $0x38] sm:$0xff]  }
0x11ce   : > { %8443 = vpow2.f32 %v4427_v18  ;;  %v4429_v26 = vmul.f32 1.442695, %v4410_v13  ;;  %v8255_v18 = vld [vmem:[%s10889_s9 + $0x30] sm:$0xff]   ;;  %v8256_v13 = vld [vmem:[%s10889_s9 + $0x38] sm:$0xff]  }
0x11d0   : > { %v8440_v30 = vpop.eup %8439  ;;  %8445 = vpow2.f32 %v4429_v26  ;;  %v8257_v26 = vld [vmem:[%s10893_s13 + $0x10] sm:$0xff]  }
0x11d1   : > { %v4449_v59 = vsel %vm1408_vm3, %v8440_v30, 0.0 }
0x11d2   : > { %v8442_v35 = vpop.eup %8441  ;;  %4450 = vadd.xlane.f32.xlu0 %v4449_v59 }
0x11d3   : > { %v4452_v52 = vsel %vm1408_vm3, %v8442_v35, 0.0 }
0x11d4   : > { %4453 = vadd.xlane.f32.xlu1 %v4452_v52  ;;  %v8258_v52 = vld [vmem:[%s10888_s8 + $0x30] sm:$0xff]  }
0x11d8   : > { %v8444_v45 = vpop.eup %8443 }
0x11d9   : > { %v4455_v55 = vsel %vm1408_vm3, %v8444_v45, 0.0 }
0x11da   : > { %v8446_v15 = vpop.eup %8445  ;;  %4456 = vadd.xlane.f32.xlu0 %v4455_v55 }
0x11db   : > { %v4458_v58 = vsel %vm1408_vm3, %v8446_v15, 0.0 }
0x11dc   : > { %4459 = vadd.xlane.f32.xlu1 %v4458_v58 }
0x1247   : > { %v4433_v14 = vpop.xlane.xlu0 %4432 }
0x1248   : > { %8447 = vrcp.f32 %v4433_v14 }
0x1249   : > { %v4436_v34 = vpop.xlane.xlu1 %4435 }
0x124a   : > { %8449 = vrcp.f32 %v4436_v34 }
0x124f   : > { %v4439_v8 = vpop.xlane.xlu0 %4438 }
0x1250   : > { %8451 = vrcp.f32 %v4439_v8 }
0x1251   : > { %v4442_v12 = vpop.xlane.xlu1 %4441 }
0x1252   : > { %v8448_v40 = vpop.eup %8447  ;;  %8453 = vrcp.f32 %v4442_v12 }
0x1253   : > { %v4471_v51 = vmul.f32 %v8448_v40, %v10153_v28 }
0x1254   : > { %v8450_v44 = vpop.eup %8449 }
0x1255   : > { %v4472_v22 = vmul.f32 %v8450_v44, %v8430_v57 }
0x1257   : > { %v4445_v2 = vpop.xlane.xlu0 %4444  ;;  %v4481_v63 = vpack.c.bf16 %v4472_v22, %v4471_v51 }
0x1258   : > { %8455 = vrcp.f32 %v4445_v2 }
0x1259   : > { %7777 = vmatmul.mubr.msk.bf16.vlgmr.msra.gmra.mrb[180].mxu0 %vm1408_vm3, %v4481_v63  ;;  %v4448_v33 = vpop.xlane.xlu1 %4447 }
0x125a   : > { %v8452_v56 = vpop.eup %8451  ;;  %7787 = vmatpush3.bf16.msra.mxu0 %v4488_v24  ;;  %8457 = vrcp.f32 %v4448_v33  ;;  %7788 = vmatprep.mubr.msk.bf16.mxu0 %vm8557_vm2, %v8556_v17 }
0x125b   : > { %7798 = vmatprep.subr.bf16.mxu0 %v8556_v17  ;;  %v4473_v28 = vmul.f32 %v8452_v56, %v10158_v61 }
0x125c   : > { %v8454_v19 = vpop.eup %8453 }
0x125d   : > { %v4474_v57 = vmul.f32 %v8454_v19, %v8434_v49 }
0x125f   : > { %v4451_v53 = vpop.xlane.xlu0 %4450  ;;  %v4482_v37 = vpack.c.bf16 %v4474_v57, %v4473_v28 }
0x1260   : > { %8459 = vrcp.f32 %v4451_v53 }
0x1261   : > { %7783 = vmatmul.mubr.msk.bf16.vlgmr.msra.gmra.mrb[200].mxu1 %vm1408_vm3, %v4482_v37  ;;  %v4454_v4 = vpop.xlane.xlu1 %4453 }
0x1262   : > { %v8456_v50 = vpop.eup %8455  ;;  %7793 = vmatpush3.bf16.msra.mxu1 %v4489_v48  ;;  %8461 = vrcp.f32 %v4454_v4  ;;  %7794 = vmatprep.mubr.msk.bf16.mxu1 %vm8557_vm2, %v8556_v17 }
0x1263   : > { %7804 = vmatprep.subr.bf16.mxu1 %v8556_v17  ;;  %v4475_v27 = vmul.f32 %v8456_v50, %v10163_v25 }
0x1264   : > { %v8458_v43 = vpop.eup %8457 }
0x1265   : > { %v4476_v24 = vmul.f32 %v8458_v43, %v8438_v21  ;;  %v6951_v43 = vld [vmem:[%s10890_s10 + $0x3] ss:$0 sm:$0xff] }
0x1267   : > { %v4457_v61 = vpop.xlane.xlu0 %4456  ;;  %v4483_v49 = vpack.c.bf16 %v4476_v24, %v4475_v27 }
0x1268   : > { %8463 = vrcp.f32 %v4457_v61 }
0x1269   : > { %7789 = vmatmul.mubr.msk.bf16.vlgmr.msra.gmra.mrb[184].mxu0 %vm1408_vm3, %v4483_v49  ;;  %v4460_v41 = vpop.xlane.xlu1 %4459 }
0x126a   : > { %v8460_v54 = vpop.eup %8459  ;;  %7799 = vmatpush3.bf16.msra.mxu0 %v4490_v36  ;;  %8465 = vrcp.f32 %v4460_v41  ;;  %7800 = vmatprep.mubr.msk.bf16.mxu0 %vm8557_vm2, %v8556_v17 }
0x126b   : > { %7826 = vmatprep.subr.bf16.mxu0 %v8556_v17  ;;  %v4477_v1 = vmul.f32 %v8460_v54, %v8440_v30 }
0x126c   : > { %v8462_v6 = vpop.eup %8461 }
0x126d   : > { %v4478_v48 = vmul.f32 %v8462_v6, %v8442_v35 }
0x126f   : > { %v4484_v25 = vpack.c.bf16 %v4478_v48, %v4477_v1 }
0x1271   : > { %7795 = vmatmul.mubr.msk.bf16.vlgmr.msra.gmra.mrb[204].mxu1 %vm1408_vm3, %v4484_v25 }
0x1272   : > { %v8464_v21 = vpop.eup %8463  ;;  %7806 = vmatprep.mubr.msk.bf16.mxu1 %vm8557_vm2, %v8556_v17  ;;  %7805 = vmatpush3.bf16.msra.mxu1 %v8257_v26 }
0x1273   : > { %v4479_v46 = vmul.f32 %v8464_v21, %v8444_v45  ;;  %7850 = vmatprep.subr.bf16.mxu1 %v8556_v17 }
0x1274   : > { %v8466_v5 = vpop.eup %8465 }
0x1275   : > { %v4480_v11 = vmul.f32 %v8466_v5, %v8446_v15  ;;  %v8259_v15 = vld [vmem:[%s10888_s8 + $0x38] sm:$0xff]  }
0x1277   : > { %v4485_v36 = vpack.c.bf16 %v4480_v11, %v4479_v46 }
0x1279   : > { %7801 = vmatmul.mubr.msk.bf16.vlgmr.msra.gmra.mrb[188].mxu0 %vm1408_vm3, %v4485_v36 }
0x127a   : > { %7827 = vmatpush3.bf16.msra.mxu0 %v8253_v29  ;;  %7830 = vmatprep.mubr.msk.bf16.mxu0 %vm8557_vm2, %v8556_v17 }
0x127b   : > { %7828 = vmatprep.subr.bf16.mxu0 %v8556_v17 }
0x127e   : > { %7829 = vmatpush3.bf16.msra.mxu0 %v8254_v16 }
0x127f   : > { %7874 = vmatprep.subr.bf16.mxu0 %v8556_v17 }
0x1281   : > { %7831 = vmatmul.mubr.msk.bf16.vlgmr.msra.gmra.mrb[192].mxu0 %vm925_vm1, %v9964_v9 }
0x1282   : > { %7834 = vmatprep.mubr.msk.bf16.mxu0 %vm8557_vm2, %v8556_v17  ;;  %7875 = vmatpush3.bf16.msra.mxu0 %v8255_v18 }
0x1283   : > { %7876 = vmatprep.subr.bf16.mxu0 %v8556_v17 }
0x1286   : > { %7877 = vmatpush3.bf16.msra.mxu0 %v8256_v13 }
0x1287   : > { %7904 = vmatprep.subr.bf16.mxu0 %v8556_v17 }
0x1289   : > { %7835 = vmatmul.mubr.msk.bf16.gmra.mrb[196].mxu0 %vm925_vm1, %v9987_v38 }
0x128a   : > { %7838 = vmatprep.mubr.msk.bf16.mxu0 %vm8557_vm2, %v8556_v17 }
0x1291   : > { %7839 = vmatmul.mubr.msk.bf16.gmra.mrb[200].mxu0 %vm925_vm1, %v10004_v10 }
0x1292   : > { %7842 = vmatprep.mubr.msk.bf16.mxu0 %vm8557_vm2, %v8556_v17 }
0x1299   : > { %7843 = vmatmul.mubr.msk.bf16.gmra.mrb[204].mxu0 %vm925_vm1, %v10020_v62 }
0x129a   : > { %7846 = vmatprep.mubr.msk.bf16.mxu0 %vm8557_vm2, %v8556_v17 }
0x12a1   : > { %7847 = vmatmul.mubr.msk.bf16.gmra.mrb[208].mxu0 %vm925_vm1, %v10035_v32 }
0x12a2   : > { %7878 = vmatprep.mubr.msk.bf16.mxu0 %vm8557_vm2, %v8556_v17 }
0x12a9   : > { %7879 = vmatmul.mubr.msk.bf16.vlgmr.msra.gmra.mrb[212].mxu0 %vm925_vm1, %v9964_v9 }
0x12aa   : > { %7882 = vmatprep.mubr.msk.bf16.mxu0 %vm8557_vm2, %v8556_v17 }
0x12b1   : > { %7883 = vmatmul.mubr.msk.bf16.gmra.mrb[216].mxu0 %vm925_vm1, %v9987_v38 }
0x12b2   : > { %7886 = vmatprep.mubr.msk.bf16.mxu0 %vm8557_vm2, %v8556_v17 }
0x12b9   : > { %7887 = vmatmul.mubr.msk.bf16.gmra.mrb[220].mxu0 %vm925_vm1, %v10004_v10 }
0x12ba   : > { %7890 = vmatprep.mubr.msk.bf16.mxu0 %vm8557_vm2, %v8556_v17 }
0x12c1   : > { %7891 = vmatmul.mubr.msk.bf16.gmra.mrb[224].mxu0 %vm925_vm1, %v10020_v62 }
0x12c2   : > { %7894 = vmatprep.mubr.msk.bf16.mxu0 %vm8557_vm2, %v8556_v17 }
0x12c9   : > { %7895 = vmatmul.mubr.msk.bf16.gmra.mrb[228].mxu0 %vm925_vm1, %v10035_v32 }
0x12ca   : > { %7906 = vmatprep.mubr.msk.bf16.mxu0 %vm8557_vm2, %v8556_v17 }
0x132c   : > { %v4528_v30 = vpop.f32.mrb[180].mxu0 }
0x132d   : > { %v7778_v59 = vpop.f32.mrb[181].mxu0 }
0x132e   : > { %v4531_v35 = vpop.f32.mrb[182].mxu0 }
0x132f   : > { %v4711_v45 = vpack.c.bf16 %v4531_v35, %v4528_v30  ;;  %v7779_v55 = vpop.f32.mrb[183].mxu0 }
0x1331   : > { %7807 = vmatmul.mubr.msk.bf16.vlgmr.msra.gmra.mrb[208].mxu1 %vm1408_vm3, %v4711_v45 }
0x1332   : > { %7810 = vmatprep.mubr.msk.bf16.mxu1 %vm8557_vm2, %v8556_v17  ;;  %7851 = vmatpush3.bf16.msra.mxu1 %v8258_v52 }
0x1333   : > { %7852 = vmatprep.subr.bf16.mxu1 %v8556_v17 }
0x1334   : > { %v4572_v58 = vpop.f32.mrb[200].mxu1 }
0x1335   : > { %v7784_v14 = vpop.f32.mrb[201].mxu1 }
0x1336   : > { %v4575_v34 = vpop.f32.mrb[202].mxu1  ;;  %7853 = vmatpush3.bf16.msra.mxu1 %v8259_v15 }
0x1337   : > { %v4712_v8 = vpack.c.bf16 %v4575_v34, %v4572_v58  ;;  %v7785_v12 = vpop.f32.mrb[203].mxu1  ;;  %7898 = vmatprep.subr.bf16.mxu1 %v8556_v17 }
0x1339   : > { %7811 = vmatmul.mubr.msk.bf16.gmra.mrb[212].mxu1 %vm1408_vm3, %v4712_v8 }
0x133a   : > { %7814 = vmatprep.mubr.msk.bf16.mxu1 %vm8557_vm2, %v8556_v17 }
0x133c   : > { %v4616_v40 = vpop.f32.mrb[184].mxu0 }
0x133d   : > { %v7790_v44 = vpop.f32.mrb[185].mxu0 }
0x133e   : > { %v4619_v51 = vpop.f32.mrb[186].mxu0 }
0x133f   : > { %v4713_v22 = vpack.c.bf16 %v4619_v51, %v4616_v40  ;;  %v7791_v2 = vpop.f32.mrb[187].mxu0 }
0x1341   : > { %7815 = vmatmul.mubr.msk.bf16.gmra.mrb[216].mxu1 %vm1408_vm3, %v4713_v22 }
0x1342   : > { %7818 = vmatprep.mubr.msk.bf16.mxu1 %vm8557_vm2, %v8556_v17 }
0x1344   : > { %v4660_v63 = vpop.f32.mrb[204].mxu1 }
0x1345   : > { %v7796_v33 = vpop.f32.mrb[205].mxu1 }
0x1346   : > { %v4663_v56 = vpop.f32.mrb[206].mxu1 }
0x1347   : > { %v4714_v19 = vpack.c.bf16 %v4663_v56, %v4660_v63  ;;  %v7797_v28 = vpop.f32.mrb[207].mxu1 }
0x1349   : > { %7819 = vmatmul.mubr.msk.bf16.gmra.mrb[220].mxu1 %vm1408_vm3, %v4714_v19 }
0x134a   : > { %7822 = vmatprep.mubr.msk.bf16.mxu1 %vm8557_vm2, %v8556_v17 }
0x134c   : > { %v4704_v57 = vpop.f32.mrb[188].mxu0 }
0x134d   : > { %v7802_v53 = vpop.f32.mrb[189].mxu0 }
0x134e   : > { %v4707_v37 = vpop.f32.mrb[190].mxu0 }
0x134f   : > { %v4715_v4 = vpack.c.bf16 %v4707_v37, %v4704_v57  ;;  %v7803_v50 = vpop.f32.mrb[191].mxu0 }
0x1351   : > { %7823 = vmatmul.mubr.msk.bf16.gmra.mrb[224].mxu1 %vm1408_vm3, %v4715_v4 }
0x1352   : > { %7854 = vmatprep.mubr.msk.bf16.mxu1 %vm8557_vm2, %v8556_v17 }
0x1354   : > { %v4888_v27 = vpop.f32.mrb[192].mxu0 }
0x1355   : > { %v7832_v24 = vpop.f32.mrb[193].mxu0  ;;  %v10288_v49 = vadd.f32 %v6951_v43, %v4888_v27 }
0x1356   : > { %v4891_v61 = vpop.f32.mrb[194].mxu0 }
0x1357   : > { %v10290_v41 = vadd.f32 %v6951_v43, %v4891_v61  ;;  %v7833_v54 = vpop.f32.mrb[195].mxu0 }
0x1359   : > { %v5123_v6 = vpack.c.bf16 %v10290_v41, %v10288_v49  ;;  %7855 = vmatmul.mubr.msk.bf16.vlgmr.msra.gmra.mrb[228].mxu1 %vm925_vm1, %v9964_v9 }
0x135a   : > { %7858 = vmatprep.mubr.msk.bf16.mxu1 %vm8557_vm2, %v8556_v17 }
0x135c   : > { %v4896_v1 = vpop.f32.mrb[196].mxu0 }
0x135d   : > { %v7836_v48 = vpop.f32.mrb[197].mxu0  ;;  %v10298_v21 = vadd.f32 %v6951_v43, %v4896_v1 }
0x135e   : > { %v4899_v25 = vpop.f32.mrb[198].mxu0 }
0x135f   : > { %v10300_v5 = vadd.f32 %v6951_v43, %v4899_v25  ;;  %v7837_v46 = vpop.f32.mrb[199].mxu0 }
0x1361   : > { %v5124_v11 = vpack.c.bf16 %v10300_v5, %v10298_v21  ;;  %7859 = vmatmul.mubr.msk.bf16.gmra.mrb[232].mxu1 %vm925_vm1, %v9987_v38 }
0x1362   : > { %7862 = vmatprep.mubr.msk.bf16.mxu1 %vm8557_vm2, %v8556_v17 }
0x1364   : > { %v4904_v9 = vpop.f32.mrb[200].mxu0 }
0x1365   : > { %v7840_v29 = vpop.f32.mrb[201].mxu0  ;;  %v10308_v16 = vadd.f32 %v6951_v43, %v4904_v9 }
0x1366   : > { %v4907_v36 = vpop.f32.mrb[202].mxu0 }
0x1367   : > { %v10310_v18 = vadd.f32 %v6951_v43, %v4907_v36  ;;  %v7841_v13 = vpop.f32.mrb[203].mxu0 }
0x1369   : > { %v5125_v26 = vpack.c.bf16 %v10310_v18, %v10308_v16  ;;  %7863 = vmatmul.mubr.msk.bf16.gmra.mrb[236].mxu1 %vm925_vm1, %v10004_v10 }
0x136a   : > { %7866 = vmatprep.mubr.msk.bf16.mxu1 %vm8557_vm2, %v8556_v17 }
0x136c   : > { %v4912_v38 = vpop.f32.mrb[204].mxu0 }
0x136d   : > { %v7844_v30 = vpop.f32.mrb[205].mxu0  ;;  %v10318_v35 = vadd.f32 %v6951_v43, %v4912_v38 }
0x136e   : > { %v4915_v59 = vpop.f32.mrb[206].mxu0 }
0x136f   : > { %v10320_v52 = vadd.f32 %v6951_v43, %v4915_v59  ;;  %v7845_v45 = vpop.f32.mrb[207].mxu0 }
0x1371   : > { %v5126_v55 = vpack.c.bf16 %v10320_v52, %v10318_v35  ;;  %7867 = vmatmul.mubr.msk.bf16.gmra.mrb[240].mxu1 %vm925_vm1, %v10020_v62  ;;  %v6977_v62 = vld [vmem:[%s10892_s12 + $0x3] ss:$0 sm:$0xff] }
0x1372   : > { %7870 = vmatprep.mubr.msk.bf16.mxu1 %vm8557_vm2, %v8556_v17 }
0x1374   : > { %v4920_v10 = vpop.f32.mrb[208].mxu0 }
0x1375   : > { %v7848_v15 = vpop.f32.mrb[209].mxu0  ;;  %v10328_v14 = vadd.f32 %v6951_v43, %v4920_v10 }
0x1376   : > { %v4923_v58 = vpop.f32.mrb[210].mxu0 }
0x1377   : > { %v10330_v34 = vadd.f32 %v6951_v43, %v4923_v58  ;;  %v7849_v8 = vpop.f32.mrb[211].mxu0 }
0x1379   : > { %v5127_v12 = vpack.c.bf16 %v10330_v34, %v10328_v14  ;;  %7871 = vmatmul.mubr.msk.bf16.gmra.mrb[244].mxu1 %vm925_vm1, %v10035_v32 }
0x137a   : > { %7900 = vmatprep.mubr.msk.bf16.mxu1 %vm8557_vm2, %v8556_v17 }
0x137c   : > { %v5084_v40 = vpop.f32.mrb[212].mxu0 }
0x137d   : > { %v7880_v44 = vpop.f32.mrb[213].mxu0  ;;  %v10341_v22 = vadd.f32 %v6977_v62, %v5084_v40 }
0x137e   : > { %v5087_v51 = vpop.f32.mrb[214].mxu0 }
0x137f   : > { %v10343_v2 = vadd.f32 %v6977_v62, %v5087_v51  ;;  %v7881_v63 = vpop.f32.mrb[215].mxu0 }
0x1381   : > { %v5493_v33 = vpack.c.bf16 %v10343_v2, %v10341_v22 }
0x1384   : > { %v5092_v56 = vpop.f32.mrb[216].mxu0 }
0x1385   : > { %v7884_v32 = vpop.f32.mrb[217].mxu0  ;;  %v10347_v28 = vadd.f32 %v6977_v62, %v5092_v56 }
0x1386   : > { %v5095_v19 = vpop.f32.mrb[218].mxu0 }
0x1387   : > { %v10349_v57 = vadd.f32 %v6977_v62, %v5095_v19  ;;  %v7885_v53 = vpop.f32.mrb[219].mxu0 }
0x1389   : > { %v5494_v37 = vpack.c.bf16 %v10349_v57, %v10347_v28 }
0x138c   : > { %v5100_v4 = vpop.f32.mrb[220].mxu0 }
0x138d   : > { %v10353_v50 = vadd.f32 %v6977_v62, %v5100_v4  ;;  %v7888_v43 = vpop.f32.mrb[221].mxu0 }
0x138e   : > { %v5103_v27 = vpop.f32.mrb[222].mxu0 }
0x138f   : > { %v10355_v24 = vadd.f32 %v6977_v62, %v5103_v27  ;;  %v7889_v61 = vpop.f32.mrb[223].mxu0 }
0x1394   : > { %v5108_v1 = vpop.f32.mrb[224].mxu0 }
0x1395   : > { %v10359_v48 = vadd.f32 %v6977_v62, %v5108_v1  ;;  %v7892_v25 = vpop.f32.mrb[225].mxu0 }
0x1396   : > { %v5111_v46 = vpop.f32.mrb[226].mxu0 }
0x1397   : > { %v10361_v9 = vadd.f32 %v6977_v62, %v5111_v46  ;;  %v7893_v29 = vpop.f32.mrb[227].mxu0 }
0x139c   : > { %v5116_v13 = vpop.f32.mrb[228].mxu0 }
0x139d   : > { %v10365_v38 = vadd.f32 %v6977_v62, %v5116_v13  ;;  %v7896_v30 = vpop.f32.mrb[229].mxu0 }
0x139e   : > { %v5119_v59 = vpop.f32.mrb[230].mxu0  ;;  %v6964_v30 = vld [vmem:[%s10891_s11 + $0x3] ss:$0 sm:$0xff] }
0x139f   : > { %v10367_v45 = vadd.f32 %v6977_v62, %v5119_v59  ;;  %v7897_v10 = vpop.f32.mrb[231].mxu0 }
0x1404   : > { %v10371_v58 = vpop.f32.mrb[208].mxu1 }
0x1405   : > { %v7808_v8 = vpop.f32.mrb[209].mxu1 }
0x1406   : > { %v10373_v40 = vpop.f32.mrb[210].mxu1 }
0x1407   : > { %v7809_v44 = vpop.f32.mrb[211].mxu1 }
0x140c   : > { %v10375_v51 = vpop.f32.mrb[212].mxu1 }
0x140d   : > { %v7812_v63 = vpop.f32.mrb[213].mxu1 }
0x140e   : > { %v10377_v56 = vpop.f32.mrb[214].mxu1 }
0x140f   : > { %v7813_v32 = vpop.f32.mrb[215].mxu1 }
0x1414   : > { %v10379_v19 = vpop.f32.mrb[216].mxu1 }
0x1415   : > { %v7816_v62 = vpop.f32.mrb[217].mxu1 }
0x1416   : > { %v10381_v53 = vpop.f32.mrb[218].mxu1 }
0x1417   : > { %v7817_v4 = vpop.f32.mrb[219].mxu1 }
0x141c   : > { %v10383_v43 = vpop.f32.mrb[220].mxu1 }
0x141d   : > { %v7820_v27 = vpop.f32.mrb[221].mxu1 }
0x141e   : > { %v10385_v61 = vpop.f32.mrb[222].mxu1 }
0x141f   : > { %v7821_v1 = vpop.f32.mrb[223].mxu1 }
0x1424   : > { %v10387_v25 = vpop.f32.mrb[224].mxu1 }
0x1425   : > { %v7824_v46 = vpop.f32.mrb[225].mxu1 }
0x1426   : > { %v10389_v29 = vpop.f32.mrb[226].mxu1 }
0x1427   : > { %v7825_v13 = vpop.f32.mrb[227].mxu1 }
0x142c   : > { %v4986_v59 = vpop.f32.mrb[228].mxu1 }
0x142d   : > { %v7856_v10 = vpop.f32.mrb[229].mxu1  ;;  %v4987_v44 = vadd.f32 %v6964_v30, %v4986_v59 }
0x142e   : > { %v4989_v8 = vpop.f32.mrb[230].mxu1 }
0x142f   : > { %v4990_v63 = vadd.f32 %v6964_v30, %v4989_v8  ;;  %v7857_v32 = vpop.f32.mrb[231].mxu1 }
0x1431   : > { %v5128_v62 = vpack.c.bf16 %v4990_v63, %v4987_v44 }
0x1433   : > { %v5137_v4 = vsel %vm1408_vm3, %v5128_v62, 0 }
0x1434   : > { %v4994_v27 = vpop.f32.mrb[232].mxu1  ;;  %7899 = vmatpush3.bf16.xpose.msra.mxu1 %v5137_v4 }
0x1435   : > { %v7860_v1 = vpop.f32.mrb[233].mxu1  ;;  %7910 = vmatprep.subr.bf16.mxu1 %v8556_v17  ;;  %v4995_v13 = vadd.f32 %v6964_v30, %v4994_v27 }
0x1436   : > { %v4997_v46 = vpop.f32.mrb[234].mxu1 }
0x1437   : > { %v4998_v15 = vadd.f32 %v6964_v30, %v4997_v46  ;;  %v7861_v36 = vpop.f32.mrb[235].mxu1 }
0x1439   : > { %v5129_v54 = vpack.c.bf16 %v4998_v15, %v4995_v13 }
0x143b   : > { %7901 = vmatmul.mubr.msk.bf16.vlgmr.msra.gmra.mrb[248].mxu1 %vm1408_vm3, %v5123_v6  ;;  %v5184_v59 = vsel %vm1408_vm3, %v5129_v54, 0 }
0x143c   : > { %v5002_v10 = vpop.f32.mrb[236].mxu1  ;;  %7905 = vmatpush3.bf16.xpose.msra.mxu0 %v5184_v59  ;;  %7912 = vmatprep.mubr.msk.bf16.mxu1 %vm8557_vm2, %v8556_v17 }
0x143d   : > { %v7864_v8 = vpop.f32.mrb[237].mxu1  ;;  %7916 = vmatprep.subr.bf16.mxu0 %v8556_v17  ;;  %v5003_v63 = vadd.f32 %v6964_v30, %v5002_v10 }
0x143e   : > { %v5005_v44 = vpop.f32.mrb[238].mxu1 }
0x143f   : > { %v5006_v32 = vadd.f32 %v6964_v30, %v5005_v44  ;;  %v7865_v36 = vpop.f32.mrb[239].mxu1 }
0x1441   : > { %v5130_v15 = vpack.c.bf16 %v5006_v32, %v5003_v63 }
0x1443   : > { %7907 = vmatmul.mubr.msk.bf16.vlgmr.msra.gmra.mrb[232].mxu0 %vm1408_vm3, %v5124_v11  ;;  %v5231_v49 = vsel %vm1408_vm3, %v5130_v15, 0 }
0x1444   : > { %v5010_v41 = vpop.f32.mrb[240].mxu1  ;;  %7911 = vmatpush3.bf16.xpose.msra.mxu1 %v5231_v49  ;;  %7918 = vmatprep.mubr.msk.bf16.mxu0 %vm8557_vm2, %v8556_v17 }
0x1445   : > { %v7868_v6 = vpop.f32.mrb[241].mxu1  ;;  %7922 = vmatprep.subr.bf16.mxu1 %v8556_v17  ;;  %v5011_v62 = vadd.f32 %v6964_v30, %v5010_v41 }
0x1446   : > { %v5013_v54 = vpop.f32.mrb[242].mxu1 }
0x1447   : > { %v5014_v4 = vadd.f32 %v6964_v30, %v5013_v54  ;;  %v7869_v27 = vpop.f32.mrb[243].mxu1 }
0x1449   : > { %v5131_v1 = vpack.c.bf16 %v5014_v4, %v5011_v62 }
0x144b   : > { %7913 = vmatmul.mubr.msk.bf16.vlgmr.msra.gmra.mrb[252].mxu1 %vm1408_vm3, %v5125_v26  ;;  %v5278_v21 = vsel %vm1408_vm3, %v5131_v1, 0 }
0x144c   : > { %v5018_v5 = vpop.f32.mrb[244].mxu1  ;;  %7917 = vmatpush3.bf16.xpose.msra.mxu0 %v5278_v21  ;;  %7924 = vmatprep.mubr.msk.bf16.mxu1 %vm8557_vm2, %v8556_v17 }
0x144d   : > { %v7872_v11 = vpop.f32.mrb[245].mxu1  ;;  %7928 = vmatprep.subr.bf16.mxu0 %v8556_v17  ;;  %v5019_v13 = vadd.f32 %v6964_v30, %v5018_v5 }
0x144e   : > { %v5021_v46 = vpop.f32.mrb[246].mxu1 }
0x144f   : > { %v5022_v59 = vadd.f32 %v6964_v30, %v5021_v46  ;;  %v7873_v10 = vpop.f32.mrb[247].mxu1 }
0x1451   : > { %v5132_v8 = vpack.c.bf16 %v5022_v59, %v5019_v13 }
0x1453   : > { %7919 = vmatmul.mubr.msk.bf16.vlgmr.msra.gmra.mrb[236].mxu0 %vm1408_vm3, %v5126_v55  ;;  %v5325_v16 = vsel %vm1408_vm3, %v5132_v8, 0 }
0x1454   : > { %7923 = vmatpush3.bf16.xpose.msra.mxu1 %v5325_v16  ;;  %7929 = vmatpush3.bf16.msra.mxu0 %v5493_v33 }
0x1455   : > { %7934 = vmatprep.subr.bf16.mxu1 %v8556_v17  ;;  %7930 = vmatprep.mubr.msk.bf16.mxu0 %vm8557_vm2, %v8556_v17 }
0x1456   : > { %7940 = vmatprep.subr.bf16.mxu0 %v8556_v17 }
0x145b   : > { %7925 = vmatmul.mubr.msk.bf16.vlgmr.msra.gmra.mrb[0].mxu1 %vm1408_vm3, %v5127_v12 }
0x145c   : > { %7935 = vmatpush3.bf16.msra.mxu1 %v5494_v37  ;;  %7936 = vmatprep.mubr.msk.bf16.mxu1 %vm8557_vm2, %v8556_v17 }
0x145d   : > { %7946 = vmatprep.subr.bf16.mxu1 %v8556_v17 }
0x150e   : > { %v5173_v18 = vpop.f32.mrb[248].mxu1 }
0x150f   : > { %v5368_v26 = vmul.f32 0.25, %v5173_v18  ;;  %v7902_v35 = vpop.f32.mrb[249].mxu1 }
0x1510   : > { %v5176_v52 = vpop.f32.mrb[250].mxu1 }
0x1511   : > { %v5369_v55 = vmul.f32 0.25, %v5176_v52  ;;  %v7903_v22 = vpop.f32.mrb[251].mxu1  ;;  %v5378_v2 = vsel %vm1408_vm3, %v5368_v26, -inf }
0x1512   : > { %5379 = vmax.xlane.f32.xlu0 %v5378_v2 }
0x1513   : > { %v5381_v14 = vsel %vm1408_vm3, %v5369_v55, -inf }
0x1514   : > { %5382 = vmax.xlane.f32.xlu1 %v5381_v14 }
0x1516   : > { %v5220_v34 = vpop.f32.mrb[232].mxu0 }
0x1517   : > { %v5370_v12 = vmul.f32 0.25, %v5220_v34  ;;  %v7908_v33 = vpop.f32.mrb[233].mxu0 }
0x1518   : > { %v5223_v28 = vpop.f32.mrb[234].mxu0 }
0x1519   : > { %v5371_v57 = vmul.f32 0.25, %v5223_v28  ;;  %v7909_v37 = vpop.f32.mrb[235].mxu0  ;;  %v5384_v30 = vsel %vm1408_vm3, %v5370_v12, -inf }
0x151a   : > { %5385 = vmax.xlane.f32.xlu0 %v5384_v30 }
0x151b   : > { %v5387_v44 = vsel %vm1408_vm3, %v5371_v57, -inf }
0x151c   : > { %5388 = vmax.xlane.f32.xlu1 %v5387_v44 }
0x151e   : > { %v5267_v63 = vpop.f32.mrb[252].mxu1 }
0x151f   : > { %v5372_v32 = vmul.f32 0.25, %v5267_v63  ;;  %v7914_v36 = vpop.f32.mrb[253].mxu1 }
0x1520   : > { %v5270_v15 = vpop.f32.mrb[254].mxu1 }
0x1521   : > { %v5373_v49 = vmul.f32 0.25, %v5270_v15  ;;  %v7915_v41 = vpop.f32.mrb[255].mxu1  ;;  %v5390_v6 = vsel %vm1408_vm3, %v5372_v32, -inf }
0x1522   : > { %5391 = vmax.xlane.f32.xlu0 %v5390_v6 }
0x1523   : > { %v5393_v54 = vsel %vm1408_vm3, %v5373_v49, -inf }
0x1524   : > { %5394 = vmax.xlane.f32.xlu1 %v5393_v54 }
0x1526   : > { %v5314_v62 = vpop.f32.mrb[236].mxu0 }
0x1527   : > { %v5374_v4 = vmul.f32 0.25, %v5314_v62  ;;  %v7920_v27 = vpop.f32.mrb[237].mxu0 }
0x1528   : > { %v5317_v1 = vpop.f32.mrb[238].mxu0 }
0x1529   : > { %v5375_v21 = vmul.f32 0.25, %v5317_v1  ;;  %v7921_v5 = vpop.f32.mrb[239].mxu0  ;;  %v5396_v11 = vsel %vm1408_vm3, %v5374_v4, -inf }
0x152a   : > { %5397 = vmax.xlane.f32.xlu0 %v5396_v11 }
0x152b   : > { %v5399_v46 = vsel %vm1408_vm3, %v5375_v21, -inf }
0x152c   : > { %5400 = vmax.xlane.f32.xlu1 %v5399_v46 }
0x152e   : > { %v5361_v13 = vpop.f32.mrb[0].mxu1 }
0x152f   : > { %v5376_v59 = vmul.f32 0.25, %v5361_v13  ;;  %v7926_v10 = vpop.f32.mrb[1].mxu1 }
0x1530   : > { %v5364_v8 = vpop.f32.mrb[2].mxu1 }
0x1531   : > { %v5377_v16 = vmul.f32 0.25, %v5364_v8  ;;  %v7927_v18 = vpop.f32.mrb[3].mxu1  ;;  %v5402_v35 = vsel %vm1408_vm3, %v5376_v59, -inf }
0x1532   : > { %5403 = vmax.xlane.f32.xlu0 %v5402_v35 }
0x1533   : > { %v5405_v52 = vsel %vm1408_vm3, %v5377_v16, -inf }
0x1534   : > { %5406 = vmax.xlane.f32.xlu1 %v5405_v52 }
0x159f   : > { %v5380_v22 = vpop.xlane.xlu0 %5379 }
0x15a0   : > { %v5408_v2 = vsub.f32 %v5368_v26, %v5380_v22 }
0x15a1   : > { %v5383_v14 = vpop.xlane.xlu1 %5382 }
0x15a2   : > { %v5418_v34 = vmul.f32 1.442695, %v5408_v2  ;;  %v5409_v33 = vsub.f32 %v5369_v55, %v5383_v14 }
0x15a4   : > { %8467 = vpow2.f32 %v5418_v34  ;;  %v5420_v28 = vmul.f32 1.442695, %v5409_v33 }
0x15a6   : > { %8469 = vpow2.f32 %v5420_v28 }
0x15a7   : > { %v5386_v37 = vpop.xlane.xlu0 %5385 }
0x15a8   : > { %v5410_v30 = vsub.f32 %v5370_v12, %v5386_v37 }
0x15a9   : > { %v5389_v44 = vpop.xlane.xlu1 %5388 }
0x15aa   : > { %v5422_v63 = vmul.f32 1.442695, %v5410_v30  ;;  %v5411_v36 = vsub.f32 %v5371_v57, %v5389_v44 }
0x15ac   : > { %8471 = vpow2.f32 %v5422_v63  ;;  %v5424_v15 = vmul.f32 1.442695, %v5411_v36 }
0x15ae   : > { %v10452_v41 = vpop.eup %8467  ;;  %8473 = vpow2.f32 %v5424_v15 }
0x15af   : > { %v5392_v6 = vpop.xlane.xlu0 %5391  ;;  %v5438_v26 = vsel %vm1408_vm3, %v10452_v41, 0.0 }
0x15b0   : > { %v8470_v54 = vpop.eup %8469  ;;  %v5412_v62 = vsub.f32 %v5372_v32, %v5392_v6  ;;  %5439 = vadd.xlane.f32.xlu0 %v5438_v26 }
0x15b1   : > { %v5395_v55 = vpop.xlane.xlu1 %5394  ;;  %v5441_v27 = vsel %vm1408_vm3, %v8470_v54, 0.0 }
0x15b2   : > { %v5426_v1 = vmul.f32 1.442695, %v5412_v62  ;;  %v5413_v12 = vsub.f32 %v5373_v49, %v5395_v55  ;;  %5442 = vadd.xlane.f32.xlu1 %v5441_v27 }
0x15b4   : > { %8475 = vpow2.f32 %v5426_v1  ;;  %v5428_v57 = vmul.f32 1.442695, %v5413_v12 }
0x15b6   : > { %v10457_v5 = vpop.eup %8471  ;;  %8477 = vpow2.f32 %v5428_v57 }
0x15b7   : > { %v5398_v11 = vpop.xlane.xlu0 %5397  ;;  %v5444_v46 = vsel %vm1408_vm3, %v10457_v5, 0.0 }
0x15b8   : > { %v8474_v13 = vpop.eup %8473  ;;  %v5414_v10 = vsub.f32 %v5374_v4, %v5398_v11  ;;  %5445 = vadd.xlane.f32.xlu0 %v5444_v46 }
0x15b9   : > { %v5401_v32 = vpop.xlane.xlu1 %5400  ;;  %v5447_v8 = vsel %vm1408_vm3, %v8474_v13, 0.0 }
0x15ba   : > { %v5430_v18 = vmul.f32 1.442695, %v5414_v10  ;;  %v5415_v35 = vsub.f32 %v5375_v21, %v5401_v32  ;;  %5448 = vadd.xlane.f32.xlu1 %v5447_v8 }
0x15bc   : > { %8479 = vpow2.f32 %v5430_v18  ;;  %v5432_v49 = vmul.f32 1.442695, %v5415_v35  ;;  %v10920_v18 = vpack.c.bf16 %v10355_v24, %v10353_v50  ;;  %v10921_v50 = vpack.c.bf16 %v10361_v9, %v10359_v48 }
0x15bd   : > { %v10922_v48 = vpack.c.bf16 %v10367_v45, %v10365_v38 }
0x15be   : > { %v10462_v52 = vpop.eup %8475  ;;  %8481 = vpow2.f32 %v5432_v49 }
0x15bf   : > { %v5404_v22 = vpop.xlane.xlu0 %5403  ;;  %v5450_v2 = vsel %vm1408_vm3, %v10462_v52, 0.0 }
0x15c0   : > { %v8478_v14 = vpop.eup %8477  ;;  %v5416_v34 = vsub.f32 %v5376_v59, %v5404_v22  ;;  %5451 = vadd.xlane.f32.xlu0 %v5450_v2 }
0x15c1   : > { %v5407_v4 = vpop.xlane.xlu1 %5406  ;;  %v5453_v33 = vsel %vm1408_vm3, %v8478_v14, 0.0 }
0x15c2   : > { %v5434_v28 = vmul.f32 1.442695, %v5416_v34  ;;  %v5417_v37 = vsub.f32 %v5377_v16, %v5407_v4  ;;  %5454 = vadd.xlane.f32.xlu1 %v5453_v33 }
0x15c4   : > { %8483 = vpow2.f32 %v5434_v28  ;;  %v5436_v21 = vmul.f32 1.442695, %v5417_v37 }
0x15c6   : > { %v8480_v30 = vpop.eup %8479  ;;  %8485 = vpow2.f32 %v5436_v21 }
0x15c7   : > { %v5456_v44 = vsel %vm1408_vm3, %v8480_v30, 0.0 }
0x15c8   : > { %v8482_v63 = vpop.eup %8481  ;;  %5457 = vadd.xlane.f32.xlu0 %v5456_v44 }
0x15c9   : > { %v5459_v36 = vsel %vm1408_vm3, %v8482_v63, 0.0 }
0x15ca   : > { %5460 = vadd.xlane.f32.xlu1 %v5459_v36 }
0x15ce   : > { %v8484_v15 = vpop.eup %8483 }
0x15cf   : > { %v5462_v59 = vsel %vm1408_vm3, %v8484_v15, 0.0 }
0x15d0   : > { %v8486_v6 = vpop.eup %8485  ;;  %5463 = vadd.xlane.f32.xlu0 %v5462_v59 }
0x15d1   : > { %v5465_v26 = vsel %vm1408_vm3, %v8486_v6, 0.0 }
0x15d2   : > { %5466 = vadd.xlane.f32.xlu1 %v5465_v26 }
0x163d   : > { %v5440_v16 = vpop.xlane.xlu0 %5439 }
0x163e   : > { %8487 = vrcp.f32 %v5440_v16 }
0x163f   : > { %v5443_v62 = vpop.xlane.xlu1 %5442 }
0x1640   : > { %8489 = vrcp.f32 %v5443_v62 }
0x1645   : > { %v5446_v55 = vpop.xlane.xlu0 %5445 }
0x1646   : > { %8491 = vrcp.f32 %v5446_v55 }
0x1647   : > { %v5449_v27 = vpop.xlane.xlu1 %5448 }
0x1648   : > { %v8488_v1 = vpop.eup %8487  ;;  %8493 = vrcp.f32 %v5449_v27 }
0x1649   : > { %v5478_v57 = vmul.f32 %v8488_v1, %v10452_v41 }
0x164a   : > { %v8490_v12 = vpop.eup %8489 }
0x164b   : > { %v5479_v11 = vmul.f32 %v8490_v12, %v8470_v54 }
0x164d   : > { %v5452_v46 = vpop.xlane.xlu0 %5451  ;;  %v5488_v10 = vpack.c.bf16 %v5479_v11, %v5478_v57 }
0x164e   : > { %8495 = vrcp.f32 %v5452_v46 }
0x164f   : > { %7931 = vmatmul.mubr.msk.bf16.vlgmr.msra.gmra.mrb[240].mxu0 %vm1408_vm3, %v5488_v10  ;;  %v5455_v32 = vpop.xlane.xlu1 %5454 }
0x1650   : > { %v8492_v8 = vpop.eup %8491  ;;  %7941 = vmatpush3.bf16.msra.mxu0 %v10920_v18  ;;  %8497 = vrcp.f32 %v5455_v32  ;;  %7942 = vmatprep.mubr.msk.bf16.mxu0 %vm8557_vm2, %v8556_v17 }
0x1651   : > { %7952 = vmatprep.subr.bf16.mxu0 %v8556_v17  ;;  %v5480_v41 = vmul.f32 %v8492_v8, %v10457_v5 }
0x1652   : > { %v8494_v35 = vpop.eup %8493 }
0x1653   : > { %v5481_v54 = vmul.f32 %v8494_v35, %v8474_v13 }
0x1655   : > { %v5489_v49 = vpack.c.bf16 %v5481_v54, %v5480_v41  ;;  %v5458_v22 = vpop.xlane.xlu0 %5457 }
0x1656   : > { %8499 = vrcp.f32 %v5458_v22 }
0x1657   : > { %7937 = vmatmul.mubr.msk.bf16.vlgmr.msra.gmra.mrb[4].mxu1 %vm1408_vm3, %v5489_v49  ;;  %v5461_v2 = vpop.xlane.xlu1 %5460 }
0x1658   : > { %v8496_v34 = vpop.eup %8495  ;;  %7947 = vmatpush3.bf16.msra.mxu1 %v10921_v50  ;;  %8501 = vrcp.f32 %v5461_v2  ;;  %7948 = vmatprep.mubr.msk.bf16.mxu1 %vm8557_vm2, %v8556_v17 }
0x1659   : > { %7958 = vmatprep.subr.bf16.mxu1 %v8556_v17  ;;  %v5482_v5 = vmul.f32 %v8496_v34, %v10462_v52 }
0x165a   : > { %v8498_v24 = vpop.eup %8497 }
0x165b   : > { %v5483_v13 = vmul.f32 %v8498_v24, %v8478_v14  ;;  %v6945_v24 = vld [vmem:[%s10894_s14 + $0x1] ss:$0 sm:$0xff] }
0x165d   : > { %v5464_v4 = vpop.xlane.xlu0 %5463  ;;  %v5490_v33 = vpack.c.bf16 %v5483_v13, %v5482_v5  ;;  %v4819_v5 = vadd.f32 %v6945_v24, %v10371_v58  ;;  %v4821_v58 = vadd.f32 %v6945_v24, %v10375_v51 }
0x165e   : > { %8503 = vrcp.f32 %v5464_v4  ;;  %v4820_v4 = vadd.f32 %v6945_v24, %v10373_v40 }
0x165f   : > { %7943 = vmatmul.mubr.msk.bf16.vlgmr.msra.gmra.mrb[244].mxu0 %vm1408_vm3, %v5490_v33  ;;  %v5467_v28 = vpop.xlane.xlu1 %5466 }
0x1660   : > { %v8500_v37 = vpop.eup %8499  ;;  %7953 = vmatpush3.bf16.msra.mxu0 %v10922_v48  ;;  %8505 = vrcp.f32 %v5467_v28  ;;  %7954 = vmatprep.mubr.msk.bf16.mxu0 %vm8557_vm2, %v8556_v17 }
0x1661   : > { %7980 = vmatprep.subr.bf16.mxu0 %v8556_v17  ;;  %v5484_v52 = vmul.f32 %v8500_v37, %v8480_v30  ;;  %v8260_v30 = vld [vmem:[%s10893_s13 + $0x18] sm:$0xff]  }
0x1662   : > { %v8502_v9 = vpop.eup %8501 }
0x1663   : > { %v5485_v14 = vmul.f32 %v8502_v9, %v8482_v63 }
0x1665   : > { %v5491_v21 = vpack.c.bf16 %v5485_v14, %v5484_v52 }
0x1667   : > { %7949 = vmatmul.mubr.msk.bf16.vlgmr.msra.gmra.mrb[8].mxu1 %vm1408_vm3, %v5491_v21 }
0x1668   : > { %v8504_v44 = vpop.eup %8503  ;;  %7960 = vmatprep.mubr.msk.bf16.mxu1 %vm8557_vm2, %v8556_v17  ;;  %7959 = vmatpush3.bf16.msra.mxu1 %v8260_v30 }
0x1669   : > { %v5486_v59 = vmul.f32 %v8504_v44, %v8484_v15  ;;  %8004 = vmatprep.subr.bf16.mxu1 %v8556_v17 }
0x166a   : > { %v8506_v36 = vpop.eup %8505 }
0x166b   : > { %v5487_v38 = vmul.f32 %v8506_v36, %v8486_v6  ;;  %v4822_v36 = vadd.f32 %v6945_v24, %v10377_v56 }
0x166d   : > { %v5492_v45 = vpack.c.bf16 %v5487_v38, %v5486_v59 }
0x166f   : > { %7955 = vmatmul.mubr.msk.bf16.vlgmr.msra.gmra.mrb[248].mxu0 %vm1408_vm3, %v5492_v45 }
0x1670   : > { %7984 = vmatprep.mubr.msk.bf16.mxu0 %vm8557_vm2, %v8556_v17 }
0x1722   : > { %v5535_v63 = vpop.f32.mrb[240].mxu0 }
0x1723   : > { %v7932_v26 = vpop.f32.mrb[241].mxu0 }
0x1724   : > { %v5538_v16 = vpop.f32.mrb[242].mxu0  ;;  %v4823_v26 = vadd.f32 %v6945_v24, %v10379_v19 }
0x1725   : > { %v5718_v62 = vpack.c.bf16 %v5538_v16, %v5535_v63  ;;  %v7933_v55 = vpop.f32.mrb[243].mxu0 }
0x1727   : > { %7961 = vmatmul.mubr.msk.bf16.vlgmr.msra.gmra.mrb[12].mxu1 %vm1408_vm3, %v5718_v62  ;;  %v4824_v62 = vadd.f32 %v6945_v24, %v10381_v53 }
0x1728   : > { %7964 = vmatprep.mubr.msk.bf16.mxu1 %vm8557_vm2, %v8556_v17 }
0x172a   : > { %v5579_v15 = vpop.f32.mrb[4].mxu1 }
0x172b   : > { %v7938_v6 = vpop.f32.mrb[5].mxu1 }
0x172c   : > { %v5582_v27 = vpop.f32.mrb[6].mxu1 }
0x172d   : > { %v5719_v1 = vpack.c.bf16 %v5582_v27, %v5579_v15  ;;  %v7939_v12 = vpop.f32.mrb[7].mxu1 }
0x172e   : > { %v4825_v12 = vadd.f32 %v6945_v24, %v10383_v43 }
0x172f   : > { %7965 = vmatmul.mubr.msk.bf16.gmra.mrb[16].mxu1 %vm1408_vm3, %v5719_v1 }
0x1730   : > { %7968 = vmatprep.mubr.msk.bf16.mxu1 %vm8557_vm2, %v8556_v17 }
0x1732   : > { %v5623_v57 = vpop.f32.mrb[244].mxu0 }
0x1733   : > { %v7944_v11 = vpop.f32.mrb[245].mxu0 }
0x1734   : > { %v5626_v46 = vpop.f32.mrb[246].mxu0  ;;  %v4826_v11 = vadd.f32 %v6945_v24, %v10385_v61 }
0x1735   : > { %v5720_v10 = vpack.c.bf16 %v5626_v46, %v5623_v57  ;;  %v7945_v32 = vpop.f32.mrb[247].mxu0 }
0x1737   : > { %7969 = vmatmul.mubr.msk.bf16.gmra.mrb[20].mxu1 %vm1408_vm3, %v5720_v10 }
0x1738   : > { %7972 = vmatprep.mubr.msk.bf16.mxu1 %vm8557_vm2, %v8556_v17 }
0x173a   : > { %v5667_v8 = vpop.f32.mrb[8].mxu1 }
0x173b   : > { %v7950_v18 = vpop.f32.mrb[9].mxu1 }
0x173c   : > { %v5670_v35 = vpop.f32.mrb[10].mxu1 }
0x173d   : > { %v5721_v41 = vpack.c.bf16 %v5670_v35, %v5667_v8  ;;  %v7951_v54 = vpop.f32.mrb[11].mxu1  ;;  %v4827_v35 = vadd.f32 %v6945_v24, %v10387_v25 }
0x173e   : > { %v4828_v54 = vadd.f32 %v6945_v24, %v10389_v29 }
0x173f   : > { %7973 = vmatmul.mubr.msk.bf16.gmra.mrb[24].mxu1 %vm1408_vm3, %v5721_v41 }
0x1740   : > { %7976 = vmatprep.mubr.msk.bf16.mxu1 %vm8557_vm2, %v8556_v17 }
0x1742   : > { %v5711_v49 = vpop.f32.mrb[248].mxu0 }
0x1743   : > { %v7956_v22 = vpop.f32.mrb[249].mxu0 }
0x1744   : > { %v5714_v2 = vpop.f32.mrb[250].mxu0 }
0x1745   : > { %v5722_v34 = vpack.c.bf16 %v5714_v2, %v5711_v49  ;;  %v7957_v50 = vpop.f32.mrb[251].mxu0 }
0x1747   : > { %7977 = vmatmul.mubr.msk.bf16.gmra.mrb[28].mxu1 %vm1408_vm3, %v5722_v34 }
0x1748   : > { %8012 = vmatprep.mubr.msk.bf16.mxu1 %vm8557_vm2, %v8556_v17 }
0x17fa   : > { %v5781_v13 = vpop.f32.mrb[12].mxu1 }
0x17fb   : > { %v5820_v33 = vadd.f32 %v5781_v13, %v4819_v5  ;;  %v7962_v28 = vpop.f32.mrb[13].mxu1 }
0x17fc   : > { %v5784_v37 = vpop.f32.mrb[14].mxu1 }
0x17fd   : > { %v10526_v48 = vadd.f32 %v5820_v33, %v9822_v39  ;;  %v5821_v9 = vadd.f32 %v5784_v37, %v4820_v4  ;;  %v7963_v52 = vpop.f32.mrb[15].mxu1 }
0x17ff   : > { %v10529_v14 = vadd.f32 %v5821_v9, %v9825_v23  ;;  %v5844_v21 = vsel %vm925_vm1, %v10526_v48, 0.0 }
0x1800   : > { %5845 = vadd.xlane.f32.xlu0 %v5844_v21 }
0x1801   : > { %v5847_v40 = vsel %vm925_vm1, %v10529_v14, 0.0 }
0x1802   : > { %5848 = vadd.xlane.f32.xlu1 %v5847_v40  ;;  %v5789_v44 = vpop.f32.mrb[16].mxu1 }
0x1803   : > { %v5822_v39 = vadd.f32 %v5789_v44, %v4821_v58  ;;  %v7966_v59 = vpop.f32.mrb[17].mxu1 }
0x1804   : > { %v5792_v38 = vpop.f32.mrb[18].mxu1 }
0x1805   : > { %v10538_v45 = vadd.f32 %v5822_v39, %v9832_v31  ;;  %v5823_v23 = vadd.f32 %v5792_v38, %v4822_v36  ;;  %v7967_v30 = vpop.f32.mrb[19].mxu1 }
0x1807   : > { %v10541_v63 = vadd.f32 %v5823_v23, %v9835_v0  ;;  %v5850_v51 = vsel %vm925_vm1, %v10538_v45, 0.0 }
0x1808   : > { %5851 = vadd.xlane.f32.xlu0 %v5850_v51 }
0x1809   : > { %v5853_v56 = vsel %vm925_vm1, %v10541_v63, 0.0 }
0x180a   : > { %5854 = vadd.xlane.f32.xlu1 %v5853_v56  ;;  %v5797_v16 = vpop.f32.mrb[20].mxu1 }
0x180b   : > { %v5824_v31 = vadd.f32 %v5797_v16, %v4823_v26  ;;  %v7970_v55 = vpop.f32.mrb[21].mxu1 }
0x180c   : > { %v5800_v15 = vpop.f32.mrb[22].mxu1 }
0x180d   : > { %v10550_v6 = vadd.f32 %v5824_v31, %v9842_v20  ;;  %v5825_v0 = vadd.f32 %v5800_v15, %v4824_v62  ;;  %v7971_v27 = vpop.f32.mrb[23].mxu1 }
0x180f   : > { %v10553_v1 = vadd.f32 %v5825_v0, %v9845_v42  ;;  %v5856_v19 = vsel %vm925_vm1, %v10550_v6, 0.0 }
0x1810   : > { %5857 = vadd.xlane.f32.xlu0 %v5856_v19 }
0x1811   : > { %v5859_v53 = vsel %vm925_vm1, %v10553_v1, 0.0 }
0x1812   : > { %5860 = vadd.xlane.f32.xlu1 %v5859_v53  ;;  %v5805_v57 = vpop.f32.mrb[24].mxu1 }
0x1813   : > { %v5826_v20 = vadd.f32 %v5805_v57, %v4825_v12  ;;  %v7974_v46 = vpop.f32.mrb[25].mxu1 }
0x1814   : > { %v5808_v10 = vpop.f32.mrb[26].mxu1 }
0x1815   : > { %v10562_v32 = vadd.f32 %v5826_v20, %v9852_v7  ;;  %v5827_v42 = vadd.f32 %v5808_v10, %v4826_v11  ;;  %v7975_v8 = vpop.f32.mrb[27].mxu1 }
0x1817   : > { %v10565_v18 = vadd.f32 %v5827_v42, %v9855_v3  ;;  %v5862_v43 = vsel %vm925_vm1, %v10562_v32, 0.0 }
0x1818   : > { %5863 = vadd.xlane.f32.xlu0 %v5862_v43 }
0x1819   : > { %v5865_v61 = vsel %vm925_vm1, %v10565_v18, 0.0 }
0x181a   : > { %5866 = vadd.xlane.f32.xlu1 %v5865_v61  ;;  %v5813_v41 = vpop.f32.mrb[28].mxu1 }
0x181b   : > { %v5828_v7 = vadd.f32 %v5813_v41, %v4827_v35  ;;  %v7978_v49 = vpop.f32.mrb[29].mxu1 }
0x181c   : > { %v5816_v22 = vpop.f32.mrb[30].mxu1 }
0x181d   : > { %v10574_v2 = vadd.f32 %v5828_v7, %v9862_v60  ;;  %v5829_v3 = vadd.f32 %v5816_v22, %v4828_v54  ;;  %v7979_v34 = vpop.f32.mrb[31].mxu1 }
0x181f   : > { %v10577_v50 = vadd.f32 %v5829_v3, %v9865_v47  ;;  %v5868_v25 = vsel %vm925_vm1, %v10574_v2, 0.0  ;;  %v8261_v3 = vld [vmem:[%s10897_s17 + $0x10] sm:$0xff]  }
0x1820   : > { %5869 = vadd.xlane.f32.xlu0 %v5868_v25  ;;  %7981 = vmatpush3.bf16.msra.mxu0 %v8261_v3  ;;  %v8262_v25 = vld [vmem:[%s10897_s17 + $0x18] sm:$0xff]  }
0x1821   : > { %v5871_v5 = vsel %vm925_vm1, %v10577_v50, 0.0  ;;  %7982 = vmatprep.subr.bf16.mxu0 %v8556_v17 }
0x1822   : > { %5872 = vadd.xlane.f32.xlu1 %v5871_v5 }
0x1824   : > { %7983 = vmatpush3.bf16.msra.mxu0 %v8262_v25 }
0x188d   : > { %v5846_v29 = vpop.xlane.xlu0 %5845 }
0x188e   : > { %v5874_v24 = vmul.f32 0.03125, %v5846_v29 }
0x188f   : > { %v5849_v13 = vpop.xlane.xlu1 %5848 }
0x1890   : > { %v10584_v4 = vsub.f32 %v10526_v48, %v5874_v24  ;;  %v5875_v60 = vmul.f32 0.03125, %v5849_v13 }
0x1892   : > { %v10587_v33 = vsub.f32 %v10529_v14, %v5875_v60  ;;  %v5894_v47 = vmul.f32 %v10584_v4, %v10584_v4 }
0x1894   : > { %v5904_v28 = vsel %vm925_vm1, %v5894_v47, 0.0  ;;  %v5895_v37 = vmul.f32 %v10587_v33, %v10587_v33 }
0x1895   : > { %v5852_v9 = vpop.xlane.xlu0 %5851  ;;  %5905 = vadd.xlane.f32.xlu0 %v5904_v28 }
0x1896   : > { %v5876_v52 = vmul.f32 0.03125, %v5852_v9  ;;  %v5907_v21 = vsel %vm925_vm1, %v5895_v37, 0.0 }
0x1897   : > { %v5855_v58 = vpop.xlane.xlu1 %5854  ;;  %5908 = vadd.xlane.f32.xlu1 %v5907_v21 }
0x1898   : > { %v10596_v40 = vsub.f32 %v10538_v45, %v5876_v52  ;;  %v5877_v44 = vmul.f32 0.03125, %v5855_v58 }
0x189a   : > { %v10599_v36 = vsub.f32 %v10541_v63, %v5877_v44  ;;  %v5896_v39 = vmul.f32 %v10596_v40, %v10596_v40 }
0x189c   : > { %v5910_v59 = vsel %vm925_vm1, %v5896_v39, 0.0  ;;  %v5897_v38 = vmul.f32 %v10599_v36, %v10599_v36  ;;  %v10653_v39 = vld [vmem:[%s10895_s15 + $0x1] ss:$0 sm:$0xff] }
0x189d   : > { %v5858_v23 = vpop.xlane.xlu0 %5857  ;;  %5911 = vadd.xlane.f32.xlu0 %v5910_v59 }
0x189e   : > { %v5878_v30 = vmul.f32 0.03125, %v5858_v23  ;;  %v5913_v51 = vsel %vm925_vm1, %v5897_v38, 0.0 }
0x189f   : > { %v5861_v26 = vpop.xlane.xlu1 %5860  ;;  %5914 = vadd.xlane.f32.xlu1 %v5913_v51 }
0x18a0   : > { %v10608_v56 = vsub.f32 %v10550_v6, %v5878_v30  ;;  %v5879_v16 = vmul.f32 0.03125, %v5861_v26 }
0x18a2   : > { %v10611_v62 = vsub.f32 %v10553_v1, %v5879_v16  ;;  %v5898_v31 = vmul.f32 %v10608_v56, %v10608_v56 }
0x18a4   : > { %v5916_v55 = vsel %vm925_vm1, %v5898_v31, 0.0  ;;  %v5899_v15 = vmul.f32 %v10611_v62, %v10611_v62  ;;  %v10661_v31 = vld [vmem:[%s10896_s16 + $0x1] ss:$0 sm:$0xff] }
0x18a5   : > { %v5864_v0 = vpop.xlane.xlu0 %5863  ;;  %5917 = vadd.xlane.f32.xlu0 %v5916_v55 }
0x18a6   : > { %v5880_v27 = vmul.f32 0.03125, %v5864_v0  ;;  %v5919_v19 = vsel %vm925_vm1, %v5899_v15, 0.0 }
0x18a7   : > { %v5867_v12 = vpop.xlane.xlu1 %5866  ;;  %5920 = vadd.xlane.f32.xlu1 %v5919_v19 }
0x18a8   : > { %v10620_v53 = vsub.f32 %v10562_v32, %v5880_v27  ;;  %v5881_v57 = vmul.f32 0.03125, %v5867_v12 }
0x18aa   : > { %v10623_v11 = vsub.f32 %v10565_v18, %v5881_v57  ;;  %v5900_v20 = vmul.f32 %v10620_v53, %v10620_v53 }
0x18ac   : > { %v5922_v46 = vsel %vm925_vm1, %v5900_v20, 0.0  ;;  %v5901_v10 = vmul.f32 %v10623_v11, %v10623_v11 }
0x18ad   : > { %5923 = vadd.xlane.f32.xlu0 %v5922_v46  ;;  %v5870_v42 = vpop.xlane.xlu0 %5869 }
0x18ae   : > { %v5882_v8 = vmul.f32 0.03125, %v5870_v42  ;;  %v5925_v43 = vsel %vm925_vm1, %v5901_v10, 0.0 }
0x18af   : > { %5926 = vadd.xlane.f32.xlu1 %v5925_v43  ;;  %v5873_v35 = vpop.xlane.xlu1 %5872 }
0x18b0   : > { %v10632_v61 = vsub.f32 %v10574_v2, %v5882_v8  ;;  %v5883_v41 = vmul.f32 0.03125, %v5873_v35 }
0x18b2   : > { %v10635_v54 = vsub.f32 %v10577_v50, %v5883_v41  ;;  %v5902_v7 = vmul.f32 %v10632_v61, %v10632_v61 }
0x18b4   : > { %v5928_v49 = vsel %vm925_vm1, %v5902_v7, 0.0  ;;  %v5903_v22 = vmul.f32 %v10635_v54, %v10635_v54 }
0x18b5   : > { %5929 = vadd.xlane.f32.xlu0 %v5928_v49 }
0x18b6   : > { %v5931_v34 = vsel %vm925_vm1, %v5903_v22, 0.0 }
0x18b7   : > { %5932 = vadd.xlane.f32.xlu1 %v5931_v34 }
0x1922   : > { %v5906_v5 = vpop.xlane.xlu0 %5905 }
0x1923   : > { %v5934_v29 = vmul.f32 0.03125, %v5906_v5 }
0x1924   : > { %v5909_v24 = vpop.xlane.xlu1 %5908 }
0x1925   : > { %v5944_v13 = vadd.f32 1e-06, %v5934_v29  ;;  %v5935_v60 = vmul.f32 0.03125, %v5909_v24 }
0x1927   : > { %8507 = vrsqrt.f32 %v5944_v13  ;;  %v5945_v47 = vadd.f32 1e-06, %v5935_v60 }
0x1929   : > { %8509 = vrsqrt.f32 %v5945_v47 }
0x192a   : > { %v5912_v28 = vpop.xlane.xlu0 %5911 }
0x192b   : > { %v5936_v37 = vmul.f32 0.03125, %v5912_v28 }
0x192c   : > { %v5915_v9 = vpop.xlane.xlu1 %5914 }
0x192d   : > { %v5946_v52 = vadd.f32 1e-06, %v5936_v37  ;;  %v5937_v21 = vmul.f32 0.03125, %v5915_v9 }
0x192f   : > { %8511 = vrsqrt.f32 %v5946_v52  ;;  %v5947_v58 = vadd.f32 1e-06, %v5937_v21 }
0x1931   : > { %v8508_v44 = vpop.eup %8507  ;;  %8513 = vrsqrt.f32 %v5947_v58 }
0x1932   : > { %v5964_v59 = vmul.f32 %v8508_v44, %v10584_v4  ;;  %v5918_v38 = vpop.xlane.xlu0 %5917 }
0x1933   : > { %v8510_v23 = vpop.eup %8509  ;;  %v5938_v30 = vmul.f32 0.03125, %v5918_v38 }
0x1934   : > { %v5980_v51 = vmul.f32 %v10653_v39, %v5964_v59  ;;  %v5965_v26 = vmul.f32 %v8510_v23, %v10587_v33  ;;  %v5921_v16 = vpop.xlane.xlu1 %5920 }
0x1935   : > { %v5948_v55 = vadd.f32 1e-06, %v5938_v30  ;;  %v5939_v15 = vmul.f32 0.03125, %v5921_v16 }
0x1936   : > { %v5981_v0 = vmul.f32 %v10653_v39, %v5965_v26  ;;  %v5996_v4 = vadd.f32 %v10661_v31, %v5980_v51 }
0x1937   : > { %8515 = vrsqrt.f32 %v5948_v55  ;;  %v5949_v27 = vadd.f32 1e-06, %v5939_v15 }
0x1938   : > { %v5997_v19 = vadd.f32 %v10661_v31, %v5981_v0 }
0x1939   : > { %v8512_v12 = vpop.eup %8511  ;;  %8517 = vrsqrt.f32 %v5949_v27 }
0x193a   : > { %v5966_v33 = vmul.f32 %v8512_v12, %v10596_v40  ;;  %v5924_v57 = vpop.xlane.xlu0 %5923  ;;  %v6006_v20 = vpack.c.bf16 %v5997_v19, %v5996_v4  ;;  %v10723_v12 = vld [vmem:[%s10898_s18 + $0x1] ss:$0 sm:$0xff] }
0x193b   : > { %v8514_v46 = vpop.eup %8513  ;;  %v5940_v10 = vmul.f32 0.03125, %v5924_v57 }
0x193c   : > { %v5982_v42 = vmul.f32 %v10653_v39, %v5966_v33  ;;  %v5967_v8 = vmul.f32 %v8514_v46, %v10599_v36  ;;  %7985 = vmatmul.mubr.msk.bf16.vlgmr.msra.gmra.mrb[252].mxu0 %vm925_vm1, %v6006_v20  ;;  %v5927_v43 = vpop.xlane.xlu1 %5926 }
0x193d   : > { %v5950_v35 = vadd.f32 1e-06, %v5940_v10  ;;  %v5941_v41 = vmul.f32 0.03125, %v5927_v43  ;;  %7988 = vmatprep.mubr.msk.bf16.mxu0 %vm8557_vm2, %v8556_v17 }
0x193e   : > { %v5983_v7 = vmul.f32 %v10653_v39, %v5967_v8  ;;  %v5998_v49 = vadd.f32 %v10661_v31, %v5982_v42 }
0x193f   : > { %8519 = vrsqrt.f32 %v5950_v35  ;;  %v5951_v40 = vadd.f32 1e-06, %v5941_v41 }
0x1940   : > { %v5999_v22 = vadd.f32 %v10661_v31, %v5983_v7 }
0x1941   : > { %v8516_v3 = vpop.eup %8515  ;;  %8521 = vrsqrt.f32 %v5951_v40 }
0x1942   : > { %v6007_v34 = vpack.c.bf16 %v5999_v22, %v5998_v49  ;;  %v5968_v36 = vmul.f32 %v8516_v3, %v10608_v56  ;;  %v5930_v25 = vpop.xlane.xlu0 %5929 }
0x1943   : > { %v8518_v5 = vpop.eup %8517  ;;  %v5942_v29 = vmul.f32 0.03125, %v5930_v25 }
0x1944   : > { %v5984_v24 = vmul.f32 %v10653_v39, %v5968_v36  ;;  %v5969_v13 = vmul.f32 %v8518_v5, %v10611_v62  ;;  %7989 = vmatmul.mubr.msk.bf16.gmra.mrb[0].mxu0 %vm925_vm1, %v6007_v34  ;;  %v5933_v60 = vpop.xlane.xlu1 %5932 }
0x1945   : > { %v5952_v47 = vadd.f32 1e-06, %v5942_v29  ;;  %v5943_v28 = vmul.f32 0.03125, %v5933_v60  ;;  %7992 = vmatprep.mubr.msk.bf16.mxu0 %vm8557_vm2, %v8556_v17 }
0x1946   : > { %v5985_v37 = vmul.f32 %v10653_v39, %v5969_v13  ;;  %v6000_v56 = vadd.f32 %v10661_v31, %v5984_v24 }
0x1947   : > { %8523 = vrsqrt.f32 %v5952_v47  ;;  %v5953_v9 = vadd.f32 1e-06, %v5943_v28 }
0x1948   : > { %v6001_v52 = vadd.f32 %v10661_v31, %v5985_v37 }
0x1949   : > { %v8520_v21 = vpop.eup %8519  ;;  %8525 = vrsqrt.f32 %v5953_v9 }
0x194a   : > { %v6008_v58 = vpack.c.bf16 %v6001_v52, %v6000_v56  ;;  %v5970_v62 = vmul.f32 %v8520_v21, %v10620_v53 }
0x194b   : > { %v8522_v44 = vpop.eup %8521 }
0x194c   : > { %v5986_v59 = vmul.f32 %v10653_v39, %v5970_v62  ;;  %v5971_v38 = vmul.f32 %v8522_v44, %v10623_v11  ;;  %7993 = vmatmul.mubr.msk.bf16.gmra.mrb[4].mxu0 %vm925_vm1, %v6008_v58 }
0x194d   : > { %7996 = vmatprep.mubr.msk.bf16.mxu0 %vm8557_vm2, %v8556_v17 }
0x194e   : > { %v5987_v23 = vmul.f32 %v10653_v39, %v5971_v38  ;;  %v6002_v30 = vadd.f32 %v10661_v31, %v5986_v59 }
0x1950   : > { %v6003_v51 = vadd.f32 %v10661_v31, %v5987_v23 }
0x1951   : > { %v8524_v26 = vpop.eup %8523 }
0x1952   : > { %v6009_v16 = vpack.c.bf16 %v6003_v51, %v6002_v30  ;;  %v5972_v53 = vmul.f32 %v8524_v26, %v10632_v61  ;;  %v8263_v61 = vld [vmem:[%s10899_s19 + $0x20] sm:$0xff]  }
0x1953   : > { %v8526_v55 = vpop.eup %8525  ;;  %8005 = vmatpush3.bf16.msra.mxu1 %v8263_v61 }
0x1954   : > { %v5988_v15 = vmul.f32 %v10653_v39, %v5972_v53  ;;  %v5973_v11 = vmul.f32 %v8526_v55, %v10635_v54  ;;  %7997 = vmatmul.mubr.msk.bf16.gmra.mrb[8].mxu0 %vm925_vm1, %v6009_v16  ;;  %8006 = vmatprep.subr.bf16.mxu1 %v8556_v17  ;;  %v8264_v54 = vld [vmem:[%s10899_s19 + $0x28] sm:$0xff]  }
0x1955   : > { %8000 = vmatprep.mubr.msk.bf16.mxu0 %vm8557_vm2, %v8556_v17 }
0x1956   : > { %v5989_v0 = vmul.f32 %v10653_v39, %v5973_v11  ;;  %v6004_v27 = vadd.f32 %v10661_v31, %v5988_v15  ;;  %v8265_v39 = vld [vmem:[%s10899_s19 + $0x30] sm:$0xff]  }
0x1957   : > { %8007 = vmatpush3.bf16.msra.mxu1 %v8264_v54 }
0x1958   : > { %v6005_v4 = vadd.f32 %v10661_v31, %v5989_v0  ;;  %8008 = vmatprep.subr.bf16.mxu1 %v8556_v17  ;;  %v8266_v31 = vld [vmem:[%s10899_s19 + $0x38] sm:$0xff]  }
0x195a   : > { %v6010_v19 = vpack.c.bf16 %v6005_v4, %v6004_v27 }
0x195b   : > { %8009 = vmatpush3.bf16.msra.mxu1 %v8265_v39 }
0x195c   : > { %8001 = vmatmul.mubr.msk.bf16.gmra.mrb[12].mxu0 %vm925_vm1, %v6010_v19  ;;  %8010 = vmatprep.subr.bf16.mxu1 %v8556_v17 }
0x195d   : > { %8052 = vmatprep.mubr.msk.f32.mxu0 %vm8557_vm2, %v8556_v17 }
0x195f   : > { %8011 = vmatpush3.bf16.msra.mxu1 %v8266_v31 }
0x1a0f   : > { %v6085_v33 = vpop.f32.mrb[252].mxu0 }
0x1a10   : > { %v10726_v57 = vadd.f32 %v10723_v12, %v6085_v33  ;;  %v7986_v20 = vpop.f32.mrb[253].mxu0 }
0x1a11   : > { %v6088_v46 = vpop.f32.mrb[254].mxu0 }
0x1a12   : > { %v6124_v10 = vmul.f32 %v10726_v57, %v10726_v57  ;;  %v10731_v42 = vadd.f32 %v10723_v12, %v6088_v46  ;;  %v7987_v8 = vpop.f32.mrb[255].mxu0 }
0x1a14   : > { %v6134_v43 = vmul.f32 %v6124_v10, %v10726_v57  ;;  %v6125_v35 = vmul.f32 %v10731_v42, %v10731_v42 }
0x1a16   : > { %v6144_v41 = vmul.f32 0.044715, %v6134_v43  ;;  %v6135_v7 = vmul.f32 %v6125_v35, %v10731_v42 }
0x1a17   : > { %v6093_v40 = vpop.f32.mrb[0].mxu0 }
0x1a18   : > { %v6154_v49 = vadd.f32 %v6144_v41, %v10726_v57  ;;  %v6145_v22 = vmul.f32 0.044715, %v6135_v7  ;;  %v10739_v3 = vadd.f32 %v10723_v12, %v6093_v40  ;;  %v7990_v34 = vpop.f32.mrb[1].mxu0 }
0x1a19   : > { %v6096_v36 = vpop.f32.mrb[2].mxu0 }
0x1a1a   : > { %v6164_v25 = vmul.f32 0.7978846, %v6154_v49  ;;  %v6155_v5 = vadd.f32 %v6145_v22, %v10731_v42  ;;  %v6126_v29 = vmul.f32 %v10739_v3, %v10739_v3  ;;  %v10745_v24 = vadd.f32 %v10723_v12, %v6096_v36  ;;  %v7991_v13 = vpop.f32.mrb[3].mxu0 }
0x1a1c   : > { %8527 = vtanh.f32 %v6164_v25  ;;  %v6165_v60 = vmul.f32 0.7978846, %v6155_v5  ;;  %v6136_v47 = vmul.f32 %v6126_v29, %v10739_v3  ;;  %v6127_v28 = vmul.f32 %v10745_v24, %v10745_v24 }
0x1a1e   : > { %8529 = vtanh.f32 %v6165_v60  ;;  %v6146_v37 = vmul.f32 0.044715, %v6136_v47  ;;  %v6137_v9 = vmul.f32 %v6127_v28, %v10745_v24 }
0x1a1f   : > { %v6101_v56 = vpop.f32.mrb[4].mxu0 }
0x1a20   : > { %v6156_v52 = vadd.f32 %v6146_v37, %v10739_v3  ;;  %v6147_v21 = vmul.f32 0.044715, %v6137_v9  ;;  %v10753_v58 = vadd.f32 %v10723_v12, %v6101_v56  ;;  %v7994_v62 = vpop.f32.mrb[5].mxu0 }
0x1a21   : > { %v6104_v44 = vpop.f32.mrb[6].mxu0 }
0x1a22   : > { %v6166_v59 = vmul.f32 0.7978846, %v6156_v52  ;;  %v6157_v38 = vadd.f32 %v6147_v21, %v10745_v24  ;;  %v6128_v23 = vmul.f32 %v10753_v58, %v10753_v58  ;;  %v10759_v30 = vadd.f32 %v10723_v12, %v6104_v44  ;;  %v7995_v51 = vpop.f32.mrb[7].mxu0 }
0x1a24   : > { %8531 = vtanh.f32 %v6166_v59  ;;  %v6167_v26 = vmul.f32 0.7978846, %v6157_v38  ;;  %v6138_v16 = vmul.f32 %v6128_v23, %v10753_v58  ;;  %v6129_v53 = vmul.f32 %v10759_v30, %v10759_v30 }
0x1a26   : > { %v8528_v55 = vpop.eup %8527  ;;  %8533 = vtanh.f32 %v6167_v26  ;;  %v6148_v15 = vmul.f32 0.044715, %v6138_v16  ;;  %v6139_v11 = vmul.f32 %v6129_v53, %v10759_v30 }
0x1a27   : > { %v6184_v0 = vadd.f32 1.0, %v8528_v55  ;;  %v6109_v27 = vpop.f32.mrb[8].mxu0 }
0x1a28   : > { %v8530_v4 = vpop.eup %8529  ;;  %v6158_v19 = vadd.f32 %v6148_v15, %v10753_v58  ;;  %v6149_v61 = vmul.f32 0.044715, %v6139_v11  ;;  %v10767_v54 = vadd.f32 %v10723_v12, %v6109_v27  ;;  %v7998_v39 = vpop.f32.mrb[9].mxu0 }
0x1a29   : > { %v6194_v31 = vmul.f32 0.5, %v6184_v0  ;;  %v6185_v33 = vadd.f32 1.0, %v8530_v4  ;;  %v6112_v20 = vpop.f32.mrb[10].mxu0 }
0x1a2a   : > { %v6168_v46 = vmul.f32 0.7978846, %v6158_v19  ;;  %v6159_v10 = vadd.f32 %v6149_v61, %v10759_v30  ;;  %v6130_v8 = vmul.f32 %v10767_v54, %v10767_v54  ;;  %v10773_v43 = vadd.f32 %v10723_v12, %v6112_v20  ;;  %v7999_v35 = vpop.f32.mrb[11].mxu0 }
0x1a2b   : > { %v6195_v41 = vmul.f32 0.5, %v6185_v33  ;;  %v6204_v22 = vmul.f32 %v6194_v31, %v10726_v57 }
0x1a2c   : > { %8535 = vtanh.f32 %v6168_v46  ;;  %v6169_v7 = vmul.f32 0.7978846, %v6159_v10  ;;  %v6140_v40 = vmul.f32 %v6130_v8, %v10767_v54  ;;  %v6131_v49 = vmul.f32 %v10773_v43, %v10773_v43 }
0x1a2d   : > { %v6205_v34 = vmul.f32 %v6195_v41, %v10731_v42 }
0x1a2e   : > { %v8532_v36 = vpop.eup %8531  ;;  %8537 = vtanh.f32 %v6169_v7  ;;  %v6150_v25 = vmul.f32 0.044715, %v6140_v40  ;;  %v6141_v5 = vmul.f32 %v6131_v49, %v10773_v43 }
0x1a2f   : > { %v6214_v29 = vpack.c.bf16 %v6205_v34, %v6204_v22  ;;  %v6186_v13 = vadd.f32 1.0, %v8532_v36  ;;  %v6117_v60 = vpop.f32.mrb[12].mxu0 }
0x1a30   : > { %v8534_v47 = vpop.eup %8533  ;;  %v6160_v28 = vadd.f32 %v6150_v25, %v10767_v54  ;;  %v6151_v37 = vmul.f32 0.044715, %v6141_v5  ;;  %v6118_v9 = vadd.f32 %v10723_v12, %v6117_v60  ;;  %v8002_v56 = vpop.f32.mrb[13].mxu0 }
0x1a31   : > { %v6196_v52 = vmul.f32 0.5, %v6186_v13  ;;  %v6187_v21 = vadd.f32 1.0, %v8534_v47  ;;  %v6120_v57 = vpop.f32.mrb[14].mxu0  ;;  %8013 = vmatmul.mubr.msk.bf16.vlgmr.msra.gmra.mrb[32].mxu1 %vm814_vm0, %v6214_v29 }
0x1a32   : > { %v6170_v42 = vmul.f32 0.7978846, %v6160_v28  ;;  %v6161_v62 = vadd.f32 %v6151_v37, %v10773_v43  ;;  %v6132_v44 = vmul.f32 %v6118_v9, %v6118_v9  ;;  %v6121_v59 = vadd.f32 %v10723_v12, %v6120_v57  ;;  %v8003_v38 = vpop.f32.mrb[15].mxu0  ;;  %8016 = vmatprep.mubr.msk.bf16.mxu1 %vm8557_vm2, %v8556_v17 }
0x1a33   : > { %v6197_v23 = vmul.f32 0.5, %v6187_v21  ;;  %v6206_v53 = vmul.f32 %v6196_v52, %v10739_v3 }
0x1a34   : > { %8539 = vtanh.f32 %v6170_v42  ;;  %v6171_v51 = vmul.f32 0.7978846, %v6161_v62  ;;  %v6142_v26 = vmul.f32 %v6132_v44, %v6118_v9  ;;  %v6133_v16 = vmul.f32 %v6121_v59, %v6121_v59 }
0x1a35   : > { %v6207_v55 = vmul.f32 %v6197_v23, %v10745_v24 }
0x1a36   : > { %v8536_v15 = vpop.eup %8535  ;;  %8541 = vtanh.f32 %v6171_v51  ;;  %v6152_v11 = vmul.f32 0.044715, %v6142_v26  ;;  %v6143_v0 = vmul.f32 %v6133_v16, %v6121_v59 }
0x1a37   : > { %v6215_v27 = vpack.c.bf16 %v6207_v55, %v6206_v53  ;;  %v6188_v4 = vadd.f32 1.0, %v8536_v15 }
0x1a38   : > { %v8538_v12 = vpop.eup %8537  ;;  %v6162_v19 = vadd.f32 %v6152_v11, %v6118_v9  ;;  %v6153_v61 = vmul.f32 0.044715, %v6143_v0 }
0x1a39   : > { %v6198_v39 = vmul.f32 0.5, %v6188_v4  ;;  %v6189_v31 = vadd.f32 1.0, %v8538_v12  ;;  %8017 = vmatmul.mubr.msk.bf16.gmra.mrb[36].mxu1 %vm814_vm0, %v6215_v27 }
0x1a3a   : > { %v6172_v33 = vmul.f32 0.7978846, %v6162_v19  ;;  %v6163_v20 = vadd.f32 %v6153_v61, %v6121_v59  ;;  %8020 = vmatprep.mubr.msk.bf16.mxu1 %vm8557_vm2, %v8556_v17 }
0x1a3b   : > { %v6199_v3 = vmul.f32 0.5, %v6189_v31  ;;  %v6208_v46 = vmul.f32 %v6198_v39, %v10753_v58 }
0x1a3c   : > { %8543 = vtanh.f32 %v6172_v33  ;;  %v6173_v24 = vmul.f32 0.7978846, %v6163_v20 }
0x1a3d   : > { %v6209_v10 = vmul.f32 %v6199_v3, %v10759_v30 }
0x1a3e   : > { %v8540_v8 = vpop.eup %8539  ;;  %8545 = vtanh.f32 %v6173_v24 }
0x1a3f   : > { %v6216_v35 = vpack.c.bf16 %v6209_v10, %v6208_v46  ;;  %v6190_v41 = vadd.f32 1.0, %v8540_v8 }
0x1a40   : > { %v8542_v7 = vpop.eup %8541 }
0x1a41   : > { %v6200_v40 = vmul.f32 0.5, %v6190_v41  ;;  %v6191_v49 = vadd.f32 1.0, %v8542_v7  ;;  %8021 = vmatmul.mubr.msk.bf16.gmra.mrb[40].mxu1 %vm814_vm0, %v6216_v35 }
0x1a42   : > { %8024 = vmatprep.mubr.msk.bf16.mxu1 %vm8557_vm2, %v8556_v17 }
0x1a43   : > { %v6201_v22 = vmul.f32 0.5, %v6191_v49  ;;  %v6210_v34 = vmul.f32 %v6200_v40, %v10767_v54  ;;  %v8558_v54 = vmov 0.0|0.0  }
0x1a44   : > { %8124 = vmatprep.subr.bf16.mxu0 %v8558_v54  ;;  %8154 = vmatprep.subr.bf16.mxu1 %v8558_v54 }
0x1a45   : > { %v6211_v36 = vmul.f32 %v6201_v22, %v10773_v43  ;;  %v7029_v43 = vld [vmem:[%s10900_s20 + $0x1] ss:$0 sm:$0xff]  ;;  %v7042_v22 = vld [vmem:[%s10923_s27 + $0x10] sm:$0x1f] }
0x1a46   : > { %v8544_v58 = vpop.eup %8543 }
0x1a47   : > { %v6217_v25 = vpack.c.bf16 %v6211_v36, %v6210_v34  ;;  %v6192_v30 = vadd.f32 1.0, %v8544_v58 }
0x1a48   : > { %v8546_v5 = vpop.eup %8545 }
0x1a49   : > { %v6202_v29 = vmul.f32 0.5, %v6192_v30  ;;  %v6193_v13 = vadd.f32 1.0, %v8546_v5  ;;  %8025 = vmatmul.mubr.msk.bf16.gmra.mrb[44].mxu1 %vm814_vm0, %v6217_v25 }
0x1a4a   : > { %8028 = vmatprep.mubr.msk.bf16.mxu1 %vm8557_vm2, %v8556_v17 }
0x1a4b   : > { %v6203_v60 = vmul.f32 0.5, %v6193_v13  ;;  %v6212_v47 = vmul.f32 %v6202_v29, %v6118_v9 }
0x1a4d   : > { %v6213_v28 = vmul.f32 %v6203_v60, %v6121_v59 }
0x1a4f   : > { %v6218_v37 = vpack.c.bf16 %v6213_v28, %v6212_v47 }
0x1a51   : > { %8029 = vmatmul.mubr.msk.bf16.gmra.mrb[48].mxu1 %vm814_vm0, %v6218_v37 }
0x1a52   : > { %8098 = vmatprep.mubr.msk.f32.mxu1 %vm8557_vm2, %v8556_v17 }
0x1b04   : > { %v6309_v56 = vpop.f32.mrb[32].mxu1 }
0x1b05   : > { %v6310_v52 = vadd.f32 %v7029_v43, %v6309_v56  ;;  %v8014_v21 = vpop.f32.mrb[33].mxu1 }
0x1b06   : > { %v6312_v9 = vpop.f32.mrb[34].mxu1 }
0x1b07   : > { %v6313_v57 = vadd.f32 %v7029_v43, %v6312_v9  ;;  %v8015_v42 = vpop.f32.mrb[35].mxu1  ;;  %v6348_v62 = vadd.f32 %v6310_v52, %v10526_v48 }
0x1b09   : > { %v6349_v44 = vadd.f32 %v6313_v57, %v10529_v14 }
0x1b0b   : > { %v10813_v59 = vpack.c.bf16 %v6349_v44, %v6348_v62 }
0x1b0c   : > { %v6317_v38 = vpop.f32.mrb[36].mxu1 }
0x1b0d   : > { %v6318_v23 = vadd.f32 %v7029_v43, %v6317_v38  ;;  %v8018_v51 = vpop.f32.mrb[37].mxu1  ;;  %8126 = vmatpush3.bf16.msra.mxu0 %v10813_v59  ;;  %8156 = vmatpush3.bf16.msra.mxu1 %v10813_v59 }
0x1b0e   : > { %v6320_v26 = vpop.f32.mrb[38].mxu1  ;;  %8127 = vmatprep.subr.bf16.mxu0 %v8558_v54  ;;  %8157 = vmatprep.subr.bf16.mxu1 %v8558_v54 }
0x1b0f   : > { %v6321_v16 = vadd.f32 %v7029_v43, %v6320_v26  ;;  %v8019_v53 = vpop.f32.mrb[39].mxu1  ;;  %v6350_v48 = vadd.f32 %v6318_v23, %v10538_v45 }
0x1b11   : > { %v6351_v14 = vadd.f32 %v6321_v16, %v10541_v63 }
0x1b13   : > { %v10821_v55 = vpack.c.bf16 %v6351_v14, %v6350_v48 }
0x1b14   : > { %v6325_v15 = vpop.f32.mrb[40].mxu1 }
0x1b15   : > { %v6326_v11 = vadd.f32 %v7029_v43, %v6325_v15  ;;  %v8022_v0 = vpop.f32.mrb[41].mxu1  ;;  %8129 = vmatpush3.bf16.msra.mxu0 %v10821_v55  ;;  %8159 = vmatpush3.bf16.msra.mxu1 %v10821_v55 }
0x1b16   : > { %v6328_v27 = vpop.f32.mrb[42].mxu1  ;;  %8130 = vmatprep.subr.bf16.mxu0 %v8558_v54  ;;  %8160 = vmatprep.subr.bf16.mxu1 %v8558_v54 }
0x1b17   : > { %v6329_v4 = vadd.f32 %v7029_v43, %v6328_v27  ;;  %v8023_v12 = vpop.f32.mrb[43].mxu1  ;;  %v6352_v45 = vadd.f32 %v6326_v11, %v10550_v6 }
0x1b19   : > { %v6353_v63 = vadd.f32 %v6329_v4, %v10553_v1 }
0x1b1b   : > { %v8131_v19 = vpack.c.bf16 %v6353_v63, %v6352_v45 }
0x1b1c   : > { %v6333_v61 = vpop.f32.mrb[44].mxu1 }
0x1b1d   : > { %v6334_v39 = vadd.f32 %v7029_v43, %v6333_v61  ;;  %v8026_v31 = vpop.f32.mrb[45].mxu1  ;;  %8132 = vmatpush3.bf16.msra.mxu0 %v8131_v19  ;;  %8162 = vmatpush3.bf16.msra.mxu1 %v8131_v19 }
0x1b1e   : > { %v6336_v33 = vpop.f32.mrb[46].mxu1  ;;  %8133 = vmatprep.subr.bf16.mxu0 %v8558_v54  ;;  %8163 = vmatprep.subr.bf16.mxu1 %v8558_v54 }
0x1b1f   : > { %v6337_v20 = vadd.f32 %v7029_v43, %v6336_v33  ;;  %v8027_v3 = vpop.f32.mrb[47].mxu1  ;;  %v6354_v24 = vadd.f32 %v6334_v39, %v10562_v32 }
0x1b21   : > { %v6355_v46 = vadd.f32 %v6337_v20, %v10565_v18  ;;  %v6358_v18 = vld [vmem:[%s10923_s27] sm:$0x1f] }
0x1b23   : > { %v8134_v6 = vpack.c.bf16 %v6355_v46, %v6354_v24 }
0x1b24   : > { %v6341_v10 = vpop.f32.mrb[48].mxu1 }
0x1b25   : > { %v6342_v1 = vadd.f32 %v7029_v43, %v6341_v10  ;;  %v8030_v8 = vpop.f32.mrb[49].mxu1  ;;  %8135 = vmatpush3.bf16.msra.mxu0 %v8134_v6  ;;  %8165 = vmatpush3.bf16.msra.mxu1 %v8134_v6 }
0x1b26   : > { %v6344_v35 = vpop.f32.mrb[50].mxu1  ;;  %8136 = vmatprep.subr.bf16.mxu0 %v8558_v54  ;;  %8166 = vmatprep.subr.bf16.mxu1 %v8558_v54 }
0x1b27   : > { %v6345_v41 = vadd.f32 %v7029_v43, %v6344_v35  ;;  %v8031_v7 = vpop.f32.mrb[51].mxu1  ;;  %v6356_v40 = vadd.f32 %v6342_v1, %v10574_v2  ;;  %v7040_v2 = vld [vmem:[%s10923_s27 + $0x8] sm:$0x1f] }
0x1b29   : > { %v6357_v49 = vadd.f32 %v6345_v41, %v10577_v50  ;;  %v7044_v50 = vld [vmem:[%s10923_s27 + $0x18] sm:$0x1f] }
0x1b2b   : > { %v8137_v32 = vpack.c.bf16 %v6357_v49, %v6356_v40 }
0x1b2d   : > { %8138 = vmatpush3.bf16.msra.mxu0 %v8137_v32  ;;  %8168 = vmatpush3.bf16.msra.mxu1 %v8137_v32 }
0x1b2e   : > { %8139 = vmatprep.subr.bf16.mxu0 %v8558_v54 }
0x1b30   : > { %8053 = vmatmul.mubr.msk.f32.vlgmr.msra.gmra.mrb[16].mxu0 %vm6359_vm4, %v6358_v18  ;;  %8099 = vmatmul.mubr.msk.f32.vlgmr.msra.gmra.mrb[52].mxu1 %vm6359_vm4, %v7042_v22 }
0x1b31   : > { %8141 = vmatpush3.bf16.msra.mxu0 %v10813_v59  ;;  %8075 = vmatprep.mubr.msk.f32.mxu0 %vm8557_vm2, %v8556_v17 }
0x1b32   : > { %8142 = vmatprep.subr.bf16.mxu0 %v8558_v54 }
0x1b35   : > { %8144 = vmatpush3.bf16.msra.mxu0 %v10821_v55 }
0x1b36   : > { %8145 = vmatprep.subr.bf16.mxu0 %v8558_v54 }
0x1b39   : > { %8147 = vmatpush3.bf16.msra.mxu0 %v8131_v19 }
0x1b3a   : > { %8148 = vmatprep.subr.bf16.mxu0 %v8558_v54 }
0x1b3d   : > { %8150 = vmatpush3.bf16.msra.mxu0 %v8134_v6 }
0x1b3e   : > { %8151 = vmatprep.subr.bf16.mxu0 %v8558_v54 }
0x1b41   : > { %8153 = vmatpush3.bf16.msra.mxu0 %v8137_v32 }
0x1b42   : > { %8169 = vmatprep.subr.bf16.mxu0 %v8558_v54 }
0x1b44   : > { %8076 = vmatmul.mubr.msk.f32.vlgmr.msra.gmra.mrb[18].mxu0 %vm6359_vm4, %v7040_v2 }
0x1b45   : > { %8171 = vmatpush3.bf16.msra.mxu0 %v10813_v59  ;;  %8121 = vmatprep.mubr.msk.f32.mxu0 %vm8557_vm2, %v8556_v17 }
0x1b46   : > { %8172 = vmatprep.subr.bf16.mxu0 %v8558_v54 }
0x1b49   : > { %8174 = vmatpush3.bf16.msra.mxu0 %v10821_v55 }
0x1b4a   : > { %8175 = vmatprep.subr.bf16.mxu0 %v8558_v54 }
0x1b4d   : > { %8177 = vmatpush3.bf16.msra.mxu0 %v8131_v19 }
0x1b4e   : > { %8178 = vmatprep.subr.bf16.mxu0 %v8558_v54 }
0x1b51   : > { %8180 = vmatpush3.bf16.msra.mxu0 %v8134_v6 }
0x1b52   : > { %8181 = vmatprep.subr.bf16.mxu0 %v8558_v54 }
0x1b55   : > { %8183 = vmatpush3.bf16.msra.mxu0 %v8137_v32 }
0x1b58   : > { %8122 = vmatmul.mubr.msk.f32.vlgmr.msra.gmra.mrb[20].mxu0 %vm6359_vm4, %v7044_v50 }
0x1c03   : > { %v6429_v17 = vpop.f32.mrb[16].mxu0  ;;  %v6579_v34 = vpop.f32.mrb[52].mxu1 }
0x1c04   : > { %v8054_v36 = vpop.f32.mrb[17].mxu0  ;;  %6663 = vrot.lane.b32.xlu1 %v6579_v34, %s8559_s22  ;;  %v8100_v58 = vpop.f32.mrb[53].mxu1 }
0x1c17   : > { %v6504_v25 = vpop.f32.mrb[18].mxu0 }
0x1c18   : > { %6659 = vrot.lane.b32.xlu0 %v6504_v25, %s8560_s23  ;;  %v8077_v30 = vpop.f32.mrb[19].mxu0 }
0x1c2b   : > { %v6654_v5 = vpop.f32.mrb[20].mxu0 }
0x1c2c   : > { %6667 = vrot.lane.b32.xlu1 %v6654_v5, %s8561_s1  ;;  %v8123_v29 = vpop.f32.mrb[21].mxu0 }
0x1c76   : > { %v6664_v60 = vpop.permute.xlu1 %6663 }
0x1c8a   : > { %v6660_v13 = vpop.permute.xlu0 %6659 }
0x1c8b   : > { %v6670_v47 = vsel %vm925_vm1, %v6429_v17, %v6660_v13 }
0x1c8c   : > { %v6671_v28 = vsel %vm814_vm0, %v6670_v47, %v6664_v60 }
0x1c9e   : > { %v6668_v37 = vpop.permute.xlu1 %6667 }
0x1c9f   : > { %v6673_v54 = vsel %vm6672_vm5, %v6671_v28, %v6668_v37 }
0x1ca0   : > { %6674 = vst [vmem:[%s654_s0] sm:$0x1f] %v6673_v54 }
0x1ca1 PF: > { %s31_s2 = sadd.s32 1, %s8553_s2  }
0x1ca2   : > { %p28_p4 = scmp.ge.s32.totalorder %s31_s2, 4  }
0x1ca4   :  { %30 = sbr.rel (!%p28_p4) target bundleno = 7 (0x7), region = 167 }

</bundles_post_ra>
